<compile_context>
chip_gen: v6e
topology: v6e:2x2x1
jax: 0.10.0
libtpu: 0.0.40
codegen_flags: <defaults>
</compile_context>

<pallas_src>
import functools
import math

import jax
import jax.numpy as jnp
from jax.experimental import pallas as pl
from jax.experimental.pallas import tpu as pltpu

ALPHA = 0.2
F32 = jnp.float32
BF16 = jnp.bfloat16


def _leaky(v, alpha):
    return jnp.where(v > 0, v, alpha * v)


def _vmem_specs(n):
    return [pl.BlockSpec(memory_space=pltpu.MemorySpace.VMEM) for _ in range(n)]


def _block_diag(mats):
    rows = sum(m.shape[0] for m in mats)
    cols = sum(m.shape[1] for m in mats)
    out = jnp.zeros((rows, cols), F32)
    r = c = 0
    for m in mats:
        out = out.at[r:r + m.shape[0], c:c + m.shape[1]].set(m.astype(F32))
        r += m.shape[0]
        c += m.shape[1]
    return out


# -----------------------------------------------------------------------------
# Kernel 1: node/feat projections + AttributeCompletion (deep-K matmul)
#           + cmp-feat / real-feat hidden projections
# -----------------------------------------------------------------------------
def _front_kernel(node_ref, feat_ref, lbl_ref, wn_ref, bn_ref, wf_ref, bfeat_ref,
                  f1_ref, b1_ref, f2_ref, b2_ref, wblk_ref,
                  wc_ref, bc_ref, wr_ref, br_ref,
                  xcmp_ref, xlbl_ref, *, alpha, heads):
    # node_ref (N, E) bf16, feat_ref (M, E) bf16, lbl_ref (Ex, F) bf16
    nodeh = _leaky(jnp.dot(node_ref[...], wn_ref[...],
                           preferred_element_type=F32) + bn_ref[...], alpha)
    feath = _leaky(jnp.dot(feat_ref[...], wf_ref[...],
                           preferred_element_type=F32) + bfeat_ref[...], alpha)

    h1 = _leaky(jnp.dot(nodeh.astype(BF16), f1_ref[...],
                        preferred_element_type=F32) + b1_ref[...], alpha)   # (N, heads*D)
    h2 = _leaky(jnp.dot(feath.astype(BF16), f2_ref[...],
                        preferred_element_type=F32) + b2_ref[...], alpha)   # (M, heads*D)
    hw = jnp.dot(h1.astype(BF16), wblk_ref[...],
                 preferred_element_type=F32)                                # (N, heads*D)
    # mean_h (h1_h W_h) h2_h^T  ==  one deep-K NT matmul over heads*D
    cmp = jax.lax.dot_general(hw.astype(BF16), h2.astype(BF16),
                              dimension_numbers=(((1,), (1,)), ((), ())),
                              preferred_element_type=F32) * (1.0 / heads)   # (N, M)

    xcmp_ref[...] = _leaky(
        jnp.dot(_leaky(cmp, alpha).astype(BF16), wc_ref[...],
                preferred_element_type=F32) + bc_ref[...], alpha)
    xlbl_ref[...] = _leaky(
        jnp.dot(lbl_ref[...], wr_ref[...],
                preferred_element_type=F32) + br_ref[...], alpha)


# -----------------------------------------------------------------------------
# Kernel 2: one grid step = one (metapath, step); all heads via block-diag
#           packed weights; both views stacked on the row axis.
# -----------------------------------------------------------------------------
def _transformer_kernel(tx_ref, yg_ref, fcw_ref, fcb_ref,
                        qw_ref, qb_ref, kw_ref, kb_ref, vw_ref, vb_ref,
                        a1w_ref, a1b_ref, a2w_ref, a2b_ref, wt_ref,
                        ones_ref, out_ref, *, n_targets, n_neigh, alpha):
    # tx_ref: (2T, H) bf16 (constant across grid), yg_ref: (NN*2T, H) bf16
    hx = _leaky(jnp.dot(tx_ref[...], fcw_ref[...],
                        preferred_element_type=F32) + fcb_ref[...], alpha)   # (2T, hd)
    hy = _leaky(jnp.dot(yg_ref[...], fcw_ref[...],
                        preferred_element_type=F32) + fcb_ref[...], alpha)   # (NN*2T, hd)
    hd = hx.shape[-1]

    hx16 = hx.astype(BF16)
    hy16 = hy.astype(BF16)

    q = jnp.dot(hx16, qw_ref[...], preferred_element_type=F32) + qb_ref[...]
    h2 = _leaky(jnp.dot(q.astype(BF16), a2w_ref[...],
                        preferred_element_type=F32) + a2b_ref[...], alpha)
    # per head: wq_h = h2_h @ W_h^T   (block-diag of W_h^T)
    wq = jnp.dot(h2.astype(BF16), wt_ref[...], preferred_element_type=F32)   # (2T, hd)

    key = jnp.dot(hy16, kw_ref[...], preferred_element_type=F32) + kb_ref[...]
    vec = jnp.dot(hy16, vw_ref[...], preferred_element_type=F32) + vb_ref[...]
    h1 = _leaky(jnp.dot(key.astype(BF16), a1w_ref[...],
                        preferred_element_type=F32) + a1b_ref[...], alpha)   # (NN*2T, hd)

    # attention score per (target, neighbor, head); neighbor-major rows.
    # TODO(synk): 2T should stay a multiple of 8 so these reshapes are tile-aligned.
    h13 = h1.reshape(n_neigh, n_targets, hd)
    prod = (h13 * wq[None, :, :]).reshape(n_neigh * n_targets, hd)
    # per-head lane-segment sum, broadcast back across each head's d lanes
    sb = jnp.dot(prod.astype(BF16), ones_ref[...],
                 preferred_element_type=F32)                                 # (NN*2T, hd)
    sb3 = sb.reshape(n_neigh, n_targets, hd)

    m = jnp.max(sb3, axis=0, keepdims=True)
    e = jnp.exp(sb3 - m)
    den = jnp.sum(e, axis=0, keepdims=True)
    w = e * pl.reciprocal(den, approx=True)

    vec3 = vec.reshape(n_neigh, n_targets, hd)
    pooled = jnp.sum(_leaky(vec3 * w, alpha), axis=0)                        # (2T, hd)

    out_ref[...] = (hx + pooled) * 0.5


# -----------------------------------------------------------------------------
# Kernel 3: fused inner (per-metapath) + between-metapath semantic attention
# -----------------------------------------------------------------------------
def _sem_kernel(trans_ref, iw1_ref, ib1_ref, iw2_ref,
                bw1_ref, bb1_ref, bw2_ref, out_ref, *, mp_steps):
    # trans_ref: (n_steps, 2T, hd) f32
    def softmax_combine(zs, scores):
        m = scores[0]
        for s in scores[1:]:
            m = jnp.maximum(m, s)
        es = [jnp.exp(s - m) for s in scores]
        den = es[0]
        for e in es[1:]:
            den = den + e
        inv = pl.reciprocal(den, approx=True)
        out = zs[0] * (es[0] * inv)
        for z, e in zip(zs[1:], es[1:]):
            out = out + z * (e * inv)
        return out

    z_mp = []
    off = 0
    for k, sk in enumerate(mp_steps):
        zs, scores = [], []
        for s in range(sk):
            z = trans_ref[off + s]                                            # (2T, hd)
            zs.append(z)
            h = jnp.tanh(jnp.dot(z.astype(BF16), iw1_ref[k],
                                 preferred_element_type=F32) + ib1_ref[k])
            scores.append(jnp.sum(h * iw2_ref[k], axis=-1, keepdims=True))
        off += sk
        z_mp.append(softmax_combine(zs, scores))

    bscores = []
    for z in z_mp:
        h = jnp.tanh(jnp.dot(z.astype(BF16), bw1_ref[...],
                             preferred_element_type=F32) + bb1_ref[...])
        bscores.append(jnp.sum(h * bw2_ref[...], axis=-1, keepdims=True))
    out_ref[...] = softmax_combine(z_mp, bscores)


# -----------------------------------------------------------------------------
# Kernel 4: fused projection heads (W, W1 block-packed; W2) + both directions
#           of both contrastive losses
# -----------------------------------------------------------------------------
def _loss_kernel(fb_ref, lblt_ref, mw1_ref, mb1_ref, mw2_ref, mb2_ref,
                 w2aw_ref, w2ab_ref, w2bw_ref, w2bb_ref, bias_ref, out_ref,
                 *, tau, alpha, t, d):
    # fused W / W1 heads on final_both (2T, hd) -> (2T, 2D)
    h = _leaky(jnp.dot(fb_ref[...].astype(BF16), mw1_ref[...],
                       preferred_element_type=F32) + mb1_ref[...], alpha)
    o = jnp.dot(h.astype(BF16), mw2_ref[...],
                preferred_element_type=F32) + mb2_ref[...]
    we = o[:, :d]
    w1e = o[:, d:]
    we1, we2 = we[:t], we[t:]
    w1e1, w1e2 = w1e[:t], w1e[t:]

    # W2 head on lbl_feat[target]
    h2 = _leaky(jnp.dot(lblt_ref[...].astype(BF16), w2aw_ref[...],
                        preferred_element_type=F32) + w2ab_ref[...], alpha)
    w2l = jnp.dot(h2.astype(BF16), w2bw_ref[...],
                  preferred_element_type=F32) + w2bb_ref[...]

    def norm(x):
        ss = jnp.sum(x * x, axis=-1, keepdims=True)
        return x * jax.lax.rsqrt(jnp.maximum(ss, 1e-16))

    def nt(a, b):
        return jax.lax.dot_general(a, b, dimension_numbers=(((1,), (1,)), ((), ())),
                                   preferred_element_type=F32)

    we1n, we2n = norm(we1), norm(we2)
    w1e1n, w1e2n, w2ln = norm(w1e1), norm(w1e2), norm(w2l)

    eye = (jax.lax.broadcasted_iota(jnp.int32, (t, t), 0)
           == jax.lax.broadcasted_iota(jnp.int32, (t, t), 1)).astype(F32)
    inv_tau = 1.0 / tau

    def mean_cost_bias(ci, cb, bias):
        ci_d = jnp.sum(ci * eye, axis=1, keepdims=True)
        cb_d = jnp.sum(cb * eye, axis=1, keepdims=True)
        pos = cb_d + jnp.sum(cb * bias, 1, keepdims=True) \
                   + jnp.sum(ci * bias, 1, keepdims=True)
        rev = 1.0 - bias
        neg = jnp.sum(cb * rev, 1, keepdims=True) \
            + jnp.sum(ci * rev, 1, keepdims=True) - ci_d
        cost = -jnp.log(pos / neg)
        return jnp.sum(cost, axis=0, keepdims=True) * (1.0 / t)              # (1, 1)

    def mean_cost(ci, cb):
        ci_d = jnp.sum(ci * eye, axis=1, keepdims=True)
        cb_d = jnp.sum(cb * eye, axis=1, keepdims=True)
        neg = jnp.sum(ci, 1, keepdims=True) + jnp.sum(cb, 1, keepdims=True) - ci_d
        cost = -jnp.log(cb_d / neg)
        return jnp.sum(cost, axis=0, keepdims=True) * (1.0 / t)

    bias = bias_ref[...]
    ci11 = jnp.exp(nt(we1n, we1n) * inv_tau)
    ci22 = jnp.exp(nt(we2n, we2n) * inv_tau)
    cb12 = jnp.exp(nt(we1n, we2n) * inv_tau)
    cb21 = jnp.exp(nt(we2n, we1n) * inv_tau)
    loss1 = 0.5 * (mean_cost_bias(ci11, cb12, bias)
                   + mean_cost_bias(ci22, cb21, bias))

    ciA = jnp.exp(nt(w1e1n, w1e1n) * inv_tau)
    ciB = jnp.exp(nt(w1e2n, w1e2n) * inv_tau)
    cbA = jnp.exp(nt(w1e1n, w2ln) * inv_tau)
    cbB = jnp.exp(nt(w1e2n, w2ln) * inv_tau)
    loss2 = 0.5 * (mean_cost(ciA, cbA) + mean_cost(ciB, cbB))

    out_ref[...] = jnp.concatenate([loss1, loss2], axis=1)                   # (1, 2)


# -----------------------------------------------------------------------------
# One-time parameter packing (hoisted out of the jitted forward)
# -----------------------------------------------------------------------------
def prepare_params(params, cfg):
    heads = cfg["num_heads"]
    D = cfg["out_dim"]
    mps = cfg["expected_metapaths"]
    hg = params["hgnn"]
    cat1 = lambda xs: jnp.concatenate(xs, axis=1)

    steps = [(k, i) for k in range(len(mps)) for i in range(len(mps[k]) - 1)]
    t_fcw, t_fcb, t_qw, t_qb, t_kw, t_kb, t_vw, t_vb = ([] for _ in range(8))
    t_a1w, t_a1b, t_a2w, t_a2b, t_wt = ([] for _ in range(5))
    for (k, i) in steps:
        tps = hg["tagg"][k][i]
        aps = hg["att"][k]
        t_fcw.append(cat1([tp["fc_w"] for tp in tps]))
        t_fcb.append(cat1([tp["fc_b"] for tp in tps]))
        t_qw.append(_block_diag([tp["q_w"] for tp in tps]))
        t_qb.append(cat1([tp["q_b"] for tp in tps]))
        t_kw.append(_block_diag([tp["k_w"] for tp in tps]))
        t_kb.append(cat1([tp["k_b"] for tp in tps]))
        t_vw.append(_block_diag([tp["v_w"] for tp in tps]))
        t_vb.append(cat1([tp["v_b"] for tp in tps]))
        t_a1w.append(_block_diag([ap["fc1_w"] for ap in aps]))
        t_a1b.append(cat1([ap["fc1_b"] for ap in aps]))
        t_a2w.append(_block_diag([ap["fc2_w"] for ap in aps]))
        t_a2b.append(cat1([ap["fc2_b"] for ap in aps]))
        t_wt.append(_block_diag([ap["W"].T for ap in aps]))

    seg_ones = _block_diag([jnp.ones((D, D), F32)] * heads)

    return {
        # front / AttributeCompletion
        "fc_node_w": params["fc_node_w"].astype(BF16), "fc_node_b": params["fc_node_b"],
        "fc_feat_w": params["fc_feat_w"].astype(BF16), "fc_feat_b": params["fc_feat_b"],
        "ac_f1": cat1([a["fc1_w"] for a in params["ac"]]).astype(BF16),
        "ac_b1": cat1([a["fc1_b"] for a in params["ac"]]),
        "ac_f2": cat1([a["fc2_w"] for a in params["ac"]]).astype(BF16),
        "ac_b2": cat1([a["fc2_b"] for a in params["ac"]]),
        "ac_w": _block_diag([a["W"] for a in params["ac"]]).astype(BF16),
        "fc_cmp_w": params["fc_cmp_w"].astype(BF16), "fc_cmp_b": params["fc_cmp_b"],
        "fc_real_w": params["fc_real_w"].astype(BF16), "fc_real_b": params["fc_real_b"],
        # transformer-agg per step (block-diag across heads)
        "t_fcw": jnp.stack(t_fcw).astype(BF16), "t_fcb": jnp.stack(t_fcb),
        "t_qw": jnp.stack(t_qw).astype(BF16), "t_qb": jnp.stack(t_qb),
        "t_kw": jnp.stack(t_kw).astype(BF16), "t_kb": jnp.stack(t_kb),
        "t_vw": jnp.stack(t_vw).astype(BF16), "t_vb": jnp.stack(t_vb),
        "t_a1w": jnp.stack(t_a1w).astype(BF16), "t_a1b": jnp.stack(t_a1b),
        "t_a2w": jnp.stack(t_a2w).astype(BF16), "t_a2b": jnp.stack(t_a2b),
        "t_wt": jnp.stack(t_wt).astype(BF16),
        "seg_ones": seg_ones.astype(BF16),
        # semantic attention
        "iw1": jnp.stack([s["w1"] for s in hg["inner_sem"]]).astype(BF16),
        "ib1": jnp.stack([s["b1"] for s in hg["inner_sem"]]),
        "iw2": jnp.stack([s["w2"] for s in hg["inner_sem"]]),
        "bw1": hg["between_sem"]["w1"].astype(BF16),
        "bb1": hg["between_sem"]["b1"],
        "bw2": hg["between_sem"]["w2"],
        # projection heads (W and W1 fused)
        "mw1": cat1([params["W"]["w1"], params["W1"]["w1"]]).astype(BF16),
        "mb1": cat1([params["W"]["b1"], params["W1"]["b1"]]),
        "mw2": _block_diag([params["W"]["w2"], params["W1"]["w2"]]).astype(BF16),
        "mb2": cat1([params["W"]["b2"], params["W1"]["b2"]]),
        "w2_1w": params["W2"]["w1"].astype(BF16), "w2_1b": params["W2"]["b1"],
        "w2_2w": params["W2"]["w2"].astype(BF16), "w2_2b": params["W2"]["b2"],
    }


# -----------------------------------------------------------------------------
# Full forward (4 pallas_call launches)
# -----------------------------------------------------------------------------
def mymodel_forward(pp, node_emb, feat_emb, lbl_feat, feat_mask,
                    target_mask, neighbors, loss_bias, *, cfg):
    alpha = cfg["alpha"]
    tau = cfg["tau"]
    lw = cfg["loss_weight"]
    heads = cfg["num_heads"]
    D = cfg["out_dim"]
    hd = heads * D
    mps = cfg["expected_metapaths"]

    N, _ = node_emb.shape
    Ex = lbl_feat.shape[0]
    H = pp["fc_node_w"].shape[1]

    # ---- 1. front: projections + attribute completion + cmp/real projections
    # TODO(synk): row/col-tile for production (N, M) with parallel grid axes
    # (v7x 64 MiB VMEM / second TensorCore); whole-array blocks at demo sizes.
    x_cmp, x_lbl = pl.pallas_call(
        functools.partial(_front_kernel, alpha=alpha, heads=heads),
        out_shape=(jax.ShapeDtypeStruct((N, H), F32),
                   jax.ShapeDtypeStruct((Ex, H), F32)),
        in_specs=_vmem_specs(16),
        out_specs=(pl.BlockSpec(memory_space=pltpu.MemorySpace.VMEM),
                   pl.BlockSpec(memory_space=pltpu.MemorySpace.VMEM)),
    )(node_emb.astype(BF16), feat_emb.astype(BF16), lbl_feat.astype(BF16),
      pp["fc_node_w"], pp["fc_node_b"], pp["fc_feat_w"], pp["fc_feat_b"],
      pp["ac_f1"], pp["ac_b1"], pp["ac_f2"], pp["ac_b2"], pp["ac_w"],
      pp["fc_cmp_w"], pp["fc_cmp_b"], pp["fc_real_w"], pp["fc_real_b"])

    x_view1 = jnp.zeros_like(x_cmp)
    x_view1 = x_view1.at[feat_mask["exist"]].set(x_lbl)
    x_view1 = x_view1.at[feat_mask["miss"]].set(x_cmp[feat_mask["miss"]])
    x_view2 = x_cmp

    # ---- 2. transformer aggregation: both views stacked along rows
    T = target_mask.shape[0]
    twoT = 2 * T
    tx = jnp.concatenate([x_view1[target_mask], x_view2[target_mask]],
                         axis=0).astype(BF16)                                # (2T, H)

    steps = [(k, i) for k in range(len(mps)) for i in range(len(mps[k]) - 1)]
    n_steps = len(steps)
    NN = neighbors[0][0].shape[1]
    # TODO(synk): assumes a uniform neighbor count per step; pad ragged sets.
    yg_l = []
    for (k, i) in steps:
        idx = neighbors[k][i]                                                # (T, NN)
        g = jnp.concatenate([x_view1[idx], x_view2[idx]], axis=0)            # (2T, NN, H)
        yg_l.append(jnp.transpose(g, (1, 0, 2)).reshape(NN * twoT, H))       # neighbor-major
    yg = jnp.stack(yg_l, axis=0).astype(BF16)                                # (S, NN*2T, H)

    step_spec = lambda shape: pl.BlockSpec((None,) + shape,
                                           lambda s: (s,) + (0,) * len(shape))
    trans_out = pl.pallas_call(
        functools.partial(_transformer_kernel, n_targets=twoT, n_neigh=NN,
                          alpha=alpha),
        grid=(n_steps,),
        in_specs=[
            pl.BlockSpec((twoT, H), lambda s: (0, 0)),      # targets: VMEM-resident
            step_spec((NN * twoT, H)),
            step_spec((H, hd)), step_spec((1, hd)),
            step_spec((hd, hd)), step_spec((1, hd)),
            step_spec((hd, hd)), step_spec((1, hd)),
            step_spec((hd, hd)), step_spec((1, hd)),
            step_spec((hd, hd)), step_spec((1, hd)),
            step_spec((hd, hd)), step_spec((1, hd)),
            step_spec((hd, hd)),
            pl.BlockSpec((hd, hd), lambda s: (0, 0)),       # head-segment ones
        ],
        out_specs=step_spec((twoT, hd)),
        out_shape=jax.ShapeDtypeStruct((n_steps, twoT, hd), F32),
        compiler_params=pltpu.CompilerParams(dimension_semantics=("parallel",)),
    )(tx, yg, pp["t_fcw"], pp["t_fcb"], pp["t_qw"], pp["t_qb"],
      pp["t_kw"], pp["t_kb"], pp["t_vw"], pp["t_vb"],
      pp["t_a1w"], pp["t_a1b"], pp["t_a2w"], pp["t_a2b"], pp["t_wt"],
      pp["seg_ones"])

    # ---- 3. fused inner + between semantic attention
    mp_steps = tuple(len(mp) - 1 for mp in mps)
    final_both = pl.pallas_call(
        functools.partial(_sem_kernel, mp_steps=mp_steps),
        out_shape=jax.ShapeDtypeStruct((twoT, hd), F32),
        in_specs=_vmem_specs(7),
        out_specs=pl.BlockSpec(memory_space=pltpu.MemorySpace.VMEM),
    )(trans_out, pp["iw1"], pp["ib1"], pp["iw2"],
      pp["bw1"], pp["bb1"], pp["bw2"])

    # ---- 4. fused projection heads + contrastive losses
    lbl_t = lbl_feat[target_mask].astype(F32)
    losses = pl.pallas_call(
        functools.partial(_loss_kernel, tau=tau, alpha=alpha, t=T, d=D),
        out_shape=jax.ShapeDtypeStruct((1, 2), F32),
        in_specs=_vmem_specs(11),
        out_specs=pl.BlockSpec(memory_space=pltpu.MemorySpace.VMEM),
    )(final_both, lbl_t, pp["mw1"], pp["mb1"], pp["mw2"], pp["mb2"],
      pp["w2_1w"], pp["w2_1b"], pp["w2_2w"], pp["w2_2b"], loss_bias)

    return (final_both[:T], final_both[T:],
            lw[0] * losses[0, 0], lw[1] * losses[0, 1])


# -----------------------------------------------------------------------------
# Deterministic synthetic parameter init (shapes mirror the torch module;
# weights stored (in, out), biases stored (1, out))
# -----------------------------------------------------------------------------
class KeyGen:
    def __init__(self, key):
        self.key = key

    def __call__(self):
        self.key, sub = jax.random.split(self.key)
        return sub


def xavier(key, in_dim, out_dim):
    lim = math.sqrt(6.0 / (in_dim + out_dim))
    return jax.random.uniform(key, (in_dim, out_dim), F32, -lim, lim)


def init_params(key, cfg):
    kg = KeyGen(key)
    E, H, D = cfg["emb_dim"], cfg["hidden_dim"], cfg["out_dim"]
    F, heads = cfg["num_feats"], cfg["num_heads"]
    mps = cfg["expected_metapaths"]

    def zeros2(n):
        return jnp.zeros((1, n), F32)

    def att_layer(in_dim, hid):
        std = 1.414 * math.sqrt(2.0 / (hid + hid))
        return {"fc1_w": xavier(kg(), in_dim, hid), "fc1_b": zeros2(hid),
                "fc2_w": xavier(kg(), in_dim, hid), "fc2_b": zeros2(hid),
                "W": std * jax.random.normal(kg(), (hid, hid), F32)}

    def transformer_p(in_dim, hid):
        return {"fc_w": xavier(kg(), in_dim, hid), "fc_b": zeros2(hid),
                "q_w": xavier(kg(), hid, hid), "q_b": zeros2(hid),
                "k_w": xavier(kg(), hid, hid), "k_b": zeros2(hid),
                "v_w": xavier(kg(), hid, hid), "v_b": zeros2(hid)}

    def sem_att(in_dim, hid):
        return {"w1": xavier(kg(), in_dim, hid), "b1": zeros2(hid),
                "w2": xavier(kg(), 1, hid)}

    def seq2(in_dim, hid, out):
        return {"w1": xavier(kg(), in_dim, hid), "b1": zeros2(hid),
                "w2": xavier(kg(), hid, out), "b2": zeros2(out)}

    return {
        "fc_node_w": xavier(kg(), E, H), "fc_node_b": zeros2(H),
        "fc_feat_w": xavier(kg(), E, H), "fc_feat_b": zeros2(H),
        "ac": [att_layer(H, D) for _ in range(heads)],
        "fc_cmp_w": xavier(kg(), F, H), "fc_cmp_b": zeros2(H),
        "fc_real_w": xavier(kg(), F, H), "fc_real_b": zeros2(H),
        "hgnn": {
            "att": [[att_layer(D, D) for _ in range(heads)] for _ in mps],
            "tagg": [[[transformer_p(H, D) for _ in range(heads)]
                      for _ in range(len(mp) - 1)] for mp in mps],
            "inner_sem": [sem_att(D * heads, D) for _ in mps],
            "between_sem": sem_att(D * heads, D),
        },
        "W": seq2(D * heads, D, D),
        "W1": seq2(D * heads, D, D),
        "W2": seq2(F, D, D),
    }


# -----------------------------------------------------------------------------
# Demo
# -----------------------------------------------------------------------------
if __name__ == "__main__":
    cfg = dict(emb_dim=16, hidden_dim=32, out_dim=16, num_feats=8, num_heads=2,
               expected_metapaths=[(0, 1, 0), (0, 2, 0)],
               alpha=ALPHA, tau=0.5, loss_weight=(1.0, 0.5))
    N, T, NN = 12, 4, 6            # nodes, target nodes, neighbors per step
    NUM_EXIST = 8                  # nodes with real features

    key = jax.random.PRNGKey(0)
    kparam, kdata = jax.random.split(key)
    params = init_params(kparam, cfg)
    packed = prepare_params(params, cfg)   # one-time packing, outside jit

    kd = KeyGen(kdata)
    node_emb = jax.random.normal(kd(), (N, cfg["emb_dim"]), F32)
    feat_emb = jax.random.normal(kd(), (cfg["num_feats"], cfg["emb_dim"]), F32)
    lbl_feat = jax.random.normal(kd(), (NUM_EXIST, cfg["num_feats"]), F32)
    feat_mask = {"exist": jnp.arange(NUM_EXIST, dtype=jnp.int32),
                 "miss": jnp.arange(NUM_EXIST, N, dtype=jnp.int32)}
    target_mask = jnp.array([0, 2, 4, 6], dtype=jnp.int32)
    neighbors = [[jax.random.randint(kd(), (T, NN), 0, N, dtype=jnp.int32)
                  for _ in range(len(mp) - 1)]
                 for mp in cfg["expected_metapaths"]]
    # binary bias with zero diagonal so the contrastive denominator stays positive
    loss_bias = (jnp.arange(T)[:, None]
                 == (jnp.arange(T)[None, :] + 1) % T).astype(F32)

    fwd = jax.jit(functools.partial(mymodel_forward, cfg=cfg))
    e1, e2, l1, l2 = fwd(packed, node_emb, feat_emb, lbl_feat, feat_mask,
                         target_mask, neighbors, loss_bias)
    jax.block_until_ready((e1, e2, l1, l2))
    assert e1.shape == (T, cfg["out_dim"] * cfg["num_heads"])
    assert e2.shape == (T, cfg["out_dim"] * cfg["num_heads"])
    assert bool(jnp.isfinite(l1)) and bool(jnp.isfinite(l2))
    print("KERNEL_OK")
</pallas_src>

<mosaic_0001>
module attributes {stable_mosaic.version = 11 : i64} {
  func.func @_front_kernel(%arg0: memref<12x16xbf16, #tpu.memory_space<vmem>>, %arg1: memref<8x16xbf16, #tpu.memory_space<vmem>>, %arg2: memref<8x8xbf16, #tpu.memory_space<vmem>>, %arg3: memref<16x32xbf16, #tpu.memory_space<vmem>>, %arg4: memref<1x32xf32, #tpu.memory_space<vmem>>, %arg5: memref<16x32xbf16, #tpu.memory_space<vmem>>, %arg6: memref<1x32xf32, #tpu.memory_space<vmem>>, %arg7: memref<32x32xbf16, #tpu.memory_space<vmem>>, %arg8: memref<1x32xf32, #tpu.memory_space<vmem>>, %arg9: memref<32x32xbf16, #tpu.memory_space<vmem>>, %arg10: memref<1x32xf32, #tpu.memory_space<vmem>>, %arg11: memref<32x32xbf16, #tpu.memory_space<vmem>>, %arg12: memref<8x32xbf16, #tpu.memory_space<vmem>>, %arg13: memref<1x32xf32, #tpu.memory_space<vmem>>, %arg14: memref<8x32xbf16, #tpu.memory_space<vmem>>, %arg15: memref<1x32xf32, #tpu.memory_space<vmem>>, %arg16: memref<12x32xf32, #tpu.memory_space<vmem>>, %arg17: memref<8x32xf32, #tpu.memory_space<vmem>>) attributes {dimension_semantics = [], scalar_prefetch = 0 : i64, scratch_operands = 0 : i64, tpu.core_type = #tpu.core_type<tc>} {
    %c0 = arith.constant 0 : index
    %c0_0 = arith.constant 0 : index
    %0 = vector.load %arg0[%c0, %c0_0] : memref<12x16xbf16, #tpu.memory_space<vmem>>, vector<12x16xbf16>
    %c0_1 = arith.constant 0 : index
    %c0_2 = arith.constant 0 : index
    %1 = vector.load %arg3[%c0_1, %c0_2] : memref<16x32xbf16, #tpu.memory_space<vmem>>, vector<16x32xbf16>
    %cst = arith.constant dense<0.000000e+00> : vector<12x32xf32>
    %2 = tpu.matmul %0, %1, %cst {dimension_numbers = #tpu.dot_dimension_numbers<[1], [0], [0], [1], [0, 0, 1, 1], [], []>} : vector<12x16xbf16>, vector<16x32xbf16>, vector<12x32xf32> -> vector<12x32xf32>
    %c0_3 = arith.constant 0 : index
    %c0_4 = arith.constant 0 : index
    %3 = vector.load %arg4[%c0_3, %c0_4] : memref<1x32xf32, #tpu.memory_space<vmem>>, vector<1x32xf32>
    %4 = vector.broadcast %3 : vector<1x32xf32> to vector<12x32xf32>
    %5 = arith.addf %2, %4 : vector<12x32xf32>
    %cst_5 = arith.constant 0.000000e+00 : f32
    %6 = vector.broadcast %cst_5 : f32 to vector<12x32xf32>
    %7 = arith.cmpf ogt, %5, %6 : vector<12x32xf32>
    %cst_6 = arith.constant 2.000000e-01 : f32
    %8 = vector.broadcast %cst_6 : f32 to vector<12x32xf32>
    %9 = arith.mulf %8, %5 : vector<12x32xf32>
    %10 = arith.select %7, %5, %9 : vector<12x32xi1>, vector<12x32xf32>
    %c0_7 = arith.constant 0 : index
    %c0_8 = arith.constant 0 : index
    %11 = vector.load %arg1[%c0_7, %c0_8] : memref<8x16xbf16, #tpu.memory_space<vmem>>, vector<8x16xbf16>
    %c0_9 = arith.constant 0 : index
    %c0_10 = arith.constant 0 : index
    %12 = vector.load %arg5[%c0_9, %c0_10] : memref<16x32xbf16, #tpu.memory_space<vmem>>, vector<16x32xbf16>
    %cst_11 = arith.constant dense<0.000000e+00> : vector<8x32xf32>
    %13 = tpu.matmul %11, %12, %cst_11 {dimension_numbers = #tpu.dot_dimension_numbers<[1], [0], [0], [1], [0, 0, 1, 1], [], []>} : vector<8x16xbf16>, vector<16x32xbf16>, vector<8x32xf32> -> vector<8x32xf32>
    %c0_12 = arith.constant 0 : index
    %c0_13 = arith.constant 0 : index
    %14 = vector.load %arg6[%c0_12, %c0_13] : memref<1x32xf32, #tpu.memory_space<vmem>>, vector<1x32xf32>
    %15 = vector.broadcast %14 : vector<1x32xf32> to vector<8x32xf32>
    %16 = arith.addf %13, %15 : vector<8x32xf32>
    %cst_14 = arith.constant 0.000000e+00 : f32
    %17 = vector.broadcast %cst_14 : f32 to vector<8x32xf32>
    %18 = arith.cmpf ogt, %16, %17 : vector<8x32xf32>
    %cst_15 = arith.constant 2.000000e-01 : f32
    %19 = vector.broadcast %cst_15 : f32 to vector<8x32xf32>
    %20 = arith.mulf %19, %16 : vector<8x32xf32>
    %21 = arith.select %18, %16, %20 : vector<8x32xi1>, vector<8x32xf32>
    %22 = arith.truncf %10 : vector<12x32xf32> to vector<12x32xbf16>
    %c0_16 = arith.constant 0 : index
    %c0_17 = arith.constant 0 : index
    %23 = vector.load %arg7[%c0_16, %c0_17] : memref<32x32xbf16, #tpu.memory_space<vmem>>, vector<32x32xbf16>
    %cst_18 = arith.constant dense<0.000000e+00> : vector<12x32xf32>
    %24 = tpu.matmul %22, %23, %cst_18 {dimension_numbers = #tpu.dot_dimension_numbers<[1], [0], [0], [1], [0, 0, 1, 1], [], []>} : vector<12x32xbf16>, vector<32x32xbf16>, vector<12x32xf32> -> vector<12x32xf32>
    %c0_19 = arith.constant 0 : index
    %c0_20 = arith.constant 0 : index
    %25 = vector.load %arg8[%c0_19, %c0_20] : memref<1x32xf32, #tpu.memory_space<vmem>>, vector<1x32xf32>
    %26 = vector.broadcast %25 : vector<1x32xf32> to vector<12x32xf32>
    %27 = arith.addf %24, %26 : vector<12x32xf32>
    %cst_21 = arith.constant 0.000000e+00 : f32
    %28 = vector.broadcast %cst_21 : f32 to vector<12x32xf32>
    %29 = arith.cmpf ogt, %27, %28 : vector<12x32xf32>
    %cst_22 = arith.constant 2.000000e-01 : f32
    %30 = vector.broadcast %cst_22 : f32 to vector<12x32xf32>
    %31 = arith.mulf %30, %27 : vector<12x32xf32>
    %32 = arith.select %29, %27, %31 : vector<12x32xi1>, vector<12x32xf32>
    %33 = arith.truncf %21 : vector<8x32xf32> to vector<8x32xbf16>
    %c0_23 = arith.constant 0 : index
    %c0_24 = arith.constant 0 : index
    %34 = vector.load %arg9[%c0_23, %c0_24] : memref<32x32xbf16, #tpu.memory_space<vmem>>, vector<32x32xbf16>
    %cst_25 = arith.constant dense<0.000000e+00> : vector<8x32xf32>
    %35 = tpu.matmul %33, %34, %cst_25 {dimension_numbers = #tpu.dot_dimension_numbers<[1], [0], [0], [1], [0, 0, 1, 1], [], []>} : vector<8x32xbf16>, vector<32x32xbf16>, vector<8x32xf32> -> vector<8x32xf32>
    %c0_26 = arith.constant 0 : index
    %c0_27 = arith.constant 0 : index
    %36 = vector.load %arg10[%c0_26, %c0_27] : memref<1x32xf32, #tpu.memory_space<vmem>>, vector<1x32xf32>
    %37 = vector.broadcast %36 : vector<1x32xf32> to vector<8x32xf32>
    %38 = arith.addf %35, %37 : vector<8x32xf32>
    %cst_28 = arith.constant 0.000000e+00 : f32
    %39 = vector.broadcast %cst_28 : f32 to vector<8x32xf32>
    %40 = arith.cmpf ogt, %38, %39 : vector<8x32xf32>
    %cst_29 = arith.constant 2.000000e-01 : f32
    %41 = vector.broadcast %cst_29 : f32 to vector<8x32xf32>
    %42 = arith.mulf %41, %38 : vector<8x32xf32>
    %43 = arith.select %40, %38, %42 : vector<8x32xi1>, vector<8x32xf32>
    %44 = arith.truncf %32 : vector<12x32xf32> to vector<12x32xbf16>
    %c0_30 = arith.constant 0 : index
    %c0_31 = arith.constant 0 : index
    %45 = vector.load %arg11[%c0_30, %c0_31] : memref<32x32xbf16, #tpu.memory_space<vmem>>, vector<32x32xbf16>
    %cst_32 = arith.constant dense<0.000000e+00> : vector<12x32xf32>
    %46 = tpu.matmul %44, %45, %cst_32 {dimension_numbers = #tpu.dot_dimension_numbers<[1], [0], [0], [1], [0, 0, 1, 1], [], []>} : vector<12x32xbf16>, vector<32x32xbf16>, vector<12x32xf32> -> vector<12x32xf32>
    %47 = arith.truncf %46 : vector<12x32xf32> to vector<12x32xbf16>
    %48 = arith.truncf %43 : vector<8x32xf32> to vector<8x32xbf16>
    %cst_33 = arith.constant dense<0.000000e+00> : vector<12x8xf32>
    %49 = tpu.matmul %47, %48, %cst_33 {dimension_numbers = #tpu.dot_dimension_numbers<[1], [1], [0], [0], [0, 0, 1, 0], [], []>} : vector<12x32xbf16>, vector<8x32xbf16>, vector<12x8xf32> -> vector<12x8xf32>
    %cst_34 = arith.constant 5.000000e-01 : f32
    %50 = vector.broadcast %cst_34 : f32 to vector<12x8xf32>
    %51 = arith.mulf %49, %50 : vector<12x8xf32>
    %cst_35 = arith.constant 0.000000e+00 : f32
    %52 = vector.broadcast %cst_35 : f32 to vector<12x8xf32>
    %53 = arith.cmpf ogt, %51, %52 : vector<12x8xf32>
    %cst_36 = arith.constant 2.000000e-01 : f32
    %54 = vector.broadcast %cst_36 : f32 to vector<12x8xf32>
    %55 = arith.mulf %54, %51 : vector<12x8xf32>
    %56 = arith.select %53, %51, %55 : vector<12x8xi1>, vector<12x8xf32>
    %57 = arith.truncf %56 : vector<12x8xf32> to vector<12x8xbf16>
    %c0_37 = arith.constant 0 : index
    %c0_38 = arith.constant 0 : index
    %58 = vector.load %arg12[%c0_37, %c0_38] : memref<8x32xbf16, #tpu.memory_space<vmem>>, vector<8x32xbf16>
    %cst_39 = arith.constant dense<0.000000e+00> : vector<12x32xf32>
    %59 = tpu.matmul %57, %58, %cst_39 {dimension_numbers = #tpu.dot_dimension_numbers<[1], [0], [0], [1], [0, 0, 1, 1], [], []>} : vector<12x8xbf16>, vector<8x32xbf16>, vector<12x32xf32> -> vector<12x32xf32>
    %c0_40 = arith.constant 0 : index
    %c0_41 = arith.constant 0 : index
    %60 = vector.load %arg13[%c0_40, %c0_41] : memref<1x32xf32, #tpu.memory_space<vmem>>, vector<1x32xf32>
    %61 = vector.broadcast %60 : vector<1x32xf32> to vector<12x32xf32>
    %62 = arith.addf %59, %61 : vector<12x32xf32>
    %cst_42 = arith.constant 0.000000e+00 : f32
    %63 = vector.broadcast %cst_42 : f32 to vector<12x32xf32>
    %64 = arith.cmpf ogt, %62, %63 : vector<12x32xf32>
    %cst_43 = arith.constant 2.000000e-01 : f32
    %65 = vector.broadcast %cst_43 : f32 to vector<12x32xf32>
    %66 = arith.mulf %65, %62 : vector<12x32xf32>
    %67 = arith.select %64, %62, %66 : vector<12x32xi1>, vector<12x32xf32>
    %c0_44 = arith.constant 0 : index
    %c0_45 = arith.constant 0 : index
    %68 = vector.load %arg16[%c0_44, %c0_45] : memref<12x32xf32, #tpu.memory_space<vmem>>, vector<12x32xf32>
    tpu.vector_store %arg16[%c0_44, %c0_45], %67 {strides = array<i32>} : memref<12x32xf32, #tpu.memory_space<vmem>>, vector<12x32xf32>,
    %c0_46 = arith.constant 0 : index
    %c0_47 = arith.constant 0 : index
    %69 = vector.load %arg2[%c0_46, %c0_47] : memref<8x8xbf16, #tpu.memory_space<vmem>>, vector<8x8xbf16>
    %c0_48 = arith.constant 0 : index
    %c0_49 = arith.constant 0 : index
    %70 = vector.load %arg14[%c0_48, %c0_49] : memref<8x32xbf16, #tpu.memory_space<vmem>>, vector<8x32xbf16>
    %cst_50 = arith.constant dense<0.000000e+00> : vector<8x32xf32>
    %71 = tpu.matmul %69, %70, %cst_50 {dimension_numbers = #tpu.dot_dimension_numbers<[1], [0], [0], [1], [0, 0, 1, 1], [], []>} : vector<8x8xbf16>, vector<8x32xbf16>, vector<8x32xf32> -> vector<8x32xf32>
    %c0_51 = arith.constant 0 : index
    %c0_52 = arith.constant 0 : index
    %72 = vector.load %arg15[%c0_51, %c0_52] : memref<1x32xf32, #tpu.memory_space<vmem>>, vector<1x32xf32>
    %73 = vector.broadcast %72 : vector<1x32xf32> to vector<8x32xf32>
    %74 = arith.addf %71, %73 : vector<8x32xf32>
    %cst_53 = arith.constant 0.000000e+00 : f32
    %75 = vector.broadcast %cst_53 : f32 to vector<8x32xf32>
    %76 = arith.cmpf ogt, %74, %75 : vector<8x32xf32>
    %cst_54 = arith.constant 2.000000e-01 : f32
    %77 = vector.broadcast %cst_54 : f32 to vector<8x32xf32>
    %78 = arith.mulf %77, %74 : vector<8x32xf32>
    %79 = arith.select %76, %74, %78 : vector<8x32xi1>, vector<8x32xf32>
    %c0_55 = arith.constant 0 : index
    %c0_56 = arith.constant 0 : index
    %80 = vector.load %arg17[%c0_55, %c0_56] : memref<8x32xf32, #tpu.memory_space<vmem>>, vector<8x32xf32>
    tpu.vector_store %arg17[%c0_55, %c0_56], %79 {strides = array<i32>} : memref<8x32xf32, #tpu.memory_space<vmem>>, vector<8x32xf32>,
    return
  }
}

module attributes {stable_mosaic.version = 11 : i64} {
  func.func @_transformer_kernel(%arg0: i32, %arg1: memref<8x32xbf16, #tpu.memory_space<vmem>>, %arg2: memref<1x48x32xbf16, #tpu.memory_space<vmem>>, %arg3: memref<1x32x32xbf16, #tpu.memory_space<vmem>>, %arg4: memref<1x1x32xf32, #tpu.memory_space<vmem>>, %arg5: memref<1x32x32xbf16, #tpu.memory_space<vmem>>, %arg6: memref<1x1x32xf32, #tpu.memory_space<vmem>>, %arg7: memref<1x32x32xbf16, #tpu.memory_space<vmem>>, %arg8: memref<1x1x32xf32, #tpu.memory_space<vmem>>, %arg9: memref<1x32x32xbf16, #tpu.memory_space<vmem>>, %arg10: memref<1x1x32xf32, #tpu.memory_space<vmem>>, %arg11: memref<1x32x32xbf16, #tpu.memory_space<vmem>>, %arg12: memref<1x1x32xf32, #tpu.memory_space<vmem>>, %arg13: memref<1x32x32xbf16, #tpu.memory_space<vmem>>, %arg14: memref<1x1x32xf32, #tpu.memory_space<vmem>>, %arg15: memref<1x32x32xbf16, #tpu.memory_space<vmem>>, %arg16: memref<32x32xbf16, #tpu.memory_space<vmem>>, %arg17: memref<1x8x32xf32, #tpu.memory_space<vmem>>) attributes {dimension_semantics = [#tpu.dimension_semantics<parallel>], iteration_bounds = array<i64: 4>, scalar_prefetch = 0 : i64, scratch_operands = 0 : i64, tpu.core_type = #tpu.core_type<tc>, window_params = [{pipeline_mode = #tpu.pipeline_mode<synchronous>, transform_indices = @transform_0, window_bounds = array<i64: 8, 32>}, {transform_indices = @transform_1, window_bounds = array<i64: 1, 48, 32>}, {transform_indices = @transform_2, window_bounds = array<i64: 1, 32, 32>}, {transform_indices = @transform_3, window_bounds = array<i64: 1, 1, 32>}, {transform_indices = @transform_4, window_bounds = array<i64: 1, 32, 32>}, {transform_indices = @transform_5, window_bounds = array<i64: 1, 1, 32>}, {transform_indices = @transform_6, window_bounds = array<i64: 1, 32, 32>}, {transform_indices = @transform_7, window_bounds = array<i64: 1, 1, 32>}, {transform_indices = @transform_8, window_bounds = array<i64: 1, 32, 32>}, {transform_indices = @transform_9, window_bounds = array<i64: 1, 1, 32>}, {transform_indices = @transform_10, window_bounds = array<i64: 1, 32, 32>}, {transform_indices = @transform_11, window_bounds = array<i64: 1, 1, 32>}, {transform_indices = @transform_12, window_bounds = array<i64: 1, 32, 32>}, {transform_indices = @transform_13, window_bounds = array<i64: 1, 1, 32>}, {transform_indices = @transform_14, window_bounds = array<i64: 1, 32, 32>}, {pipeline_mode = #tpu.pipeline_mode<synchronous>, transform_indices = @transform_15, window_bounds = array<i64: 32, 32>}, {transform_indices = @transform_16, window_bounds = array<i64: 1, 8, 32>}]} {
    %c0 = arith.constant 0 : index
    %c0_0 = arith.constant 0 : index
    %0 = vector.load %arg1[%c0, %c0_0] : memref<8x32xbf16, #tpu.memory_space<vmem>>, vector<8x32xbf16>
    %c0_1 = arith.constant 0 : index
    %c0_2 = arith.constant 0 : index
    %c0_3 = arith.constant 0 : index
    %1 = vector.load %arg3[%c0_1, %c0_2, %c0_3] : memref<1x32x32xbf16, #tpu.memory_space<vmem>>, vector<1x32x32xbf16>
    %2 = vector.shape_cast %1 : vector<1x32x32xbf16> to vector<32x32xbf16>
    %cst = arith.constant dense<0.000000e+00> : vector<8x32xf32>
    %3 = tpu.matmul %0, %2, %cst {dimension_numbers = #tpu.dot_dimension_numbers<[1], [0], [0], [1], [0, 0, 1, 1], [], []>} : vector<8x32xbf16>, vector<32x32xbf16>, vector<8x32xf32> -> vector<8x32xf32>
    %c0_4 = arith.constant 0 : index
    %c0_5 = arith.constant 0 : index
    %c0_6 = arith.constant 0 : index
    %4 = vector.load %arg4[%c0_4, %c0_5, %c0_6] : memref<1x1x32xf32, #tpu.memory_space<vmem>>, vector<1x1x32xf32>
    %5 = vector.shape_cast %4 : vector<1x1x32xf32> to vector<1x32xf32>
    %6 = vector.broadcast %5 : vector<1x32xf32> to vector<8x32xf32>
    %7 = arith.addf %3, %6 : vector<8x32xf32>
    %cst_7 = arith.constant 0.000000e+00 : f32
    %8 = vector.broadcast %cst_7 : f32 to vector<8x32xf32>
    %9 = arith.cmpf ogt, %7, %8 : vector<8x32xf32>
    %cst_8 = arith.constant 2.000000e-01 : f32
    %10 = vector.broadcast %cst_8 : f32 to vector<8x32xf32>
    %11 = arith.mulf %10, %7 : vector<8x32xf32>
    %12 = arith.select %9, %7, %11 : vector<8x32xi1>, vector<8x32xf32>
    %c0_9 = arith.constant 0 : index
    %c0_10 = arith.constant 0 : index
    %c0_11 = arith.constant 0 : index
    %13 = vector.load %arg2[%c0_9, %c0_10, %c0_11] : memref<1x48x32xbf16, #tpu.memory_space<vmem>>, vector<1x48x32xbf16>
    %14 = vector.shape_cast %13 : vector<1x48x32xbf16> to vector<48x32xbf16>
    %c0_12 = arith.constant 0 : index
    %c0_13 = arith.constant 0 : index
    %c0_14 = arith.constant 0 : index
    %15 = vector.load %arg3[%c0_12, %c0_13, %c0_14] : memref<1x32x32xbf16, #tpu.memory_space<vmem>>, vector<1x32x32xbf16>
    %16 = vector.shape_cast %15 : vector<1x32x32xbf16> to vector<32x32xbf16>
    %cst_15 = arith.constant dense<0.000000e+00> : vector<48x32xf32>
    %17 = tpu.matmul %14, %16, %cst_15 {dimension_numbers = #tpu.dot_dimension_numbers<[1], [0], [0], [1], [0, 0, 1, 1], [], []>} : vector<48x32xbf16>, vector<32x32xbf16>, vector<48x32xf32> -> vector<48x32xf32>
    %c0_16 = arith.constant 0 : index
    %c0_17 = arith.constant 0 : index
    %c0_18 = arith.constant 0 : index
    %18 = vector.load %arg4[%c0_16, %c0_17, %c0_18] : memref<1x1x32xf32, #tpu.memory_space<vmem>>, vector<1x1x32xf32>
    %19 = vector.shape_cast %18 : vector<1x1x32xf32> to vector<1x32xf32>
    %20 = vector.broadcast %19 : vector<1x32xf32> to vector<48x32xf32>
    %21 = arith.addf %17, %20 : vector<48x32xf32>
    %cst_19 = arith.constant 0.000000e+00 : f32
    %22 = vector.broadcast %cst_19 : f32 to vector<48x32xf32>
    %23 = arith.cmpf ogt, %21, %22 : vector<48x32xf32>
    %cst_20 = arith.constant 2.000000e-01 : f32
    %24 = vector.broadcast %cst_20 : f32 to vector<48x32xf32>
    %25 = arith.mulf %24, %21 : vector<48x32xf32>
    %26 = arith.select %23, %21, %25 : vector<48x32xi1>, vector<48x32xf32>
    %27 = arith.truncf %12 : vector<8x32xf32> to vector<8x32xbf16>
    %28 = arith.truncf %26 : vector<48x32xf32> to vector<48x32xbf16>
    %c0_21 = arith.constant 0 : index
    %c0_22 = arith.constant 0 : index
    %c0_23 = arith.constant 0 : index
    %29 = vector.load %arg5[%c0_21, %c0_22, %c0_23] : memref<1x32x32xbf16, #tpu.memory_space<vmem>>, vector<1x32x32xbf16>
    %30 = vector.shape_cast %29 : vector<1x32x32xbf16> to vector<32x32xbf16>
    %cst_24 = arith.constant dense<0.000000e+00> : vector<8x32xf32>
    %31 = tpu.matmul %27, %30, %cst_24 {dimension_numbers = #tpu.dot_dimension_numbers<[1], [0], [0], [1], [0, 0, 1, 1], [], []>} : vector<8x32xbf16>, vector<32x32xbf16>, vector<8x32xf32> -> vector<8x32xf32>
    %c0_25 = arith.constant 0 : index
    %c0_26 = arith.constant 0 : index
    %c0_27 = arith.constant 0 : index
    %32 = vector.load %arg6[%c0_25, %c0_26, %c0_27] : memref<1x1x32xf32, #tpu.memory_space<vmem>>, vector<1x1x32xf32>
    %33 = vector.shape_cast %32 : vector<1x1x32xf32> to vector<1x32xf32>
    %34 = vector.broadcast %33 : vector<1x32xf32> to vector<8x32xf32>
    %35 = arith.addf %31, %34 : vector<8x32xf32>
    %36 = arith.truncf %35 : vector<8x32xf32> to vector<8x32xbf16>
    %c0_28 = arith.constant 0 : index
    %c0_29 = arith.constant 0 : index
    %c0_30 = arith.constant 0 : index
    %37 = vector.load %arg13[%c0_28, %c0_29, %c0_30] : memref<1x32x32xbf16, #tpu.memory_space<vmem>>, vector<1x32x32xbf16>
    %38 = vector.shape_cast %37 : vector<1x32x32xbf16> to vector<32x32xbf16>
    %cst_31 = arith.constant dense<0.000000e+00> : vector<8x32xf32>
    %39 = tpu.matmul %36, %38, %cst_31 {dimension_numbers = #tpu.dot_dimension_numbers<[1], [0], [0], [1], [0, 0, 1, 1], [], []>} : vector<8x32xbf16>, vector<32x32xbf16>, vector<8x32xf32> -> vector<8x32xf32>
    %c0_32 = arith.constant 0 : index
    %c0_33 = arith.constant 0 : index
    %c0_34 = arith.constant 0 : index
    %40 = vector.load %arg14[%c0_32, %c0_33, %c0_34] : memref<1x1x32xf32, #tpu.memory_space<vmem>>, vector<1x1x32xf32>
    %41 = vector.shape_cast %40 : vector<1x1x32xf32> to vector<1x32xf32>
    %42 = vector.broadcast %41 : vector<1x32xf32> to vector<8x32xf32>
    %43 = arith.addf %39, %42 : vector<8x32xf32>
    %cst_35 = arith.constant 0.000000e+00 : f32
    %44 = vector.broadcast %cst_35 : f32 to vector<8x32xf32>
    %45 = arith.cmpf ogt, %43, %44 : vector<8x32xf32>
    %cst_36 = arith.constant 2.000000e-01 : f32
    %46 = vector.broadcast %cst_36 : f32 to vector<8x32xf32>
    %47 = arith.mulf %46, %43 : vector<8x32xf32>
    %48 = arith.select %45, %43, %47 : vector<8x32xi1>, vector<8x32xf32>
    %49 = arith.truncf %48 : vector<8x32xf32> to vector<8x32xbf16>
    %c0_37 = arith.constant 0 : index
    %c0_38 = arith.constant 0 : index
    %c0_39 = arith.constant 0 : index
    %50 = vector.load %arg15[%c0_37, %c0_38, %c0_39] : memref<1x32x32xbf16, #tpu.memory_space<vmem>>, vector<1x32x32xbf16>
    %51 = vector.shape_cast %50 : vector<1x32x32xbf16> to vector<32x32xbf16>
    %cst_40 = arith.constant dense<0.000000e+00> : vector<8x32xf32>
    %52 = tpu.matmul %49, %51, %cst_40 {dimension_numbers = #tpu.dot_dimension_numbers<[1], [0], [0], [1], [0, 0, 1, 1], [], []>} : vector<8x32xbf16>, vector<32x32xbf16>, vector<8x32xf32> -> vector<8x32xf32>
    %c0_41 = arith.constant 0 : index
    %c0_42 = arith.constant 0 : index
    %c0_43 = arith.constant 0 : index
    %53 = vector.load %arg7[%c0_41, %c0_42, %c0_43] : memref<1x32x32xbf16, #tpu.memory_space<vmem>>, vector<1x32x32xbf16>
    %54 = vector.shape_cast %53 : vector<1x32x32xbf16> to vector<32x32xbf16>
    %cst_44 = arith.constant dense<0.000000e+00> : vector<48x32xf32>
    %55 = tpu.matmul %28, %54, %cst_44 {dimension_numbers = #tpu.dot_dimension_numbers<[1], [0], [0], [1], [0, 0, 1, 1], [], []>} : vector<48x32xbf16>, vector<32x32xbf16>, vector<48x32xf32> -> vector<48x32xf32>
    %c0_45 = arith.constant 0 : index
    %c0_46 = arith.constant 0 : index
    %c0_47 = arith.constant 0 : index
    %56 = vector.load %arg8[%c0_45, %c0_46, %c0_47] : memref<1x1x32xf32, #tpu.memory_space<vmem>>, vector<1x1x32xf32>
    %57 = vector.shape_cast %56 : vector<1x1x32xf32> to vector<1x32xf32>
    %58 = vector.broadcast %57 : vector<1x32xf32> to vector<48x32xf32>
    %59 = arith.addf %55, %58 : vector<48x32xf32>
    %c0_48 = arith.constant 0 : index
    %c0_49 = arith.constant 0 : index
    %c0_50 = arith.constant 0 : index
    %60 = vector.load %arg9[%c0_48, %c0_49, %c0_50] : memref<1x32x32xbf16, #tpu.memory_space<vmem>>, vector<1x32x32xbf16>
    %61 = vector.shape_cast %60 : vector<1x32x32xbf16> to vector<32x32xbf16>
    %cst_51 = arith.constant dense<0.000000e+00> : vector<48x32xf32>
    %62 = tpu.matmul %28, %61, %cst_51 {dimension_numbers = #tpu.dot_dimension_numbers<[1], [0], [0], [1], [0, 0, 1, 1], [], []>} : vector<48x32xbf16>, vector<32x32xbf16>, vector<48x32xf32> -> vector<48x32xf32>
    %c0_52 = arith.constant 0 : index
    %c0_53 = arith.constant 0 : index
    %c0_54 = arith.constant 0 : index
    %63 = vector.load %arg10[%c0_52, %c0_53, %c0_54] : memref<1x1x32xf32, #tpu.memory_space<vmem>>, vector<1x1x32xf32>
    %64 = vector.shape_cast %63 : vector<1x1x32xf32> to vector<1x32xf32>
    %65 = vector.broadcast %64 : vector<1x32xf32> to vector<48x32xf32>
    %66 = arith.addf %62, %65 : vector<48x32xf32>
    %67 = arith.truncf %59 : vector<48x32xf32> to vector<48x32xbf16>
    %c0_55 = arith.constant 0 : index
    %c0_56 = arith.constant 0 : index
    %c0_57 = arith.constant 0 : index
    %68 = vector.load %arg11[%c0_55, %c0_56, %c0_57] : memref<1x32x32xbf16, #tpu.memory_space<vmem>>, vector<1x32x32xbf16>
    %69 = vector.shape_cast %68 : vector<1x32x32xbf16> to vector<32x32xbf16>
    %cst_58 = arith.constant dense<0.000000e+00> : vector<48x32xf32>
    %70 = tpu.matmul %67, %69, %cst_58 {dimension_numbers = #tpu.dot_dimension_numbers<[1], [0], [0], [1], [0, 0, 1, 1], [], []>} : vector<48x32xbf16>, vector<32x32xbf16>, vector<48x32xf32> -> vector<48x32xf32>
    %c0_59 = arith.constant 0 : index
    %c0_60 = arith.constant 0 : index
    %c0_61 = arith.constant 0 : index
    %71 = vector.load %arg12[%c0_59, %c0_60, %c0_61] : memref<1x1x32xf32, #tpu.memory_space<vmem>>, vector<1x1x32xf32>
    %72 = vector.shape_cast %71 : vector<1x1x32xf32> to vector<1x32xf32>
    %73 = vector.broadcast %72 : vector<1x32xf32> to vector<48x32xf32>
    %74 = arith.addf %70, %73 : vector<48x32xf32>
    %cst_62 = arith.constant 0.000000e+00 : f32
    %75 = vector.broadcast %cst_62 : f32 to vector<48x32xf32>
    %76 = arith.cmpf ogt, %74, %75 : vector<48x32xf32>
    %cst_63 = arith.constant 2.000000e-01 : f32
    %77 = vector.broadcast %cst_63 : f32 to vector<48x32xf32>
    %78 = arith.mulf %77, %74 : vector<48x32xf32>
    %79 = arith.select %76, %74, %78 : vector<48x32xi1>, vector<48x32xf32>
    %80 = vector.shape_cast %79 : vector<48x32xf32> to vector<6x8x32xf32>
    %81 = vector.shape_cast %52 : vector<8x32xf32> to vector<1x8x32xf32>
    %82 = vector.broadcast %81 : vector<1x8x32xf32> to vector<6x8x32xf32>
    %83 = arith.mulf %80, %82 : vector<6x8x32xf32>
    %84 = vector.shape_cast %83 : vector<6x8x32xf32> to vector<48x32xf32>
    %85 = arith.truncf %84 : vector<48x32xf32> to vector<48x32xbf16>
    %c0_64 = arith.constant 0 : index
    %c0_65 = arith.constant 0 : index
    %86 = vector.load %arg16[%c0_64, %c0_65] : memref<32x32xbf16, #tpu.memory_space<vmem>>, vector<32x32xbf16>
    %cst_66 = arith.constant dense<0.000000e+00> : vector<48x32xf32>
    %87 = tpu.matmul %85, %86, %cst_66 {dimension_numbers = #tpu.dot_dimension_numbers<[1], [0], [0], [1], [0, 0, 1, 1], [], []>} : vector<48x32xbf16>, vector<32x32xbf16>, vector<48x32xf32> -> vector<48x32xf32>
    %88 = vector.shape_cast %87 : vector<48x32xf32> to vector<6x8x32xf32>
    %cst_67 = arith.constant dense<0xFF800000> : vector<8x32xf32>
    %89 = vector.multi_reduction <maximumf>, %88, %cst_67 [0] : vector<6x8x32xf32> to vector<8x32xf32>
    %90 = vector.shape_cast %89 : vector<8x32xf32> to vector<1x8x32xf32>
    %91 = vector.broadcast %90 : vector<1x8x32xf32> to vector<6x8x32xf32>
    %92 = arith.subf %88, %91 : vector<6x8x32xf32>
    %93 = math.exp %92 : vector<6x8x32xf32>
    %cst_68 = arith.constant dense<0.000000e+00> : vector<8x32xf32>
    %94 = vector.multi_reduction <add>, %93, %cst_68 [0] : vector<6x8x32xf32> to vector<8x32xf32>
    %95 = vector.shape_cast %94 : vector<8x32xf32> to vector<1x8x32xf32>
    %96 = tpu.reciprocal %95 {approx = true} : vector<1x8x32xf32> -> vector<1x8x32xf32>
    %97 = vector.broadcast %96 : vector<1x8x32xf32> to vector<6x8x32xf32>
    %98 = arith.mulf %93, %97 : vector<6x8x32xf32>
    %99 = vector.shape_cast %66 : vector<48x32xf32> to vector<6x8x32xf32>
    %100 = arith.mulf %99, %98 : vector<6x8x32xf32>
    %cst_69 = arith.constant 0.000000e+00 : f32
    %101 = vector.broadcast %cst_69 : f32 to vector<6x8x32xf32>
    %102 = arith.cmpf ogt, %100, %101 : vector<6x8x32xf32>
    %cst_70 = arith.constant 2.000000e-01 : f32
    %103 = vector.broadcast %cst_70 : f32 to vector<6x8x32xf32>
    %104 = arith.mulf %103, %100 : vector<6x8x32xf32>
    %105 = arith.select %102, %100, %104 : vector<6x8x32xi1>, vector<6x8x32xf32>
    %cst_71 = arith.constant dense<0.000000e+00> : vector<8x32xf32>
    %106 = vector.multi_reduction <add>, %105, %cst_71 [0] : vector<6x8x32xf32> to vector<8x32xf32>
    %107 = arith.addf %12, %106 : vector<8x32xf32>
    %cst_72 = arith.constant 5.000000e-01 : f32
    %108 = vector.broadcast %cst_72 : f32 to vector<8x32xf32>
    %109 = arith.mulf %107, %108 : vector<8x32xf32>
    %c0_73 = arith.constant 0 : index
    %c0_74 = arith.constant 0 : index
    %c0_75 = arith.constant 0 : index
    %110 = vector.load %arg17[%c0_73, %c0_74, %c0_75] : memref<1x8x32xf32, #tpu.memory_space<vmem>>, vector<1x8x32xf32>
    %111 = vector.shape_cast %110 : vector<1x8x32xf32> to vector<8x32xf32>
    %112 = vector.shape_cast %109 : vector<8x32xf32> to vector<1x8x32xf32>
    tpu.vector_store %arg17[%c0_73, %c0_74, %c0_75], %112 {strides = array<i32>} : memref<1x8x32xf32, #tpu.memory_space<vmem>>, vector<1x8x32xf32>,
    return
  }
  func.func @transform_0(%arg0: i32) -> (i32, i32) {
    %c0_i32 = arith.constant 0 : i32
    %c0_i32_0 = arith.constant 0 : i32
    %c0_i32_1 = arith.constant 0 : i32
    return %c0_i32, %c0_i32_0 : i32, i32
  }
  func.func @transform_1(%arg0: i32) -> (i32, i32, i32) {
    %c0_i32 = arith.constant 0 : i32
    %c0_i32_0 = arith.constant 0 : i32
    %c0_i32_1 = arith.constant 0 : i32
    return %arg0, %c0_i32, %c0_i32_0 : i32, i32, i32
  }
  func.func @transform_2(%arg0: i32) -> (i32, i32, i32) {
    %c0_i32 = arith.constant 0 : i32
    %c0_i32_0 = arith.constant 0 : i32
    %c0_i32_1 = arith.constant 0 : i32
    return %arg0, %c0_i32, %c0_i32_0 : i32, i32, i32
  }
  func.func @transform_3(%arg0: i32) -> (i32, i32, i32) {
    %c0_i32 = arith.constant 0 : i32
    %c0_i32_0 = arith.constant 0 : i32
    %c0_i32_1 = arith.constant 0 : i32
    return %arg0, %c0_i32, %c0_i32_0 : i32, i32, i32
  }
  func.func @transform_4(%arg0: i32) -> (i32, i32, i32) {
    %c0_i32 = arith.constant 0 : i32
    %c0_i32_0 = arith.constant 0 : i32
    %c0_i32_1 = arith.constant 0 : i32
    return %arg0, %c0_i32, %c0_i32_0 : i32, i32, i32
  }
  func.func @transform_5(%arg0: i32) -> (i32, i32, i32) {
    %c0_i32 = arith.constant 0 : i32
    %c0_i32_0 = arith.constant 0 : i32
    %c0_i32_1 = arith.constant 0 : i32
    return %arg0, %c0_i32, %c0_i32_0 : i32, i32, i32
  }
  func.func @transform_6(%arg0: i32) -> (i32, i32, i32) {
    %c0_i32 = arith.constant 0 : i32
    %c0_i32_0 = arith.constant 0 : i32
    %c0_i32_1 = arith.constant 0 : i32
    return %arg0, %c0_i32, %c0_i32_0 : i32, i32, i32
  }
  func.func @transform_7(%arg0: i32) -> (i32, i32, i32) {
    %c0_i32 = arith.constant 0 : i32
    %c0_i32_0 = arith.constant 0 : i32
    %c0_i32_1 = arith.constant 0 : i32
    return %arg0, %c0_i32, %c0_i32_0 : i32, i32, i32
  }
  func.func @transform_8(%arg0: i32) -> (i32, i32, i32) {
    %c0_i32 = arith.constant 0 : i32
    %c0_i32_0 = arith.constant 0 : i32
    %c0_i32_1 = arith.constant 0 : i32
    return %arg0, %c0_i32, %c0_i32_0 : i32, i32, i32
  }
  func.func @transform_9(%arg0: i32) -> (i32, i32, i32) {
    %c0_i32 = arith.constant 0 : i32
    %c0_i32_0 = arith.constant 0 : i32
    %c0_i32_1 = arith.constant 0 : i32
    return %arg0, %c0_i32, %c0_i32_0 : i32, i32, i32
  }
  func.func @transform_10(%arg0: i32) -> (i32, i32, i32) {
    %c0_i32 = arith.constant 0 : i32
    %c0_i32_0 = arith.constant 0 : i32
    %c0_i32_1 = arith.constant 0 : i32
    return %arg0, %c0_i32, %c0_i32_0 : i32, i32, i32
  }
  func.func @transform_11(%arg0: i32) -> (i32, i32, i32) {
    %c0_i32 = arith.constant 0 : i32
    %c0_i32_0 = arith.constant 0 : i32
    %c0_i32_1 = arith.constant 0 : i32
    return %arg0, %c0_i32, %c0_i32_0 : i32, i32, i32
  }
  func.func @transform_12(%arg0: i32) -> (i32, i32, i32) {
    %c0_i32 = arith.constant 0 : i32
    %c0_i32_0 = arith.constant 0 : i32
    %c0_i32_1 = arith.constant 0 : i32
    return %arg0, %c0_i32, %c0_i32_0 : i32, i32, i32
  }
  func.func @transform_13(%arg0: i32) -> (i32, i32, i32) {
    %c0_i32 = arith.constant 0 : i32
    %c0_i32_0 = arith.constant 0 : i32
    %c0_i32_1 = arith.constant 0 : i32
    return %arg0, %c0_i32, %c0_i32_0 : i32, i32, i32
  }
  func.func @transform_14(%arg0: i32) -> (i32, i32, i32) {
    %c0_i32 = arith.constant 0 : i32
    %c0_i32_0 = arith.constant 0 : i32
    %c0_i32_1 = arith.constant 0 : i32
    return %arg0, %c0_i32, %c0_i32_0 : i32, i32, i32
  }
  func.func @transform_15(%arg0: i32) -> (i32, i32) {
    %c0_i32 = arith.constant 0 : i32
    %c0_i32_0 = arith.constant 0 : i32
    %c0_i32_1 = arith.constant 0 : i32
    return %c0_i32, %c0_i32_0 : i32, i32
  }
  func.func @transform_16(%arg0: i32) -> (i32, i32, i32) {
    %c0_i32 = arith.constant 0 : i32
    %c0_i32_0 = arith.constant 0 : i32
    %c0_i32_1 = arith.constant 0 : i32
    return %arg0, %c0_i32, %c0_i32_0 : i32, i32, i32
  }
}

module attributes {stable_mosaic.version = 11 : i64} {
  func.func @_sem_kernel(%arg0: memref<4x8x32xf32, #tpu.memory_space<vmem>>, %arg1: memref<2x32x16xbf16, #tpu.memory_space<vmem>>, %arg2: memref<2x1x16xf32, #tpu.memory_space<vmem>>, %arg3: memref<2x1x16xf32, #tpu.memory_space<vmem>>, %arg4: memref<32x16xbf16, #tpu.memory_space<vmem>>, %arg5: memref<1x16xf32, #tpu.memory_space<vmem>>, %arg6: memref<1x16xf32, #tpu.memory_space<vmem>>, %arg7: memref<8x32xf32, #tpu.memory_space<vmem>>) attributes {dimension_semantics = [], scalar_prefetch = 0 : i64, scratch_operands = 0 : i64, tpu.core_type = #tpu.core_type<tc>} {
    %c0 = arith.constant 0 : index
    %c0_0 = arith.constant 0 : index
    %c0_1 = arith.constant 0 : index
    %0 = vector.load %arg0[%c0, %c0_0, %c0_1] : memref<4x8x32xf32, #tpu.memory_space<vmem>>, vector<1x8x32xf32>
    %1 = vector.shape_cast %0 : vector<1x8x32xf32> to vector<8x32xf32>
    %2 = arith.truncf %1 : vector<8x32xf32> to vector<8x32xbf16>
    %c0_2 = arith.constant 0 : index
    %c0_3 = arith.constant 0 : index
    %c0_4 = arith.constant 0 : index
    %3 = vector.load %arg1[%c0_2, %c0_3, %c0_4] : memref<2x32x16xbf16, #tpu.memory_space<vmem>>, vector<1x32x16xbf16>
    %4 = vector.shape_cast %3 : vector<1x32x16xbf16> to vector<32x16xbf16>
    %cst = arith.constant dense<0.000000e+00> : vector<8x16xf32>
    %5 = tpu.matmul %2, %4, %cst {dimension_numbers = #tpu.dot_dimension_numbers<[1], [0], [0], [1], [0, 0, 1, 1], [], []>} : vector<8x32xbf16>, vector<32x16xbf16>, vector<8x16xf32> -> vector<8x16xf32>
    %c0_5 = arith.constant 0 : index
    %c0_6 = arith.constant 0 : index
    %c0_7 = arith.constant 0 : index
    %6 = vector.load %arg2[%c0_5, %c0_6, %c0_7] : memref<2x1x16xf32, #tpu.memory_space<vmem>>, vector<1x1x16xf32>
    %7 = vector.shape_cast %6 : vector<1x1x16xf32> to vector<1x16xf32>
    %8 = vector.broadcast %7 : vector<1x16xf32> to vector<8x16xf32>
    %9 = arith.addf %5, %8 : vector<8x16xf32>
    %10 = math.tanh %9 : vector<8x16xf32>
    %c0_8 = arith.constant 0 : index
    %c0_9 = arith.constant 0 : index
    %c0_10 = arith.constant 0 : index
    %11 = vector.load %arg3[%c0_8, %c0_9, %c0_10] : memref<2x1x16xf32, #tpu.memory_space<vmem>>, vector<1x1x16xf32>
    %12 = vector.shape_cast %11 : vector<1x1x16xf32> to vector<1x16xf32>
    %13 = vector.broadcast %12 : vector<1x16xf32> to vector<8x16xf32>
    %14 = arith.mulf %10, %13 : vector<8x16xf32>
    %cst_11 = arith.constant dense<0.000000e+00> : vector<8xf32>
    %15 = vector.multi_reduction <add>, %14, %cst_11 [1] : vector<8x16xf32> to vector<8xf32>
    %16 = vector.shape_cast %15 : vector<8xf32> to vector<8x1xf32>
    %c1 = arith.constant 1 : index
    %c0_12 = arith.constant 0 : index
    %c0_13 = arith.constant 0 : index
    %17 = vector.load %arg0[%c1, %c0_12, %c0_13] : memref<4x8x32xf32, #tpu.memory_space<vmem>>, vector<1x8x32xf32>
    %18 = vector.shape_cast %17 : vector<1x8x32xf32> to vector<8x32xf32>
    %19 = arith.truncf %18 : vector<8x32xf32> to vector<8x32xbf16>
    %c0_14 = arith.constant 0 : index
    %c0_15 = arith.constant 0 : index
    %c0_16 = arith.constant 0 : index
    %20 = vector.load %arg1[%c0_14, %c0_15, %c0_16] : memref<2x32x16xbf16, #tpu.memory_space<vmem>>, vector<1x32x16xbf16>
    %21 = vector.shape_cast %20 : vector<1x32x16xbf16> to vector<32x16xbf16>
    %cst_17 = arith.constant dense<0.000000e+00> : vector<8x16xf32>
    %22 = tpu.matmul %19, %21, %cst_17 {dimension_numbers = #tpu.dot_dimension_numbers<[1], [0], [0], [1], [0, 0, 1, 1], [], []>} : vector<8x32xbf16>, vector<32x16xbf16>, vector<8x16xf32> -> vector<8x16xf32>
    %c0_18 = arith.constant 0 : index
    %c0_19 = arith.constant 0 : index
    %c0_20 = arith.constant 0 : index
    %23 = vector.load %arg2[%c0_18, %c0_19, %c0_20] : memref<2x1x16xf32, #tpu.memory_space<vmem>>, vector<1x1x16xf32>
    %24 = vector.shape_cast %23 : vector<1x1x16xf32> to vector<1x16xf32>
    %25 = vector.broadcast %24 : vector<1x16xf32> to vector<8x16xf32>
    %26 = arith.addf %22, %25 : vector<8x16xf32>
    %27 = math.tanh %26 : vector<8x16xf32>
    %c0_21 = arith.constant 0 : index
    %c0_22 = arith.constant 0 : index
    %c0_23 = arith.constant 0 : index
    %28 = vector.load %arg3[%c0_21, %c0_22, %c0_23] : memref<2x1x16xf32, #tpu.memory_space<vmem>>, vector<1x1x16xf32>
    %29 = vector.shape_cast %28 : vector<1x1x16xf32> to vector<1x16xf32>
    %30 = vector.broadcast %29 : vector<1x16xf32> to vector<8x16xf32>
    %31 = arith.mulf %27, %30 : vector<8x16xf32>
    %cst_24 = arith.constant dense<0.000000e+00> : vector<8xf32>
    %32 = vector.multi_reduction <add>, %31, %cst_24 [1] : vector<8x16xf32> to vector<8xf32>
    %33 = vector.shape_cast %32 : vector<8xf32> to vector<8x1xf32>
    %34 = arith.maximumf %16, %33 : vector<8x1xf32>
    %35 = arith.subf %16, %34 : vector<8x1xf32>
    %36 = math.exp %35 : vector<8x1xf32>
    %37 = arith.subf %33, %34 : vector<8x1xf32>
    %38 = math.exp %37 : vector<8x1xf32>
    %39 = arith.addf %36, %38 : vector<8x1xf32>
    %40 = tpu.reciprocal %39 {approx = true} : vector<8x1xf32> -> vector<8x1xf32>
    %41 = arith.mulf %36, %40 : vector<8x1xf32>
    %42 = vector.broadcast %41 : vector<8x1xf32> to vector<8x32xf32>
    %43 = arith.mulf %1, %42 : vector<8x32xf32>
    %44 = arith.mulf %38, %40 : vector<8x1xf32>
    %45 = vector.broadcast %44 : vector<8x1xf32> to vector<8x32xf32>
    %46 = arith.mulf %18, %45 : vector<8x32xf32>
    %47 = arith.addf %43, %46 : vector<8x32xf32>
    %c2 = arith.constant 2 : index
    %c0_25 = arith.constant 0 : index
    %c0_26 = arith.constant 0 : index
    %48 = vector.load %arg0[%c2, %c0_25, %c0_26] : memref<4x8x32xf32, #tpu.memory_space<vmem>>, vector<1x8x32xf32>
    %49 = vector.shape_cast %48 : vector<1x8x32xf32> to vector<8x32xf32>
    %50 = arith.truncf %49 : vector<8x32xf32> to vector<8x32xbf16>
    %c1_27 = arith.constant 1 : index
    %c0_28 = arith.constant 0 : index
    %c0_29 = arith.constant 0 : index
    %51 = vector.load %arg1[%c1_27, %c0_28, %c0_29] : memref<2x32x16xbf16, #tpu.memory_space<vmem>>, vector<1x32x16xbf16>
    %52 = vector.shape_cast %51 : vector<1x32x16xbf16> to vector<32x16xbf16>
    %cst_30 = arith.constant dense<0.000000e+00> : vector<8x16xf32>
    %53 = tpu.matmul %50, %52, %cst_30 {dimension_numbers = #tpu.dot_dimension_numbers<[1], [0], [0], [1], [0, 0, 1, 1], [], []>} : vector<8x32xbf16>, vector<32x16xbf16>, vector<8x16xf32> -> vector<8x16xf32>
    %c1_31 = arith.constant 1 : index
    %c0_32 = arith.constant 0 : index
    %c0_33 = arith.constant 0 : index
    %54 = vector.load %arg2[%c1_31, %c0_32, %c0_33] : memref<2x1x16xf32, #tpu.memory_space<vmem>>, vector<1x1x16xf32>
    %55 = vector.shape_cast %54 : vector<1x1x16xf32> to vector<1x16xf32>
    %56 = vector.broadcast %55 : vector<1x16xf32> to vector<8x16xf32>
    %57 = arith.addf %53, %56 : vector<8x16xf32>
    %58 = math.tanh %57 : vector<8x16xf32>
    %c1_34 = arith.constant 1 : index
    %c0_35 = arith.constant 0 : index
    %c0_36 = arith.constant 0 : index
    %59 = vector.load %arg3[%c1_34, %c0_35, %c0_36] : memref<2x1x16xf32, #tpu.memory_space<vmem>>, vector<1x1x16xf32>
    %60 = vector.shape_cast %59 : vector<1x1x16xf32> to vector<1x16xf32>
    %61 = vector.broadcast %60 : vector<1x16xf32> to vector<8x16xf32>
    %62 = arith.mulf %58, %61 : vector<8x16xf32>
    %cst_37 = arith.constant dense<0.000000e+00> : vector<8xf32>
    %63 = vector.multi_reduction <add>, %62, %cst_37 [1] : vector<8x16xf32> to vector<8xf32>
    %64 = vector.shape_cast %63 : vector<8xf32> to vector<8x1xf32>
    %c3 = arith.constant 3 : index
    %c0_38 = arith.constant 0 : index
    %c0_39 = arith.constant 0 : index
    %65 = vector.load %arg0[%c3, %c0_38, %c0_39] : memref<4x8x32xf32, #tpu.memory_space<vmem>>, vector<1x8x32xf32>
    %66 = vector.shape_cast %65 : vector<1x8x32xf32> to vector<8x32xf32>
    %67 = arith.truncf %66 : vector<8x32xf32> to vector<8x32xbf16>
    %c1_40 = arith.constant 1 : index
    %c0_41 = arith.constant 0 : index
    %c0_42 = arith.constant 0 : index
    %68 = vector.load %arg1[%c1_40, %c0_41, %c0_42] : memref<2x32x16xbf16, #tpu.memory_space<vmem>>, vector<1x32x16xbf16>
    %69 = vector.shape_cast %68 : vector<1x32x16xbf16> to vector<32x16xbf16>
    %cst_43 = arith.constant dense<0.000000e+00> : vector<8x16xf32>
    %70 = tpu.matmul %67, %69, %cst_43 {dimension_numbers = #tpu.dot_dimension_numbers<[1], [0], [0], [1], [0, 0, 1, 1], [], []>} : vector<8x32xbf16>, vector<32x16xbf16>, vector<8x16xf32> -> vector<8x16xf32>
    %c1_44 = arith.constant 1 : index
    %c0_45 = arith.constant 0 : index
    %c0_46 = arith.constant 0 : index
    %71 = vector.load %arg2[%c1_44, %c0_45, %c0_46] : memref<2x1x16xf32, #tpu.memory_space<vmem>>, vector<1x1x16xf32>
    %72 = vector.shape_cast %71 : vector<1x1x16xf32> to vector<1x16xf32>
    %73 = vector.broadcast %72 : vector<1x16xf32> to vector<8x16xf32>
    %74 = arith.addf %70, %73 : vector<8x16xf32>
    %75 = math.tanh %74 : vector<8x16xf32>
    %c1_47 = arith.constant 1 : index
    %c0_48 = arith.constant 0 : index
    %c0_49 = arith.constant 0 : index
    %76 = vector.load %arg3[%c1_47, %c0_48, %c0_49] : memref<2x1x16xf32, #tpu.memory_space<vmem>>, vector<1x1x16xf32>
    %77 = vector.shape_cast %76 : vector<1x1x16xf32> to vector<1x16xf32>
    %78 = vector.broadcast %77 : vector<1x16xf32> to vector<8x16xf32>
    %79 = arith.mulf %75, %78 : vector<8x16xf32>
    %cst_50 = arith.constant dense<0.000000e+00> : vector<8xf32>
    %80 = vector.multi_reduction <add>, %79, %cst_50 [1] : vector<8x16xf32> to vector<8xf32>
    %81 = vector.shape_cast %80 : vector<8xf32> to vector<8x1xf32>
    %82 = arith.maximumf %64, %81 : vector<8x1xf32>
    %83 = arith.subf %64, %82 : vector<8x1xf32>
    %84 = math.exp %83 : vector<8x1xf32>
    %85 = arith.subf %81, %82 : vector<8x1xf32>
    %86 = math.exp %85 : vector<8x1xf32>
    %87 = arith.addf %84, %86 : vector<8x1xf32>
    %88 = tpu.reciprocal %87 {approx = true} : vector<8x1xf32> -> vector<8x1xf32>
    %89 = arith.mulf %84, %88 : vector<8x1xf32>
    %90 = vector.broadcast %89 : vector<8x1xf32> to vector<8x32xf32>
    %91 = arith.mulf %49, %90 : vector<8x32xf32>
    %92 = arith.mulf %86, %88 : vector<8x1xf32>
    %93 = vector.broadcast %92 : vector<8x1xf32> to vector<8x32xf32>
    %94 = arith.mulf %66, %93 : vector<8x32xf32>
    %95 = arith.addf %91, %94 : vector<8x32xf32>
    %96 = arith.truncf %47 : vector<8x32xf32> to vector<8x32xbf16>
    %c0_51 = arith.constant 0 : index
    %c0_52 = arith.constant 0 : index
    %97 = vector.load %arg4[%c0_51, %c0_52] : memref<32x16xbf16, #tpu.memory_space<vmem>>, vector<32x16xbf16>
    %cst_53 = arith.constant dense<0.000000e+00> : vector<8x16xf32>
    %98 = tpu.matmul %96, %97, %cst_53 {dimension_numbers = #tpu.dot_dimension_numbers<[1], [0], [0], [1], [0, 0, 1, 1], [], []>} : vector<8x32xbf16>, vector<32x16xbf16>, vector<8x16xf32> -> vector<8x16xf32>
    %c0_54 = arith.constant 0 : index
    %c0_55 = arith.constant 0 : index
    %99 = vector.load %arg5[%c0_54, %c0_55] : memref<1x16xf32, #tpu.memory_space<vmem>>, vector<1x16xf32>
    %100 = vector.broadcast %99 : vector<1x16xf32> to vector<8x16xf32>
    %101 = arith.addf %98, %100 : vector<8x16xf32>
    %102 = math.tanh %101 : vector<8x16xf32>
    %c0_56 = arith.constant 0 : index
    %c0_57 = arith.constant 0 : index
    %103 = vector.load %arg6[%c0_56, %c0_57] : memref<1x16xf32, #tpu.memory_space<vmem>>, vector<1x16xf32>
    %104 = vector.broadcast %103 : vector<1x16xf32> to vector<8x16xf32>
    %105 = arith.mulf %102, %104 : vector<8x16xf32>
    %cst_58 = arith.constant dense<0.000000e+00> : vector<8xf32>
    %106 = vector.multi_reduction <add>, %105, %cst_58 [1] : vector<8x16xf32> to vector<8xf32>
    %107 = vector.shape_cast %106 : vector<8xf32> to vector<8x1xf32>
    %108 = arith.truncf %95 : vector<8x32xf32> to vector<8x32xbf16>
    %c0_59 = arith.constant 0 : index
    %c0_60 = arith.constant 0 : index
    %109 = vector.load %arg4[%c0_59, %c0_60] : memref<32x16xbf16, #tpu.memory_space<vmem>>, vector<32x16xbf16>
    %cst_61 = arith.constant dense<0.000000e+00> : vector<8x16xf32>
    %110 = tpu.matmul %108, %109, %cst_61 {dimension_numbers = #tpu.dot_dimension_numbers<[1], [0], [0], [1], [0, 0, 1, 1], [], []>} : vector<8x32xbf16>, vector<32x16xbf16>, vector<8x16xf32> -> vector<8x16xf32>
    %c0_62 = arith.constant 0 : index
    %c0_63 = arith.constant 0 : index
    %111 = vector.load %arg5[%c0_62, %c0_63] : memref<1x16xf32, #tpu.memory_space<vmem>>, vector<1x16xf32>
    %112 = vector.broadcast %111 : vector<1x16xf32> to vector<8x16xf32>
    %113 = arith.addf %110, %112 : vector<8x16xf32>
    %114 = math.tanh %113 : vector<8x16xf32>
    %c0_64 = arith.constant 0 : index
    %c0_65 = arith.constant 0 : index
    %115 = vector.load %arg6[%c0_64, %c0_65] : memref<1x16xf32, #tpu.memory_space<vmem>>, vector<1x16xf32>
    %116 = vector.broadcast %115 : vector<1x16xf32> to vector<8x16xf32>
    %117 = arith.mulf %114, %116 : vector<8x16xf32>
    %cst_66 = arith.constant dense<0.000000e+00> : vector<8xf32>
    %118 = vector.multi_reduction <add>, %117, %cst_66 [1] : vector<8x16xf32> to vector<8xf32>
    %119 = vector.shape_cast %118 : vector<8xf32> to vector<8x1xf32>
    %120 = arith.maximumf %107, %119 : vector<8x1xf32>
    %121 = arith.subf %107, %120 : vector<8x1xf32>
    %122 = math.exp %121 : vector<8x1xf32>
    %123 = arith.subf %119, %120 : vector<8x1xf32>
    %124 = math.exp %123 : vector<8x1xf32>
    %125 = arith.addf %122, %124 : vector<8x1xf32>
    %126 = tpu.reciprocal %125 {approx = true} : vector<8x1xf32> -> vector<8x1xf32>
    %127 = arith.mulf %122, %126 : vector<8x1xf32>
    %128 = vector.broadcast %127 : vector<8x1xf32> to vector<8x32xf32>
    %129 = arith.mulf %47, %128 : vector<8x32xf32>
    %130 = arith.mulf %124, %126 : vector<8x1xf32>
    %131 = vector.broadcast %130 : vector<8x1xf32> to vector<8x32xf32>
    %132 = arith.mulf %95, %131 : vector<8x32xf32>
    %133 = arith.addf %129, %132 : vector<8x32xf32>
    %c0_67 = arith.constant 0 : index
    %c0_68 = arith.constant 0 : index
    %134 = vector.load %arg7[%c0_67, %c0_68] : memref<8x32xf32, #tpu.memory_space<vmem>>, vector<8x32xf32>
    tpu.vector_store %arg7[%c0_67, %c0_68], %133 {strides = array<i32>} : memref<8x32xf32, #tpu.memory_space<vmem>>, vector<8x32xf32>,
    return
  }
}

module attributes {stable_mosaic.version = 11 : i64} {
  func.func @_loss_kernel(%arg0: memref<8x32xf32, #tpu.memory_space<vmem>>, %arg1: memref<4x8xf32, #tpu.memory_space<vmem>>, %arg2: memref<32x32xbf16, #tpu.memory_space<vmem>>, %arg3: memref<1x32xf32, #tpu.memory_space<vmem>>, %arg4: memref<32x32xbf16, #tpu.memory_space<vmem>>, %arg5: memref<1x32xf32, #tpu.memory_space<vmem>>, %arg6: memref<8x16xbf16, #tpu.memory_space<vmem>>, %arg7: memref<1x16xf32, #tpu.memory_space<vmem>>, %arg8: memref<16x16xbf16, #tpu.memory_space<vmem>>, %arg9: memref<1x16xf32, #tpu.memory_space<vmem>>, %arg10: memref<4x4xf32, #tpu.memory_space<vmem>>, %arg11: memref<1x2xf32, #tpu.memory_space<vmem>>) attributes {dimension_semantics = [], scalar_prefetch = 0 : i64, scratch_operands = 0 : i64, tpu.core_type = #tpu.core_type<tc>} {
    %c0 = arith.constant 0 : index
    %c0_0 = arith.constant 0 : index
    %0 = vector.load %arg0[%c0, %c0_0] : memref<8x32xf32, #tpu.memory_space<vmem>>, vector<8x32xf32>
    %1 = arith.truncf %0 : vector<8x32xf32> to vector<8x32xbf16>
    %c0_1 = arith.constant 0 : index
    %c0_2 = arith.constant 0 : index
    %2 = vector.load %arg2[%c0_1, %c0_2] : memref<32x32xbf16, #tpu.memory_space<vmem>>, vector<32x32xbf16>
    %cst = arith.constant dense<0.000000e+00> : vector<8x32xf32>
    %3 = tpu.matmul %1, %2, %cst {dimension_numbers = #tpu.dot_dimension_numbers<[1], [0], [0], [1], [0, 0, 1, 1], [], []>} : vector<8x32xbf16>, vector<32x32xbf16>, vector<8x32xf32> -> vector<8x32xf32>
    %c0_3 = arith.constant 0 : index
    %c0_4 = arith.constant 0 : index
    %4 = vector.load %arg3[%c0_3, %c0_4] : memref<1x32xf32, #tpu.memory_space<vmem>>, vector<1x32xf32>
    %5 = vector.broadcast %4 : vector<1x32xf32> to vector<8x32xf32>
    %6 = arith.addf %3, %5 : vector<8x32xf32>
    %cst_5 = arith.constant 0.000000e+00 : f32
    %7 = vector.broadcast %cst_5 : f32 to vector<8x32xf32>
    %8 = arith.cmpf ogt, %6, %7 : vector<8x32xf32>
    %cst_6 = arith.constant 2.000000e-01 : f32
    %9 = vector.broadcast %cst_6 : f32 to vector<8x32xf32>
    %10 = arith.mulf %9, %6 : vector<8x32xf32>
    %11 = arith.select %8, %6, %10 : vector<8x32xi1>, vector<8x32xf32>
    %12 = arith.truncf %11 : vector<8x32xf32> to vector<8x32xbf16>
    %c0_7 = arith.constant 0 : index
    %c0_8 = arith.constant 0 : index
    %13 = vector.load %arg4[%c0_7, %c0_8] : memref<32x32xbf16, #tpu.memory_space<vmem>>, vector<32x32xbf16>
    %cst_9 = arith.constant dense<0.000000e+00> : vector<8x32xf32>
    %14 = tpu.matmul %12, %13, %cst_9 {dimension_numbers = #tpu.dot_dimension_numbers<[1], [0], [0], [1], [0, 0, 1, 1], [], []>} : vector<8x32xbf16>, vector<32x32xbf16>, vector<8x32xf32> -> vector<8x32xf32>
    %c0_10 = arith.constant 0 : index
    %c0_11 = arith.constant 0 : index
    %15 = vector.load %arg5[%c0_10, %c0_11] : memref<1x32xf32, #tpu.memory_space<vmem>>, vector<1x32xf32>
    %16 = vector.broadcast %15 : vector<1x32xf32> to vector<8x32xf32>
    %17 = arith.addf %14, %16 : vector<8x32xf32>
    %18 = vector.extract_strided_slice %17 {offsets = [0, 0], sizes = [8, 16], strides = [1, 1]} : vector<8x32xf32> to vector<8x16xf32>
    %19 = vector.extract_strided_slice %17 {offsets = [0, 16], sizes = [8, 16], strides = [1, 1]} : vector<8x32xf32> to vector<8x16xf32>
    %20 = vector.extract_strided_slice %18 {offsets = [0, 0], sizes = [4, 16], strides = [1, 1]} : vector<8x16xf32> to vector<4x16xf32>
    %21 = vector.extract_strided_slice %18 {offsets = [4, 0], sizes = [4, 16], strides = [1, 1]} : vector<8x16xf32> to vector<4x16xf32>
    %22 = vector.extract_strided_slice %19 {offsets = [0, 0], sizes = [4, 16], strides = [1, 1]} : vector<8x16xf32> to vector<4x16xf32>
    %23 = vector.extract_strided_slice %19 {offsets = [4, 0], sizes = [4, 16], strides = [1, 1]} : vector<8x16xf32> to vector<4x16xf32>
    %c0_12 = arith.constant 0 : index
    %c0_13 = arith.constant 0 : index
    %24 = vector.load %arg1[%c0_12, %c0_13] : memref<4x8xf32, #tpu.memory_space<vmem>>, vector<4x8xf32>
    %25 = arith.truncf %24 : vector<4x8xf32> to vector<4x8xbf16>
    %c0_14 = arith.constant 0 : index
    %c0_15 = arith.constant 0 : index
    %26 = vector.load %arg6[%c0_14, %c0_15] : memref<8x16xbf16, #tpu.memory_space<vmem>>, vector<8x16xbf16>
    %cst_16 = arith.constant dense<0.000000e+00> : vector<4x16xf32>
    %27 = tpu.matmul %25, %26, %cst_16 {dimension_numbers = #tpu.dot_dimension_numbers<[1], [0], [0], [1], [0, 0, 1, 1], [], []>} : vector<4x8xbf16>, vector<8x16xbf16>, vector<4x16xf32> -> vector<4x16xf32>
    %c0_17 = arith.constant 0 : index
    %c0_18 = arith.constant 0 : index
    %28 = vector.load %arg7[%c0_17, %c0_18] : memref<1x16xf32, #tpu.memory_space<vmem>>, vector<1x16xf32>
    %29 = vector.broadcast %28 : vector<1x16xf32> to vector<4x16xf32>
    %30 = arith.addf %27, %29 : vector<4x16xf32>
    %cst_19 = arith.constant 0.000000e+00 : f32
    %31 = vector.broadcast %cst_19 : f32 to vector<4x16xf32>
    %32 = arith.cmpf ogt, %30, %31 : vector<4x16xf32>
    %cst_20 = arith.constant 2.000000e-01 : f32
    %33 = vector.broadcast %cst_20 : f32 to vector<4x16xf32>
    %34 = arith.mulf %33, %30 : vector<4x16xf32>
    %35 = arith.select %32, %30, %34 : vector<4x16xi1>, vector<4x16xf32>
    %36 = arith.truncf %35 : vector<4x16xf32> to vector<4x16xbf16>
    %c0_21 = arith.constant 0 : index
    %c0_22 = arith.constant 0 : index
    %37 = vector.load %arg8[%c0_21, %c0_22] : memref<16x16xbf16, #tpu.memory_space<vmem>>, vector<16x16xbf16>
    %cst_23 = arith.constant dense<0.000000e+00> : vector<4x16xf32>
    %38 = tpu.matmul %36, %37, %cst_23 {dimension_numbers = #tpu.dot_dimension_numbers<[1], [0], [0], [1], [0, 0, 1, 1], [], []>} : vector<4x16xbf16>, vector<16x16xbf16>, vector<4x16xf32> -> vector<4x16xf32>
    %c0_24 = arith.constant 0 : index
    %c0_25 = arith.constant 0 : index
    %39 = vector.load %arg9[%c0_24, %c0_25] : memref<1x16xf32, #tpu.memory_space<vmem>>, vector<1x16xf32>
    %40 = vector.broadcast %39 : vector<1x16xf32> to vector<4x16xf32>
    %41 = arith.addf %38, %40 : vector<4x16xf32>
    %42 = arith.mulf %20, %20 : vector<4x16xf32>
    %cst_26 = arith.constant dense<0.000000e+00> : vector<4xf32>
    %43 = vector.multi_reduction <add>, %42, %cst_26 [1] : vector<4x16xf32> to vector<4xf32>
    %44 = vector.shape_cast %43 : vector<4xf32> to vector<4x1xf32>
    %cst_27 = arith.constant 1.000000e-16 : f32
    %45 = vector.broadcast %cst_27 : f32 to vector<4x1xf32>
    %46 = arith.maximumf %44, %45 : vector<4x1xf32>
    %47 = math.rsqrt %46 : vector<4x1xf32>
    %48 = vector.broadcast %47 : vector<4x1xf32> to vector<4x16xf32>
    %49 = arith.mulf %20, %48 : vector<4x16xf32>
    %50 = arith.mulf %21, %21 : vector<4x16xf32>
    %cst_28 = arith.constant dense<0.000000e+00> : vector<4xf32>
    %51 = vector.multi_reduction <add>, %50, %cst_28 [1] : vector<4x16xf32> to vector<4xf32>
    %52 = vector.shape_cast %51 : vector<4xf32> to vector<4x1xf32>
    %cst_29 = arith.constant 1.000000e-16 : f32
    %53 = vector.broadcast %cst_29 : f32 to vector<4x1xf32>
    %54 = arith.maximumf %52, %53 : vector<4x1xf32>
    %55 = math.rsqrt %54 : vector<4x1xf32>
    %56 = vector.broadcast %55 : vector<4x1xf32> to vector<4x16xf32>
    %57 = arith.mulf %21, %56 : vector<4x16xf32>
    %58 = arith.mulf %22, %22 : vector<4x16xf32>
    %cst_30 = arith.constant dense<0.000000e+00> : vector<4xf32>
    %59 = vector.multi_reduction <add>, %58, %cst_30 [1] : vector<4x16xf32> to vector<4xf32>
    %60 = vector.shape_cast %59 : vector<4xf32> to vector<4x1xf32>
    %cst_31 = arith.constant 1.000000e-16 : f32
    %61 = vector.broadcast %cst_31 : f32 to vector<4x1xf32>
    %62 = arith.maximumf %60, %61 : vector<4x1xf32>
    %63 = math.rsqrt %62 : vector<4x1xf32>
    %64 = vector.broadcast %63 : vector<4x1xf32> to vector<4x16xf32>
    %65 = arith.mulf %22, %64 : vector<4x16xf32>
    %66 = arith.mulf %23, %23 : vector<4x16xf32>
    %cst_32 = arith.constant dense<0.000000e+00> : vector<4xf32>
    %67 = vector.multi_reduction <add>, %66, %cst_32 [1] : vector<4x16xf32> to vector<4xf32>
    %68 = vector.shape_cast %67 : vector<4xf32> to vector<4x1xf32>
    %cst_33 = arith.constant 1.000000e-16 : f32
    %69 = vector.broadcast %cst_33 : f32 to vector<4x1xf32>
    %70 = arith.maximumf %68, %69 : vector<4x1xf32>
    %71 = math.rsqrt %70 : vector<4x1xf32>
    %72 = vector.broadcast %71 : vector<4x1xf32> to vector<4x16xf32>
    %73 = arith.mulf %23, %72 : vector<4x16xf32>
    %74 = arith.mulf %41, %41 : vector<4x16xf32>
    %cst_34 = arith.constant dense<0.000000e+00> : vector<4xf32>
    %75 = vector.multi_reduction <add>, %74, %cst_34 [1] : vector<4x16xf32> to vector<4xf32>
    %76 = vector.shape_cast %75 : vector<4xf32> to vector<4x1xf32>
    %cst_35 = arith.constant 1.000000e-16 : f32
    %77 = vector.broadcast %cst_35 : f32 to vector<4x1xf32>
    %78 = arith.maximumf %76, %77 : vector<4x1xf32>
    %79 = math.rsqrt %78 : vector<4x1xf32>
    %80 = vector.broadcast %79 : vector<4x1xf32> to vector<4x16xf32>
    %81 = arith.mulf %41, %80 : vector<4x16xf32>
    %82 = tpu.iota {dimensions = array<i32: 0>} : vector<4x4xi32>
    %83 = tpu.iota {dimensions = array<i32: 1>} : vector<4x4xi32>
    %84 = arith.cmpi eq, %82, %83 : vector<4x4xi32>
    %85 = arith.extui %84 : vector<4x4xi1> to vector<4x4xi32>
    %86 = arith.sitofp %85 : vector<4x4xi32> to vector<4x4xf32>
    %c0_36 = arith.constant 0 : index
    %c0_37 = arith.constant 0 : index
    %87 = vector.load %arg10[%c0_36, %c0_37] : memref<4x4xf32, #tpu.memory_space<vmem>>, vector<4x4xf32>
    %cst_38 = arith.constant dense<0.000000e+00> : vector<4x4xf32>
    %88 = tpu.matmul %49, %49, %cst_38 {dimension_numbers = #tpu.dot_dimension_numbers<[1], [1], [0], [0], [0, 0, 1, 0], [], []>} : vector<4x16xf32>, vector<4x16xf32>, vector<4x4xf32> -> vector<4x4xf32>
    %cst_39 = arith.constant 2.000000e+00 : f32
    %89 = vector.broadcast %cst_39 : f32 to vector<4x4xf32>
    %90 = arith.mulf %88, %89 : vector<4x4xf32>
    %91 = math.exp %90 : vector<4x4xf32>
    %cst_40 = arith.constant dense<0.000000e+00> : vector<4x4xf32>
    %92 = tpu.matmul %57, %57, %cst_40 {dimension_numbers = #tpu.dot_dimension_numbers<[1], [1], [0], [0], [0, 0, 1, 0], [], []>} : vector<4x16xf32>, vector<4x16xf32>, vector<4x4xf32> -> vector<4x4xf32>
    %cst_41 = arith.constant 2.000000e+00 : f32
    %93 = vector.broadcast %cst_41 : f32 to vector<4x4xf32>
    %94 = arith.mulf %92, %93 : vector<4x4xf32>
    %95 = math.exp %94 : vector<4x4xf32>
    %cst_42 = arith.constant dense<0.000000e+00> : vector<4x4xf32>
    %96 = tpu.matmul %49, %57, %cst_42 {dimension_numbers = #tpu.dot_dimension_numbers<[1], [1], [0], [0], [0, 0, 1, 0], [], []>} : vector<4x16xf32>, vector<4x16xf32>, vector<4x4xf32> -> vector<4x4xf32>
    %cst_43 = arith.constant 2.000000e+00 : f32
    %97 = vector.broadcast %cst_43 : f32 to vector<4x4xf32>
    %98 = arith.mulf %96, %97 : vector<4x4xf32>
    %99 = math.exp %98 : vector<4x4xf32>
    %cst_44 = arith.constant dense<0.000000e+00> : vector<4x4xf32>
    %100 = tpu.matmul %57, %49, %cst_44 {dimension_numbers = #tpu.dot_dimension_numbers<[1], [1], [0], [0], [0, 0, 1, 0], [], []>} : vector<4x16xf32>, vector<4x16xf32>, vector<4x4xf32> -> vector<4x4xf32>
    %cst_45 = arith.constant 2.000000e+00 : f32
    %101 = vector.broadcast %cst_45 : f32 to vector<4x4xf32>
    %102 = arith.mulf %100, %101 : vector<4x4xf32>
    %103 = math.exp %102 : vector<4x4xf32>
    %104 = arith.mulf %91, %86 : vector<4x4xf32>
    %cst_46 = arith.constant dense<0.000000e+00> : vector<4xf32>
    %105 = vector.multi_reduction <add>, %104, %cst_46 [1] : vector<4x4xf32> to vector<4xf32>
    %106 = vector.shape_cast %105 : vector<4xf32> to vector<4x1xf32>
    %107 = arith.mulf %99, %86 : vector<4x4xf32>
    %cst_47 = arith.constant dense<0.000000e+00> : vector<4xf32>
    %108 = vector.multi_reduction <add>, %107, %cst_47 [1] : vector<4x4xf32> to vector<4xf32>
    %109 = vector.shape_cast %108 : vector<4xf32> to vector<4x1xf32>
    %110 = arith.mulf %99, %87 : vector<4x4xf32>
    %cst_48 = arith.constant dense<0.000000e+00> : vector<4xf32>
    %111 = vector.multi_reduction <add>, %110, %cst_48 [1] : vector<4x4xf32> to vector<4xf32>
    %112 = vector.shape_cast %111 : vector<4xf32> to vector<4x1xf32>
    %113 = arith.addf %109, %112 : vector<4x1xf32>
    %114 = arith.mulf %91, %87 : vector<4x4xf32>
    %cst_49 = arith.constant dense<0.000000e+00> : vector<4xf32>
    %115 = vector.multi_reduction <add>, %114, %cst_49 [1] : vector<4x4xf32> to vector<4xf32>
    %116 = vector.shape_cast %115 : vector<4xf32> to vector<4x1xf32>
    %117 = arith.addf %113, %116 : vector<4x1xf32>
    %cst_50 = arith.constant 1.000000e+00 : f32
    %118 = vector.broadcast %cst_50 : f32 to vector<4x4xf32>
    %119 = arith.subf %118, %87 : vector<4x4xf32>
    %120 = arith.mulf %99, %119 : vector<4x4xf32>
    %cst_51 = arith.constant dense<0.000000e+00> : vector<4xf32>
    %121 = vector.multi_reduction <add>, %120, %cst_51 [1] : vector<4x4xf32> to vector<4xf32>
    %122 = vector.shape_cast %121 : vector<4xf32> to vector<4x1xf32>
    %123 = arith.mulf %91, %119 : vector<4x4xf32>
    %cst_52 = arith.constant dense<0.000000e+00> : vector<4xf32>
    %124 = vector.multi_reduction <add>, %123, %cst_52 [1] : vector<4x4xf32> to vector<4xf32>
    %125 = vector.shape_cast %124 : vector<4xf32> to vector<4x1xf32>
    %126 = arith.addf %122, %125 : vector<4x1xf32>
    %127 = arith.subf %126, %106 : vector<4x1xf32>
    %128 = arith.divf %117, %127 : vector<4x1xf32>
    %129 = math.log %128 : vector<4x1xf32>
    %cst_53 = arith.constant 0.000000e+00 : f32
    %130 = vector.broadcast %cst_53 : f32 to vector<4x1xf32>
    %131 = arith.subf %130, %129 : vector<4x1xf32>
    %cst_54 = arith.constant dense<0.000000e+00> : vector<1xf32>
    %132 = vector.multi_reduction <add>, %131, %cst_54 [0] : vector<4x1xf32> to vector<1xf32>
    %133 = vector.shape_cast %132 : vector<1xf32> to vector<1x1xf32>
    %cst_55 = arith.constant 2.500000e-01 : f32
    %134 = vector.broadcast %cst_55 : f32 to vector<1x1xf32>
    %135 = arith.mulf %133, %134 : vector<1x1xf32>
    %136 = arith.mulf %95, %86 : vector<4x4xf32>
    %cst_56 = arith.constant dense<0.000000e+00> : vector<4xf32>
    %137 = vector.multi_reduction <add>, %136, %cst_56 [1] : vector<4x4xf32> to vector<4xf32>
    %138 = vector.shape_cast %137 : vector<4xf32> to vector<4x1xf32>
    %139 = arith.mulf %103, %86 : vector<4x4xf32>
    %cst_57 = arith.constant dense<0.000000e+00> : vector<4xf32>
    %140 = vector.multi_reduction <add>, %139, %cst_57 [1] : vector<4x4xf32> to vector<4xf32>
    %141 = vector.shape_cast %140 : vector<4xf32> to vector<4x1xf32>
    %142 = arith.mulf %103, %87 : vector<4x4xf32>
    %cst_58 = arith.constant dense<0.000000e+00> : vector<4xf32>
    %143 = vector.multi_reduction <add>, %142, %cst_58 [1] : vector<4x4xf32> to vector<4xf32>
    %144 = vector.shape_cast %143 : vector<4xf32> to vector<4x1xf32>
    %145 = arith.addf %141, %144 : vector<4x1xf32>
    %146 = arith.mulf %95, %87 : vector<4x4xf32>
    %cst_59 = arith.constant dense<0.000000e+00> : vector<4xf32>
    %147 = vector.multi_reduction <add>, %146, %cst_59 [1] : vector<4x4xf32> to vector<4xf32>
    %148 = vector.shape_cast %147 : vector<4xf32> to vector<4x1xf32>
    %149 = arith.addf %145, %148 : vector<4x1xf32>
    %cst_60 = arith.constant 1.000000e+00 : f32
    %150 = vector.broadcast %cst_60 : f32 to vector<4x4xf32>
    %151 = arith.subf %150, %87 : vector<4x4xf32>
    %152 = arith.mulf %103, %151 : vector<4x4xf32>
    %cst_61 = arith.constant dense<0.000000e+00> : vector<4xf32>
    %153 = vector.multi_reduction <add>, %152, %cst_61 [1] : vector<4x4xf32> to vector<4xf32>
    %154 = vector.shape_cast %153 : vector<4xf32> to vector<4x1xf32>
    %155 = arith.mulf %95, %151 : vector<4x4xf32>
    %cst_62 = arith.constant dense<0.000000e+00> : vector<4xf32>
    %156 = vector.multi_reduction <add>, %155, %cst_62 [1] : vector<4x4xf32> to vector<4xf32>
    %157 = vector.shape_cast %156 : vector<4xf32> to vector<4x1xf32>
    %158 = arith.addf %154, %157 : vector<4x1xf32>
    %159 = arith.subf %158, %138 : vector<4x1xf32>
    %160 = arith.divf %149, %159 : vector<4x1xf32>
    %161 = math.log %160 : vector<4x1xf32>
    %cst_63 = arith.constant 0.000000e+00 : f32
    %162 = vector.broadcast %cst_63 : f32 to vector<4x1xf32>
    %163 = arith.subf %162, %161 : vector<4x1xf32>
    %cst_64 = arith.constant dense<0.000000e+00> : vector<1xf32>
    %164 = vector.multi_reduction <add>, %163, %cst_64 [0] : vector<4x1xf32> to vector<1xf32>
    %165 = vector.shape_cast %164 : vector<1xf32> to vector<1x1xf32>
    %cst_65 = arith.constant 2.500000e-01 : f32
    %166 = vector.broadcast %cst_65 : f32 to vector<1x1xf32>
    %167 = arith.mulf %165, %166 : vector<1x1xf32>
    %168 = arith.addf %135, %167 : vector<1x1xf32>
    %cst_66 = arith.constant 5.000000e-01 : f32
    %169 = vector.broadcast %cst_66 : f32 to vector<1x1xf32>
    %170 = arith.mulf %169, %168 : vector<1x1xf32>
    %cst_67 = arith.constant dense<0.000000e+00> : vector<4x4xf32>
    %171 = tpu.matmul %65, %65, %cst_67 {dimension_numbers = #tpu.dot_dimension_numbers<[1], [1], [0], [0], [0, 0, 1, 0], [], []>} : vector<4x16xf32>, vector<4x16xf32>, vector<4x4xf32> -> vector<4x4xf32>
    %cst_68 = arith.constant 2.000000e+00 : f32
    %172 = vector.broadcast %cst_68 : f32 to vector<4x4xf32>
    %173 = arith.mulf %171, %172 : vector<4x4xf32>
    %174 = math.exp %173 : vector<4x4xf32>
    %cst_69 = arith.constant dense<0.000000e+00> : vector<4x4xf32>
    %175 = tpu.matmul %73, %73, %cst_69 {dimension_numbers = #tpu.dot_dimension_numbers<[1], [1], [0], [0], [0, 0, 1, 0], [], []>} : vector<4x16xf32>, vector<4x16xf32>, vector<4x4xf32> -> vector<4x4xf32>
    %cst_70 = arith.constant 2.000000e+00 : f32
    %176 = vector.broadcast %cst_70 : f32 to vector<4x4xf32>
    %177 = arith.mulf %175, %176 : vector<4x4xf32>
    %178 = math.exp %177 : vector<4x4xf32>
    %cst_71 = arith.constant dense<0.000000e+00> : vector<4x4xf32>
    %179 = tpu.matmul %65, %81, %cst_71 {dimension_numbers = #tpu.dot_dimension_numbers<[1], [1], [0], [0], [0, 0, 1, 0], [], []>} : vector<4x16xf32>, vector<4x16xf32>, vector<4x4xf32> -> vector<4x4xf32>
    %cst_72 = arith.constant 2.000000e+00 : f32
    %180 = vector.broadcast %cst_72 : f32 to vector<4x4xf32>
    %181 = arith.mulf %179, %180 : vector<4x4xf32>
    %182 = math.exp %181 : vector<4x4xf32>
    %cst_73 = arith.constant dense<0.000000e+00> : vector<4x4xf32>
    %183 = tpu.matmul %73, %81, %cst_73 {dimension_numbers = #tpu.dot_dimension_numbers<[1], [1], [0], [0], [0, 0, 1, 0], [], []>} : vector<4x16xf32>, vector<4x16xf32>, vector<4x4xf32> -> vector<4x4xf32>
    %cst_74 = arith.constant 2.000000e+00 : f32
    %184 = vector.broadcast %cst_74 : f32 to vector<4x4xf32>
    %185 = arith.mulf %183, %184 : vector<4x4xf32>
    %186 = math.exp %185 : vector<4x4xf32>
    %187 = arith.mulf %174, %86 : vector<4x4xf32>
    %cst_75 = arith.constant dense<0.000000e+00> : vector<4xf32>
    %188 = vector.multi_reduction <add>, %187, %cst_75 [1] : vector<4x4xf32> to vector<4xf32>
    %189 = vector.shape_cast %188 : vector<4xf32> to vector<4x1xf32>
    %190 = arith.mulf %182, %86 : vector<4x4xf32>
    %cst_76 = arith.constant dense<0.000000e+00> : vector<4xf32>
    %191 = vector.multi_reduction <add>, %190, %cst_76 [1] : vector<4x4xf32> to vector<4xf32>
    %192 = vector.shape_cast %191 : vector<4xf32> to vector<4x1xf32>
    %cst_77 = arith.constant dense<0.000000e+00> : vector<4xf32>
    %193 = vector.multi_reduction <add>, %174, %cst_77 [1] : vector<4x4xf32> to vector<4xf32>
    %194 = vector.shape_cast %193 : vector<4xf32> to vector<4x1xf32>
    %cst_78 = arith.constant dense<0.000000e+00> : vector<4xf32>
    %195 = vector.multi_reduction <add>, %182, %cst_78 [1] : vector<4x4xf32> to vector<4xf32>
    %196 = vector.shape_cast %195 : vector<4xf32> to vector<4x1xf32>
    %197 = arith.addf %194, %196 : vector<4x1xf32>
    %198 = arith.subf %197, %189 : vector<4x1xf32>
    %199 = arith.divf %192, %198 : vector<4x1xf32>
    %200 = math.log %199 : vector<4x1xf32>
    %cst_79 = arith.constant 0.000000e+00 : f32
    %201 = vector.broadcast %cst_79 : f32 to vector<4x1xf32>
    %202 = arith.subf %201, %200 : vector<4x1xf32>
    %cst_80 = arith.constant dense<0.000000e+00> : vector<1xf32>
    %203 = vector.multi_reduction <add>, %202, %cst_80 [0] : vector<4x1xf32> to vector<1xf32>
    %204 = vector.shape_cast %203 : vector<1xf32> to vector<1x1xf32>
    %cst_81 = arith.constant 2.500000e-01 : f32
    %205 = vector.broadcast %cst_81 : f32 to vector<1x1xf32>
    %206 = arith.mulf %204, %205 : vector<1x1xf32>
    %207 = arith.mulf %178, %86 : vector<4x4xf32>
    %cst_82 = arith.constant dense<0.000000e+00> : vector<4xf32>
    %208 = vector.multi_reduction <add>, %207, %cst_82 [1] : vector<4x4xf32> to vector<4xf32>
    %209 = vector.shape_cast %208 : vector<4xf32> to vector<4x1xf32>
    %210 = arith.mulf %186, %86 : vector<4x4xf32>
    %cst_83 = arith.constant dense<0.000000e+00> : vector<4xf32>
    %211 = vector.multi_reduction <add>, %210, %cst_83 [1] : vector<4x4xf32> to vector<4xf32>
    %212 = vector.shape_cast %211 : vector<4xf32> to vector<4x1xf32>
    %cst_84 = arith.constant dense<0.000000e+00> : vector<4xf32>
    %213 = vector.multi_reduction <add>, %178, %cst_84 [1] : vector<4x4xf32> to vector<4xf32>
    %214 = vector.shape_cast %213 : vector<4xf32> to vector<4x1xf32>
    %cst_85 = arith.constant dense<0.000000e+00> : vector<4xf32>
    %215 = vector.multi_reduction <add>, %186, %cst_85 [1] : vector<4x4xf32> to vector<4xf32>
    %216 = vector.shape_cast %215 : vector<4xf32> to vector<4x1xf32>
    %217 = arith.addf %214, %216 : vector<4x1xf32>
    %218 = arith.subf %217, %209 : vector<4x1xf32>
    %219 = arith.divf %212, %218 : vector<4x1xf32>
    %220 = math.log %219 : vector<4x1xf32>
    %cst_86 = arith.constant 0.000000e+00 : f32
    %221 = vector.broadcast %cst_86 : f32 to vector<4x1xf32>
    %222 = arith.subf %221, %220 : vector<4x1xf32>
    %cst_87 = arith.constant dense<0.000000e+00> : vector<1xf32>
    %223 = vector.multi_reduction <add>, %222, %cst_87 [0] : vector<4x1xf32> to vector<1xf32>
    %224 = vector.shape_cast %223 : vector<1xf32> to vector<1x1xf32>
    %cst_88 = arith.constant 2.500000e-01 : f32
    %225 = vector.broadcast %cst_88 : f32 to vector<1x1xf32>
    %226 = arith.mulf %224, %225 : vector<1x1xf32>
    %227 = arith.addf %206, %226 : vector<1x1xf32>
    %cst_89 = arith.constant 5.000000e-01 : f32
    %228 = vector.broadcast %cst_89 : f32 to vector<1x1xf32>
    %229 = arith.mulf %228, %227 : vector<1x1xf32>
    %230 = tpu.concatenate %170, %229 in 1 : vector<1x1xf32>, vector<1x1xf32> -> vector<1x2xf32>
    %c0_90 = arith.constant 0 : index
    %c0_91 = arith.constant 0 : index
    %231 = vector.load %arg11[%c0_90, %c0_91] : memref<1x2xf32, #tpu.memory_space<vmem>>, vector<1x2xf32>
    tpu.vector_store %arg11[%c0_90, %c0_91], %230 {strides = array<i32>} : memref<1x2xf32, #tpu.memory_space<vmem>>, vector<1x2xf32>,
    return
  }
}

</mosaic_0001>

<bundles_post_ra>
// kernel: mymodel_forward.4
= control target key start
LH: loop header
LB: loop body
LE: loop exit
PB: predicated region body
PF: predicated region fallthrough
CT: control target
= control target key end

     0   :  { %v695_v0 = vmov 0.0   ;;  %vm696_vm0 = vmmov 0   ;;  %vm78_vm1 = vcmask 130048   ;;  %vm215_vm5 = vcmask 261120   ;;  %s889_s3 = inlined_call_operand.vmem [shape: bf16[16,32], index: 3, kind: input, shape index: {}]   ;;  %s890_s0 = inlined_call_operand.vmem [shape: bf16[12,16], index: 0, kind: input, shape index: {}]   ;;  %s891_s5 = inlined_call_operand.vmem [shape: bf16[16,32], index: 5, kind: input, shape index: {}]   ;;  %s892_s1 = inlined_call_operand.vmem [shape: bf16[8,16], index: 1, kind: input, shape index: {}]   ;;  %s893_s7 = inlined_call_operand.vmem [shape: bf16[32,32], index: 7, kind: input, shape index: {}]   ;;  %s894_s9 = inlined_call_operand.vmem [shape: bf16[32,32], index: 9, kind: input, shape index: {}]   ;;  %s895_s4 = inlined_call_operand.vmem [shape: f32[1,32], index: 4, kind: input, shape index: {}]   ;;  %s896_s6 = inlined_call_operand.vmem [shape: f32[1,32], index: 6, kind: input, shape index: {}]   ;;  %s897_s11 = inlined_call_operand.vmem [shape: bf16[32,32], index: 11, kind: input, shape index: {}]   ;;  %s898_s10 = inlined_call_operand.vmem [shape: f32[1,32], index: 10, kind: input, shape index: {}]   ;;  %s899_s8 = inlined_call_operand.vmem [shape: f32[1,32], index: 8, kind: input, shape index: {}]   ;;  %s900_s14 = inlined_call_operand.vmem [shape: bf16[8,32], index: 14, kind: input, shape index: {}]   ;;  %s901_s12 = inlined_call_operand.vmem [shape: bf16[8,32], index: 12, kind: input, shape index: {}]   ;;  %s902_s2 = inlined_call_operand.vmem [shape: bf16[8,8], index: 2, kind: input, shape index: {}]   ;;  %s903_s15 = inlined_call_operand.vmem [shape: f32[1,32], index: 15, kind: input, shape index: {}]   ;;  %s904_s17 = inlined_call_operand.vmem [shape: f32[8,32], index: 17, kind: output, shape index: {1}]   ;;  %s905_s13 = inlined_call_operand.vmem [shape: f32[1,32], index: 13, kind: input, shape index: {}]   ;;  %s906_s16 = inlined_call_operand.vmem [shape: f32[12,32], index: 16, kind: output, shape index: {0}]  }
   0x1   :  { %907 = sst [smem:[#allocation2_spill]] %s889_s3  ;;  %630 = vmatprep.subr.bf16.mxu0 %v695_v0  ;;  %632 = vmatprep.mubr.msk.bf16.mxu0 %vm696_vm0, %v695_v0  ;;  %v688_v3 = vld [vmem:[%s891_s5] sm:$0xff]   ;;  %v689_v5 = vld [vmem:[%s893_s7 + $0x8] sm:$0xff]   ;;  %vm467_vm9 = vcmask 1043456   ;;  %vm463_vm10 = vcmask 64512  }
   0x2   :  { %908 = sst [smem:[#allocation3_spill]] %s890_s0  ;;  %636 = vmatprep.subr.bf16.mxu1 %v695_v0  ;;  %638 = vmatprep.mubr.msk.bf16.mxu1 %vm696_vm0, %v695_v0  ;;  %v129_v4 = vld [vmem:[%s892_s1] sm:$0xf]  ;;  %v691_v7 = vld [vmem:[%s894_s9 + $0x8] sm:$0xff]  }
   0x3   :  { %s909_s26 = sld [smem:[#allocation2_spill]]  ;;  %637 = vmatpush3.bf16.msra.mxu1 %v688_v3  ;;  %v690_v6 = vld [vmem:[%s893_s7] sm:$0xff]   ;;  %v693_v30 = vld [vmem:[%s897_s11 + $0x8] sm:$0xff]  }
   0x4   :  { %s910_s29 = sld [smem:[#allocation3_spill]]  ;;  %650 = vmatprep.subr.bf16.mxu1 %v695_v0  ;;  %v692_v8 = vld [vmem:[%s894_s9] sm:$0xff]  }
   0x5   :  { %v588_v9 = vld [vmem:[%s895_s4] ss:$0 sm:$0xff] }
   0x6   :  { %639 = vmatmul.mubr.msk.bf16.vlgmr.msra.gmra.mxu1 %vm78_vm1, %v129_v4  ;;  %v592_v11 = vld [vmem:[%s896_s6] ss:$0 sm:$0xff] }
   0x7   :  { %654 = vmatprep.mubr.msk.bf16.mxu1 %vm696_vm0, %v695_v0  ;;  %651 = vmatpush3.bf16.msra.mxu1 %v691_v7  ;;  %v694_v31 = vld [vmem:[%s897_s11] sm:$0xff]  }
   0x8   :  { %652 = vmatprep.subr.bf16.mxu1 %v695_v0  ;;  %v599_v32 = vld [vmem:[%s898_s10] ss:$0 sm:$0xff] }
   0x9   :  { %v686_v1 = vld [vmem:[%s909_s26] sm:$0xff]  }
   0xa   :  { %v687_v2 = vld [vmem:[%s910_s29] sm:$0x3f]   ;;  %631 = vmatpush3.bf16.msra.mxu0 %v686_v1 }
   0xb   :  { %642 = vmatprep.subr.bf16.mxu0 %v695_v0  ;;  %653 = vmatpush3.bf16.msra.mxu1 %v692_v8  ;;  %v595_v33 = vld [vmem:[%s899_s8] ss:$0 sm:$0xff] }
   0xc   :  { %666 = vmatprep.subr.bf16.mxu1 %v695_v0  ;;  %v522_v59 = vld [vmem:[%s900_s14] sm:$0xf] }
   0xd   :  { %633 = vmatmul.mubr.msk.bf16.vlgmr.msra.gmra.mxu0 %vm78_vm1, %v687_v2  ;;  %v534_v60 = vsel %vm467_vm9, %v522_v59, 0  ;;  %v455_v61 = vld [vmem:[%s901_s12] sm:$0xf] }
   0xe   :  { %646 = vmatprep.mubr.msk.bf16.mxu0 %vm696_vm0, %v695_v0  ;;  %643 = vmatpush3.bf16.msra.mxu0 %v689_v5  ;;  %v469_v62 = vsel %vm467_vm9, %v455_v61, 0  ;;  %v521_v63 = vld [vmem:[%s902_s2] sm:$0xf] }
   0xf   :  { %644 = vmatprep.subr.bf16.mxu0 %v695_v0 }
  0x12   :  { %645 = vmatpush3.bf16.msra.mxu0 %v690_v6 }
  0x13   :  { %658 = vmatprep.subr.bf16.mxu0 %v695_v0 }
  0xc6   :  { %v182_v14 = vpop.f32.mrf.mxu1 }
  0xc7   :  { %v183_v15 = vadd.f32 %v592_v11, %v182_v14  ;;  %v609_v11 = vld [vmem:[%s903_s15] ss:$0 sm:$0xff] }
  0xc8   :  { %v640_v17 = vpop.f32.mrf.mxu1 }
  0xc9   :  { %vm188_vm2 = vcmp.gt.f32.partialorder %v183_v15, 0.0  ;;  %v189_v20 = vmul.f32 0.2, %v183_v15 }
  0xca   :  { %v185_v22 = vpop.f32.mrf.mxu1 }
  0xcb   :  { %v190_v24 = vsel %vm188_vm2, %v183_v15, %v189_v20 }
  0xcc   :  { %v266_v25 = vpack.c.bf16 %v190_v24, %v190_v24  ;;  %v641_v26 = vpop.f32.mrf.mxu1 }
  0xcd   :  { %v116_v10 = vpop.f32.mrf.mxu0 }
  0xce   :  { %v117_v12 = vadd.f32 %v588_v9, %v116_v10  ;;  %655 = vmatmul.mubr.msk.bf16.vlgmr.msra.gmra.mxu1 %vm215_vm5, %v266_v25 }
  0xcf   :  { %v634_v13 = vpop.f32.mrf.mxu0  ;;  %668 = vmatprep.mubr.msk.bf16.mxu1 %vm696_vm0, %v695_v0 }
  0xd0   :  { %v125_v18 = vmul.f32 0.2, %v117_v12  ;;  %vm123_vm3 = vcmp.gt.f32.partialorder %v117_v12, 0.0 }
  0xd1   :  { %v119_v16 = vpop.f32.mrf.mxu0 }
  0xd2   :  { %v120_v19 = vadd.f32 %v588_v9, %v119_v16  ;;  %v127_v27 = vsel %vm123_vm3, %v117_v12, %v125_v18 }
  0xd3   :  { %v635_v21 = vpop.f32.mrf.mxu0 }
  0xd4   :  { %vm124_vm4 = vcmp.gt.f32.partialorder %v120_v19, 0.0  ;;  %v126_v23 = vmul.f32 0.2, %v120_v19 }
  0xd6   :  { %v128_v28 = vsel %vm124_vm4, %v120_v19, %v126_v23  ;;  %v607_v19 = vld [vmem:[%s905_s13] ss:$0 sm:$0xff] }
  0xd7   :  { %v191_v29 = vpack.c.bf16 %v128_v28, %v127_v27 }
  0xd9   :  { %647 = vmatmul.mubr.msk.bf16.vlgmr.msra.gmra.mxu0 %vm215_vm5, %v191_v29 }
  0xda   :  { %662 = vmatprep.mubr.msk.bf16.mxu0 %vm696_vm0, %v695_v0  ;;  %659 = vmatpush3.bf16.msra.mxu0 %v693_v30 }
  0xdb   :  { %660 = vmatprep.subr.bf16.mxu0 %v695_v0 }
  0xde   :  { %661 = vmatpush3.bf16.msra.mxu0 %v694_v31 }
  0xdf   :  { %672 = vmatprep.subr.bf16.mxu0 %v695_v0 }
 0x18e   :  { %v327_v34 = vpop.f32.mrf.mxu1 }
 0x18f   :  { %v328_v35 = vadd.f32 %v599_v32, %v327_v34 }
 0x190   :  { %v656_v37 = vpop.f32.mrf.mxu1 }
 0x191   :  { %vm333_vm6 = vcmp.gt.f32.partialorder %v328_v35, 0.0  ;;  %v334_v39 = vmul.f32 0.2, %v328_v35 }
 0x192   :  { %v330_v41 = vpop.f32.mrf.mxu1 }
 0x193   :  { %v335_v42 = vsel %vm333_vm6, %v328_v35, %v334_v39 }
 0x194   :  { %v398_v44 = vpack.c.bf16 %v335_v42, %v335_v42  ;;  %v657_v45 = vpop.f32.mrf.mxu1 }
 0x196   :  { %v403_v49 = vsel %vm215_vm5, %v398_v44, 0 }
 0x197   :  { %667 = vmatpush3.bf16.xpose.msra.mxu1 %v403_v49 }
 0x198   :  { %678 = vmatprep.subr.bf16.mxu1 %v695_v0 }
 0x199   :  { %v253_v36 = vpop.f32.mrf.mxu0 }
 0x19a   :  { %v254_v38 = vadd.f32 %v595_v33, %v253_v36 }
 0x19b   :  { %v648_v40 = vpop.f32.mrf.mxu0 }
 0x19c   :  { %v262_v46 = vmul.f32 0.2, %v254_v38  ;;  %vm260_vm7 = vcmp.gt.f32.partialorder %v254_v38, 0.0 }
 0x19d   :  { %v256_v43 = vpop.f32.mrf.mxu0 }
 0x19e   :  { %v257_v47 = vadd.f32 %v595_v33, %v256_v43  ;;  %v264_v51 = vsel %vm260_vm7, %v254_v38, %v262_v46 }
 0x19f   :  { %v649_v48 = vpop.f32.mrf.mxu0 }
 0x1a0   :  { %vm261_vm8 = vcmp.gt.f32.partialorder %v257_v47, 0.0  ;;  %v263_v50 = vmul.f32 0.2, %v257_v47 }
 0x1a2   :  { %v265_v52 = vsel %vm261_vm8, %v257_v47, %v263_v50 }
 0x1a3   :  { %v336_v53 = vpack.c.bf16 %v265_v52, %v264_v51 }
 0x1a5   :  { %663 = vmatmul.mubr.msk.bf16.vlgmr.msra.gmra.mxu0 %vm215_vm5, %v336_v53 }
 0x1a6   :  { %674 = vmatprep.mubr.msk.bf16.mxu0 %vm696_vm0, %v695_v0  ;;  %673 = vmatpush3.bf16.msra.mxu0 %v469_v62 }
 0x265   :  { %v390_v54 = vpop.f32.mrf.mxu0 }
 0x267   :  { %v664_v55 = vpop.f32.mrf.mxu0 }
 0x269   :  { %v393_v56 = vpop.f32.mrf.mxu0 }
 0x26a   :  { %v397_v57 = vpack.c.bf16 %v393_v56, %v390_v54 }
 0x26b   :  { %v665_v58 = vpop.f32.mrf.mxu0 }
 0x26c   :  { %669 = vmatmul.mubr.msk.bf16.vlgmr.msra.gmra.mxu1 %vm215_vm5, %v397_v57 }
 0x26d   :  { %680 = vmatprep.mubr.msk.bf16.mxu1 %vm696_vm0, %v695_v0  ;;  %679 = vmatpush3.bf16.msra.mxu1 %v534_v60  ;;  %vm519_vm0 = vcmask 257024  }
 0x274   :  { %681 = vmatmul.mubr.msk.bf16.vlgmr.msra.gmra.mxu1 %vm463_vm10, %v521_v63 }
 0x32c   :  { %v439_v0 = vpop.f32.mrf.mxu1 }
 0x32d   :  { %v446_v1 = vmul.f32 0.5, %v439_v0 }
 0x32e   :  { %v670_v2 = vpop.f32.mrf.mxu1 }
 0x32f   :  { %v450_v4 = vmul.f32 0.2, %v446_v1  ;;  %vm448_vm11 = vcmp.gt.f32.partialorder %v446_v1, 0.0 }
 0x330   :  { %v442_v3 = vpop.f32.mrf.mxu1 }
 0x331   :  { %v447_v5 = vmul.f32 0.5, %v442_v3  ;;  %v452_v8 = vsel %vm448_vm11, %v446_v1, %v450_v4 }
 0x332   :  { %v671_v6 = vpop.f32.mrf.mxu1 }
 0x333   :  { %vm449_vm12 = vcmp.gt.f32.partialorder %v447_v5, 0.0  ;;  %v451_v7 = vmul.f32 0.2, %v447_v5 }
 0x334   :  { %v570_v12 = vpop.f32.mrf.mxu1 }
 0x335   :  { %v453_v9 = vsel %vm449_vm12, %v447_v5, %v451_v7  ;;  %v571_v13 = vadd.f32 %v609_v11, %v570_v12 }
 0x336   :  { %v454_v10 = vpack.c.bf16 %v453_v9, %v452_v8  ;;  %v682_v14 = vpop.f32.mrf.mxu1 }
 0x337   :  { %vm576_vm13 = vcmp.gt.f32.partialorder %v571_v13, 0.0  ;;  %v577_v15 = vmul.f32 0.2, %v571_v13 }
 0x338   :  { %675 = vmatmul.mubr.msk.bf16.vlgmr.msra.gmra.mxu0 %vm463_vm10, %v454_v10  ;;  %v573_v16 = vpop.f32.mrf.mxu1 }
 0x339   :  { %v578_v17 = vsel %vm576_vm13, %v571_v13, %v577_v15 }
 0x33a   :  { %579 = vst.msk [vmem:[%s904_s17] sm:$0xff] %vm215_vm5, %v578_v17  ;;  %v683_v18 = vpop.f32.mrf.mxu1 }
 0x3f8   :  { %v505_v20 = vpop.f32.mrf.mxu0 }
 0x3f9   :  { %v506_v21 = vadd.f32 %v607_v19, %v505_v20 }
 0x3fa   :  { %v676_v22 = vpop.f32.mrf.mxu0 }
 0x3fb   :  { %vm512_vm14 = vcmp.gt.f32.partialorder %v506_v21, 0.0  ;;  %v514_v23 = vmul.f32 0.2, %v506_v21 }
 0x3fc   :  { %v508_v24 = vpop.f32.mrf.mxu0 }
 0x3fd   :  { %v516_v25 = vsel %vm512_vm14, %v506_v21, %v514_v23  ;;  %v509_v26 = vadd.f32 %v607_v19, %v508_v24 }
 0x3fe   :  { %518 = vst.msk [vmem:[%s906_s16] sm:$0xff] %vm215_vm5, %v516_v25  ;;  %v677_v27 = vpop.f32.mrf.mxu0 }
 0x3ff   :  { %vm513_vm15 = vcmp.gt.f32.partialorder %v509_v26, 0.0  ;;  %v515_v28 = vmul.f32 0.2, %v509_v26 }
 0x401   :  { %v517_v29 = vsel %vm513_vm15, %v509_v26, %v515_v28 }
 0x402   :  { %520 = vst.msk [vmem:[%s906_s16 + $0x8] sm:$0xf] %vm519_vm0, %v517_v29 }

// kernel: mymodel_forward.6
= control target key start
LH: loop header
LB: loop body
LE: loop exit
PB: predicated region body
PF: predicated region fallthrough
CT: control target
= control target key end

     0   :  { %v601_v0 = vmov 0.0   ;;  %vm602_vm0 = vmmov 0   ;;  %vm52_vm1 = vcmask 261120   ;;  %vm105_vm2 = vcmask 130048   ;;  %s751_s1 = inlined_call_operand.vmem [shape: bf16[2,32,16], index: 1, kind: input, shape index: {}]   ;;  %s752_s0 = inlined_call_operand.vmem [shape: f32[4,8,32], index: 0, kind: input, shape index: {}]   ;;  %s753_s2 = inlined_call_operand.vmem [shape: f32[2,1,16], index: 2, kind: input, shape index: {}]   ;;  %s754_s3 = inlined_call_operand.vmem [shape: f32[2,1,16], index: 3, kind: input, shape index: {}]   ;;  %s755_s4 = inlined_call_operand.vmem [shape: bf16[32,16], index: 4, kind: input, shape index: {}]   ;;  %s756_s5 = inlined_call_operand.vmem [shape: f32[1,16], index: 5, kind: input, shape index: {}]   ;;  %s757_s6 = inlined_call_operand.vmem [shape: f32[1,16], index: 6, kind: input, shape index: {}]   ;;  %s758_s7 = inlined_call_operand.vmem [shape: f32[8,32], index: 7, kind: output, shape index: {}]  }
   0x1   :  { %515 = vmatprep.subr.bf16.mxu0 %v601_v0  ;;  %523 = vmatprep.subr.bf16.mxu1 %v601_v0  ;;  %v565_v1 = vld [vmem:[%s751_s1 + $0x8] sm:$0xff]   ;;  %v566_v2 = vld [vmem:[%s751_s1] sm:$0xff]   ;;  %v567_v7 = vld [vmem:[%s751_s1 + $0x18] sm:$0xff]  }
   0x2   :  { %519 = vmatprep.mubr.msk.bf16.mxu0 %vm602_vm0, %v601_v0  ;;  %527 = vmatprep.mubr.msk.bf16.mxu1 %vm602_vm0, %v601_v0  ;;  %v658_v3 = vld [vmem:[%s752_s0] sm:$0xff]  ;;  %v663_v4 = vld [vmem:[%s752_s0 + $0x8] sm:$0xff]  ;;  %v568_v8 = vld [vmem:[%s751_s1 + $0x10] sm:$0xff]  }
   0x3   :  { %516 = vmatpush3.bf16.msra.mxu0 %v565_v1  ;;  %524 = vmatpush3.bf16.msra.mxu1 %v565_v1  ;;  %v28_v5 = vpack.c.bf16 %v658_v3, %v658_v3  ;;  %v111_v6 = vpack.c.bf16 %v663_v4, %v663_v4  ;;  %v684_v9 = vld [vmem:[%s752_s0 + $0x10] sm:$0xff]  ;;  %v689_v10 = vld [vmem:[%s752_s0 + $0x18] sm:$0xff]  ;;  %v470_v13 = vld [vmem:[%s753_s2] ss:$0 sm:$0xff] }
   0x4   :  { %517 = vmatprep.subr.bf16.mxu0 %v601_v0  ;;  %525 = vmatprep.subr.bf16.mxu1 %v601_v0  ;;  %v176_v11 = vpack.c.bf16 %v684_v9, %v684_v9  ;;  %v260_v12 = vpack.c.bf16 %v689_v10, %v689_v10  ;;  %v483_v24 = vld [vmem:[%s753_s2 + $0x1] ss:$0 sm:$0xff]  ;;  %v474_v35 = vld [vmem:[%s754_s3] ss:$0 sm:$0xff]  ;;  %v569_v49 = vld [vmem:[%s755_s4 + $0x8] sm:$0xff]  }
   0x5   :  { %v488_v42 = vld [vmem:[%s754_s3 + $0x1] ss:$0 sm:$0xff] }
   0x6   :  { %v570_v50 = vld [vmem:[%s755_s4] sm:$0xff]  }
   0x7   :  { %518 = vmatpush3.bf16.msra.mxu0 %v566_v2  ;;  %526 = vmatpush3.bf16.msra.mxu1 %v566_v2 }
   0x8   :  { %531 = vmatprep.subr.bf16.mxu0 %v601_v0  ;;  %539 = vmatprep.subr.bf16.mxu1 %v601_v0 }
   0xa   :  { %520 = vmatmul.mubr.msk.bf16.vlgmr.msra.gmra.mxu0 %vm52_vm1, %v28_v5  ;;  %528 = vmatmul.mubr.msk.bf16.vlgmr.msra.gmra.mxu1 %vm52_vm1, %v111_v6 }
   0xb   :  { %532 = vmatpush3.bf16.msra.mxu0 %v567_v7  ;;  %540 = vmatpush3.bf16.msra.mxu1 %v567_v7 }
   0xc   :  { %533 = vmatprep.subr.bf16.mxu0 %v601_v0  ;;  %541 = vmatprep.subr.bf16.mxu1 %v601_v0 }
   0xd   :  { %535 = vmatprep.mubr.msk.bf16.mxu0 %vm602_vm0, %v601_v0  ;;  %543 = vmatprep.mubr.msk.bf16.mxu1 %vm602_vm0, %v601_v0 }
   0xf   :  { %534 = vmatpush3.bf16.msra.mxu0 %v568_v8  ;;  %542 = vmatpush3.bf16.msra.mxu1 %v568_v8 }
  0x10   :  { %547 = vmatprep.subr.bf16.mxu0 %v601_v0  ;;  %555 = vmatprep.subr.bf16.mxu1 %v601_v0 }
  0x12   :  { %536 = vmatmul.mubr.msk.bf16.vlgmr.msra.gmra.mxu0 %vm52_vm1, %v176_v11  ;;  %544 = vmatmul.mubr.msk.bf16.vlgmr.msra.gmra.mxu1 %vm52_vm1, %v260_v12 }
  0x13   :  { %551 = vmatprep.mubr.msk.bf16.mxu0 %vm602_vm0, %v601_v0  ;;  %559 = vmatprep.mubr.msk.bf16.mxu1 %vm602_vm0, %v601_v0 }
  0x14   :  { %548 = vmatpush3.bf16.msra.mxu0 %v569_v49  ;;  %556 = vmatpush3.bf16.msra.mxu1 %v569_v49 }
  0x15   :  { %549 = vmatprep.subr.bf16.mxu0 %v601_v0  ;;  %557 = vmatprep.subr.bf16.mxu1 %v601_v0 }
  0x18   :  { %550 = vmatpush3.bf16.msra.mxu0 %v570_v50  ;;  %558 = vmatpush3.bf16.msra.mxu1 %v570_v50 }
  0xca   :  { %v90_v14 = vpop.f32.mrf.mxu0  ;;  %v149_v15 = vpop.f32.mrf.mxu1 }
  0xcb   :  { %v91_v16 = vadd.f32 %v470_v13, %v90_v14  ;;  %v150_v17 = vadd.f32 %v470_v13, %v149_v15 }
  0xcc   :  { %v521_v18 = vpop.f32.mrf.mxu0  ;;  %v529_v19 = vpop.f32.mrf.mxu1 }
  0xcd   :  { %571 = vtanh.f32 %v91_v16 }
  0xce   :  { %573 = vtanh.f32 %v150_v17  ;;  %v93_v20 = vpop.f32.mrf.mxu0  ;;  %v152_v21 = vpop.f32.mrf.mxu1 }
  0xd0   :  { %v522_v22 = vpop.f32.mrf.mxu0  ;;  %v530_v23 = vpop.f32.mrf.mxu1 }
  0xd2   :  { %v239_v25 = vpop.f32.mrf.mxu0  ;;  %v298_v26 = vpop.f32.mrf.mxu1 }
  0xd3   :  { %v240_v27 = vadd.f32 %v483_v24, %v239_v25  ;;  %v299_v28 = vadd.f32 %v483_v24, %v298_v26 }
  0xd4   :  { %v537_v29 = vpop.f32.mrf.mxu0  ;;  %v545_v30 = vpop.f32.mrf.mxu1 }
  0xd5   :  { %575 = vtanh.f32 %v240_v27 }
  0xd6   :  { %577 = vtanh.f32 %v299_v28  ;;  %v242_v31 = vpop.f32.mrf.mxu0  ;;  %v301_v32 = vpop.f32.mrf.mxu1 }
  0xd7   :  { %v495_v32 = vld [vmem:[%s757_s6] ss:$0 sm:$0xff] }
  0xd8   :  { %v538_v33 = vpop.f32.mrf.mxu0  ;;  %v546_v34 = vpop.f32.mrf.mxu1 }
  0xda   :  { %v572_v36 = vpop.eup %571 }
  0xdb   :  { %v574_v37 = vpop.eup %573  ;;  %v104_v38 = vmul.f32 %v572_v36, %v474_v35 }
  0xdc   :  { %v156_v39 = vmul.f32 %v574_v37, %v474_v35 }
  0xdd   :  { %v106_v40 = vsel %vm105_vm2, %v104_v38, 0.0 }
  0xde   :  { %107 = vadd.xlane.f32.xlu0 %v106_v40  ;;  %v157_v41 = vsel %vm105_vm2, %v156_v39, 0.0 }
  0xe2   :  { %v576_v43 = vpop.eup %575  ;;  %158 = vadd.xlane.f32.xlu0 %v157_v41 }
  0xe3   :  { %v578_v44 = vpop.eup %577  ;;  %v254_v45 = vmul.f32 %v576_v43, %v488_v42 }
  0xe4   :  { %v305_v46 = vmul.f32 %v578_v44, %v488_v42 }
  0xe5   :  { %v255_v47 = vsel %vm105_vm2, %v254_v45, 0.0 }
  0xe6   :  { %256 = vadd.xlane.f32.xlu1 %v255_v47  ;;  %v306_v48 = vsel %vm105_vm2, %v305_v46, 0.0 }
  0xea   :  { %307 = vadd.xlane.f32.xlu1 %v306_v48 }
 0x167   :  { %v108_v51 = vpop.xlane.xlu0 %107 }
 0x16b   :  { %v159_v52 = vpop.xlane.xlu0 %158 }
 0x16c   :  { %v160_v53 = vmax.f32 %v108_v51, %v159_v52 }
 0x16e   :  { %v161_v54 = vsub.f32 %v108_v51, %v160_v53  ;;  %v164_v55 = vsub.f32 %v159_v52, %v160_v53 }
 0x16f   :  { %v257_v56 = vpop.xlane.xlu1 %256 }
 0x170   :  { %v162_v57 = vmul.f32 1.442695, %v161_v54  ;;  %v165_v58 = vmul.f32 1.442695, %v164_v55 }
 0x172   :  { %579 = vpow2.f32 %v162_v57 }
 0x173   :  { %581 = vpow2.f32 %v165_v58  ;;  %v308_v59 = vpop.xlane.xlu1 %307 }
 0x174   :  { %v309_v60 = vmax.f32 %v257_v56, %v308_v59 }
 0x176   :  { %v310_v61 = vsub.f32 %v257_v56, %v309_v60  ;;  %v313_v62 = vsub.f32 %v308_v59, %v309_v60 }
 0x178   :  { %v311_v63 = vmul.f32 1.442695, %v310_v61  ;;  %v314_v0 = vmul.f32 1.442695, %v313_v62 }
 0x17a   :  { %583 = vpow2.f32 %v311_v63 }
 0x17b   :  { %585 = vpow2.f32 %v314_v0 }
 0x17f   :  { %v580_v1 = vpop.eup %579 }
 0x180   :  { %v582_v2 = vpop.eup %581 }
 0x181   :  { %v167_v5 = vadd.f32 %v582_v2, %v580_v1 }
 0x183   :  { %587 = vrcp.f32 %v167_v5 }
 0x187   :  { %v584_v6 = vpop.eup %583 }
 0x188   :  { %v586_v7 = vpop.eup %585 }
 0x189   :  { %v316_v8 = vadd.f32 %v586_v7, %v584_v6 }
 0x18b   :  { %589 = vrcp.f32 %v316_v8 }
 0x190   :  { %v588_v11 = vpop.eup %587 }
 0x191   :  { %v171_v12 = vmul.f32 %v588_v11, %v582_v2  ;;  %v169_v13 = vmul.f32 %v588_v11, %v580_v1 }
 0x193   :  { %v170_v14 = vmul.f32 %v169_v13, %v658_v3  ;;  %v172_v15 = vmul.f32 %v663_v4, %v171_v12  ;;  %v491_v3 = vld [vmem:[%s756_s5] ss:$0 sm:$0xff] }
 0x195   :  { %v173_v16 = vadd.f32 %v172_v15, %v170_v14 }
 0x197   :  { %v323_v17 = vpack.c.bf16 %v173_v16, %v173_v16 }
 0x198   :  { %v590_v18 = vpop.eup %589 }
 0x199   :  { %v320_v19 = vmul.f32 %v590_v18, %v586_v7  ;;  %552 = vmatmul.mubr.msk.bf16.vlgmr.msra.gmra.mxu0 %vm52_vm1, %v323_v17  ;;  %v318_v20 = vmul.f32 %v590_v18, %v584_v6 }
 0x19b   :  { %v319_v21 = vmul.f32 %v684_v9, %v318_v20  ;;  %v321_v22 = vmul.f32 %v689_v10, %v320_v19 }
 0x19d   :  { %v322_v23 = vadd.f32 %v321_v22, %v319_v21 }
 0x19f   :  { %v402_v24 = vpack.c.bf16 %v322_v23, %v322_v23 }
 0x1a1   :  { %560 = vmatmul.mubr.msk.bf16.vlgmr.msra.gmra.mxu1 %vm52_vm1, %v402_v24 }
 0x259   :  { %v384_v4 = vpop.f32.mrf.mxu0 }
 0x25a   :  { %v385_v25 = vadd.f32 %v491_v3, %v384_v4 }
 0x25b   :  { %v553_v26 = vpop.f32.mrf.mxu0 }
 0x25c   :  { %591 = vtanh.f32 %v385_v25 }
 0x25d   :  { %v387_v27 = vpop.f32.mrf.mxu0 }
 0x25f   :  { %v554_v28 = vpop.f32.mrf.mxu0 }
 0x261   :  { %v440_v29 = vpop.f32.mrf.mxu1 }
 0x262   :  { %v441_v30 = vadd.f32 %v491_v3, %v440_v29 }
 0x263   :  { %v561_v31 = vpop.f32.mrf.mxu1 }
 0x264   :  { %593 = vtanh.f32 %v441_v30 }
 0x265   :  { %v443_v9 = vpop.f32.mrf.mxu1 }
 0x267   :  { %v562_v10 = vpop.f32.mrf.mxu1 }
 0x269   :  { %v592_v33 = vpop.eup %591 }
 0x26a   :  { %v398_v34 = vmul.f32 %v592_v33, %v495_v32 }
 0x26c   :  { %v399_v35 = vsel %vm105_vm2, %v398_v34, 0.0 }
 0x26d   :  { %400 = vadd.xlane.f32.xlu0 %v399_v35 }
 0x271   :  { %v594_v36 = vpop.eup %593 }
 0x272   :  { %v447_v37 = vmul.f32 %v594_v36, %v495_v32 }
 0x274   :  { %v448_v38 = vsel %vm105_vm2, %v447_v37, 0.0 }
 0x275   :  { %449 = vadd.xlane.f32.xlu1 %v448_v38 }
 0x2f6   :  { %v401_v39 = vpop.xlane.xlu0 %400 }
 0x2fe   :  { %v450_v40 = vpop.xlane.xlu1 %449 }
 0x2ff   :  { %v451_v41 = vmax.f32 %v401_v39, %v450_v40 }
 0x301   :  { %v452_v42 = vsub.f32 %v401_v39, %v451_v41  ;;  %v455_v43 = vsub.f32 %v450_v40, %v451_v41 }
 0x303   :  { %v453_v44 = vmul.f32 1.442695, %v452_v42  ;;  %v456_v45 = vmul.f32 1.442695, %v455_v43 }
 0x305   :  { %595 = vpow2.f32 %v453_v44 }
 0x306   :  { %597 = vpow2.f32 %v456_v45 }
 0x312   :  { %v596_v46 = vpop.eup %595 }
 0x313   :  { %v598_v47 = vpop.eup %597 }
 0x314   :  { %v458_v48 = vadd.f32 %v598_v47, %v596_v46 }
 0x316   :  { %599 = vrcp.f32 %v458_v48 }
 0x323   :  { %v600_v49 = vpop.eup %599 }
 0x324   :  { %v460_v50 = vmul.f32 %v600_v49, %v596_v46  ;;  %v462_v51 = vmul.f32 %v600_v49, %v598_v47 }
 0x326   :  { %v461_v52 = vmul.f32 %v460_v50, %v173_v16  ;;  %v463_v53 = vmul.f32 %v462_v51, %v322_v23 }
 0x328   :  { %v464_v54 = vadd.f32 %v463_v53, %v461_v52 }
 0x32a   :  { %465 = vst.msk [vmem:[%s758_s7] sm:$0xff] %vm52_vm1, %v464_v54 }

// kernel: mymodel_forward.5
= control target key start
LH: loop header
LB: loop body
LE: loop exit
PB: predicated region body
PF: predicated region fallthrough
CT: control target
= control target key end

     0   :  { %s2129_s21 = smov 0   ;;  %s2347_s0 = inlined_call_operand.vmem [shape: bf16[8,32], index: 0, kind: input, shape index: {}]   ;;  %s2348_s1 = inlined_call_operand.vmem [shape: bf16[4,48,32], index: 1, kind: input, shape index: {}]   ;;  %s2349_s2 = inlined_call_operand.vmem [shape: bf16[4,32,32], index: 2, kind: input, shape index: {}]   ;;  %s2350_s3 = inlined_call_operand.vmem [shape: f32[4,1,32], index: 3, kind: input, shape index: {}]   ;;  %s2351_s4 = inlined_call_operand.vmem [shape: bf16[4,32,32], index: 4, kind: input, shape index: {}]   ;;  %s2352_s5 = inlined_call_operand.vmem [shape: f32[4,1,32], index: 5, kind: input, shape index: {}]   ;;  %s2353_s6 = inlined_call_operand.vmem [shape: bf16[4,32,32], index: 6, kind: input, shape index: {}]   ;;  %s2354_s7 = inlined_call_operand.vmem [shape: f32[4,1,32], index: 7, kind: input, shape index: {}]   ;;  %s2355_s8 = inlined_call_operand.vmem [shape: bf16[4,32,32], index: 8, kind: input, shape index: {}]   ;;  %s2356_s9 = inlined_call_operand.vmem [shape: f32[4,1,32], index: 9, kind: input, shape index: {}]   ;;  %s2357_s10 = inlined_call_operand.vmem [shape: bf16[4,32,32], index: 10, kind: input, shape index: {}]   ;;  %s2358_s11 = inlined_call_operand.vmem [shape: f32[4,1,32], index: 11, kind: input, shape index: {}]   ;;  %s2359_s12 = inlined_call_operand.vmem [shape: bf16[4,32,32], index: 12, kind: input, shape index: {}]   ;;  %s2360_s13 = inlined_call_operand.vmem [shape: f32[4,1,32], index: 13, kind: input, shape index: {}]   ;;  %s2361_s14 = inlined_call_operand.vmem [shape: bf16[4,32,32], index: 14, kind: input, shape index: {}]   ;;  %s2362_s15 = inlined_call_operand.vmem [shape: bf16[32,32], index: 15, kind: input, shape index: {}]   ;;  %s2363_s16 = inlined_call_operand.vmem [shape: f32[4,8,32], index: 16, kind: output, shape index: {}]  }
   0x1   :  { %2364 = sst [smem:[#allocation2_spill]] %s2347_s0 }
   0x2 LB: > { %s1767_s22 = sadd.s32 4294967295, %s2040_s21   ;;  %p1771_p0 = scmp.ge.s32.totalorder %s2040_s21, 1  ;;  %s2040_s21 = sphi %s2129_s21, %s26_s21  }
   0x3   : > { %p580_p1 = scmp.lt.s32.totalorder %s2040_s21, 5 }
   0x5   : > { %p581_p2 = pnand %p1771_p0, %p580_p1 }
   0x6   : > { %p682_p3 = scmp.lt.s32.totalorder (!%p581_p2), %s1767_s22, 3  ;;  %s2365_s18 = sld [smem:[#allocation2_spill]] (!%p581_p2) }
   0x7   : > { %584 = sbr.rel (%p581_p2) target bundleno = 1105 (0x451), region = 84 }
   0xc   : > { %v2042_v0 = vmov 0.0   ;;  %vm2043_vm0 = vmmov 0   ;;  %s2367_s22 = smov (!%p682_p3, %s1767_s22), 3  ;;  %v745_v4 = vld [vmem:[%s2365_s18] sm:$0xf]  ;;  %vm769_vm1 = vcmask 261120  }
   0xd   : > { %1878 = vmatprep.subr.bf16.mxu0 %v2042_v0  ;;  %1882 = vmatprep.mubr.msk.bf16.mxu0 %vm2043_vm0, %v2042_v0  ;;  %s2146_s23 = sshll.u32 %s2367_s22, 4  ;;  %s1990_s24 = smul.u32 24, %s2367_s22 }
   0xe   : > { %1886 = vmatprep.subr.bf16.mxu1 %v2042_v0  ;;  %1890 = vmatprep.mubr.msk.bf16.mxu1 %vm2043_vm0, %v2042_v0  ;;  %s691_s27 = scalar_lea.vmem %s2349_s2, %s2146_s23  ;;  %s694_s18 = scalar_lea.vmem %s2350_s3, %s2367_s22 }
   0xf   : > { %v2001_v1 = vld [vmem:[%s691_s27 + $0x8] sm:$0xff]   ;;  %s686_s30 = scalar_lea.vmem %s2348_s1, %s1990_s24  ;;  %v2002_v2 = vld [vmem:[%s691_s27] sm:$0xff]   ;;  %s699_s24 = scalar_lea.vmem %s2351_s4, %s2146_s23 }
  0x10   : > { %1879 = vmatpush3.bf16.msra.mxu0 %v2001_v1  ;;  %1887 = vmatpush3.bf16.msra.mxu1 %v2001_v1  ;;  %v2003_v3 = vld [vmem:[%s686_s30] sm:$0xff]   ;;  %v2004_v5 = vld [vmem:[%s686_s30 + $0x8] sm:$0xff]   ;;  %v2005_v6 = vld [vmem:[%s686_s30 + $0x10] sm:$0xff]   ;;  %s707_s27 = scalar_lea.vmem %s2353_s6, %s2146_s23  ;;  %s2191_s30 = scalar_lea.vmem %s2359_s12, %s2146_s23 }
  0x11   : > { %1880 = vmatprep.subr.bf16.mxu0 %v2042_v0  ;;  %1888 = vmatprep.subr.bf16.mxu1 %v2042_v0  ;;  %v2006_v7 = vld [vmem:[%s699_s24 + $0x8] sm:$0xff]   ;;  %v2007_v8 = vld [vmem:[%s699_s24] sm:$0xff]   ;;  %s723_s24 = scalar_lea.vmem %s2357_s10, %s2146_s23  ;;  %s1787_s25 = sshll.u32 %s2367_s22, 3 }
  0x12   : > { %v2008_v9 = vld [vmem:[%s707_s27 + $0x8] sm:$0xff]   ;;  %v2009_v10 = vld [vmem:[%s707_s27] sm:$0xff]   ;;  %s702_s27 = scalar_lea.vmem %s2352_s5, %s2367_s22 }
  0x13   : > { %v1788_v11 = vld [vmem:[%s694_s18] ss:$0 sm:$0xff]  ;;  %v2010_v24 = vld [vmem:[%s2191_s30 + $0x8] sm:$0xff]   ;;  %s739_s18 = scalar_lea.vmem %s2361_s14, %s2146_s23 }
  0x14   : > { %1881 = vmatpush3.bf16.msra.mxu0 %v2002_v2  ;;  %1889 = vmatpush3.bf16.msra.mxu1 %v2002_v2  ;;  %v2011_v54 = vld [vmem:[%s2191_s30] sm:$0xff]   ;;  %v2012_v55 = vld [vmem:[%s723_s24 + $0x8] sm:$0xff]   ;;  %s710_s30 = scalar_lea.vmem %s2354_s7, %s2367_s22 }
  0x15   : > { %1902 = vmatprep.subr.bf16.mxu0 %v2042_v0  ;;  %1926 = vmatprep.subr.bf16.mxu1 %v2042_v0  ;;  %v2013_v56 = vld [vmem:[%s723_s24] sm:$0xff]   ;;  %s715_s24 = scalar_lea.vmem %s2355_s8, %s2146_s23  ;;  %s743_s23 = scalar_lea.vmem %s2363_s16, %s1787_s25 }
  0x16   : > { %v1798_v57 = vld [vmem:[%s702_s27] ss:$0 sm:$0xff]  ;;  %s734_s27 = scalar_lea.vmem %s2360_s13, %s2367_s22 }
  0x17   : > { %1883 = vmatmul.mubr.msk.bf16.vlgmr.msra.gmra.mxu0 %vm769_vm1, %v745_v4  ;;  %1891 = vmatmul.mubr.msk.bf16.vlgmr.msra.gmra.mxu1 %vm769_vm1, %v2003_v3  ;;  %v1809_v63 = vld [vmem:[%s710_s30] ss:$0 sm:$0xff] }
  0x18   : > { %1894 = vmatprep.mubr.msk.bf16.mxu1 %vm2043_vm0, %v2042_v0  ;;  %1906 = vmatprep.mubr.msk.bf16.mxu0 %vm2043_vm0, %v2042_v0 }
  0x19   : > { %1903 = vmatpush3.bf16.msra.mxu0 %v2006_v7  ;;  %1927 = vmatpush3.bf16.msra.mxu1 %v2008_v9 }
  0x1a   : > { %1904 = vmatprep.subr.bf16.mxu0 %v2042_v0  ;;  %1928 = vmatprep.subr.bf16.mxu1 %v2042_v0 }
  0x1d   : > { %1905 = vmatpush3.bf16.msra.mxu0 %v2007_v8  ;;  %1929 = vmatpush3.bf16.msra.mxu1 %v2009_v10 }
  0x1e   : > { %1910 = vmatprep.subr.bf16.mxu0 %v2042_v0  ;;  %1958 = vmatprep.subr.bf16.mxu1 %v2042_v0 }
  0x1f   : > { %1895 = vmatmul.mubr.msk.bf16.gmra.mxu1 %vm769_vm1, %v2004_v5 }
  0x20   : > { %1898 = vmatprep.mubr.msk.bf16.mxu1 %vm2043_vm0, %v2042_v0 }
  0x27   : > { %1899 = vmatmul.mubr.msk.bf16.gmra.mxu1 %vm769_vm1, %v2005_v6 }
  0x28   : > { %1930 = vmatprep.mubr.msk.bf16.mxu1 %vm2043_vm0, %v2042_v0 }
  0xd7   : > { %v807_v12 = vpop.f32.mrf.mxu0  ;;  %v880_v13 = vpop.f32.mrf.mxu1 }
  0xd8   : > { %v808_v14 = vadd.f32 %v1788_v11, %v807_v12  ;;  %v881_v15 = vadd.f32 %v1788_v11, %v880_v13 }
  0xd9   : > { %v1884_v16 = vpop.f32.mrf.mxu0  ;;  %v1892_v17 = vpop.f32.mrf.mxu1 }
  0xda   : > { %vm813_vm2 = vcmp.gt.f32.partialorder %v808_v14, 0.0  ;;  %v814_v18 = vmul.f32 0.2, %v808_v14  ;;  %v909_v19 = vmul.f32 0.2, %v881_v15  ;;  %vm903_vm3 = vcmp.gt.f32.partialorder %v881_v15, 0.0 }
  0xdb   : > { %v810_v20 = vpop.f32.mrf.mxu0  ;;  %v883_v21 = vpop.f32.mrf.mxu1 }
  0xdc   : > { %v2197_v22 = vsel %vm813_vm2, %v808_v14, %v814_v18  ;;  %v884_v23 = vadd.f32 %v1788_v11, %v883_v21  ;;  %v915_v28 = vsel %vm903_vm3, %v881_v15, %v909_v19 }
  0xdd   : > { %v921_v25 = vpack.c.bf16 %v2197_v22, %v2197_v22  ;;  %v1885_v26 = vpop.f32.mrf.mxu0  ;;  %v1893_v27 = vpop.f32.mrf.mxu1 }
  0xde   : > { %vm904_vm4 = vcmp.gt.f32.partialorder %v884_v23, 0.0  ;;  %v910_v29 = vmul.f32 0.2, %v884_v23  ;;  %v1802_v26 = vld [vmem:[%s734_s27] ss:$0 sm:$0xff] }
  0xdf   : > { %1907 = vmatmul.mubr.msk.bf16.vlgmr.msra.gmra.mxu0 %vm769_vm1, %v921_v25  ;;  %v888_v30 = vpop.f32.mrf.mxu1  ;;  %v2015_v25 = vld [vmem:[%s739_s18] sm:$0xff]  }
  0xe0   : > { %v916_v31 = vsel %vm904_vm4, %v884_v23, %v910_v29  ;;  %v889_v32 = vadd.f32 %v1788_v11, %v888_v30  ;;  %1911 = vmatpush3.bf16.msra.mxu0 %v2010_v24  ;;  %1914 = vmatprep.mubr.msk.bf16.mxu0 %vm2043_vm0, %v2042_v0  ;;  %v2014_v24 = vld [vmem:[%s739_s18 + $0x8] sm:$0xff]   ;;  %s726_s18 = scalar_lea.vmem %s2358_s11, %s2367_s22 }
  0xe1   : > { %v2205_v33 = vpack.c.bf16 %v916_v31, %v915_v28  ;;  %v1896_v34 = vpop.f32.mrf.mxu1  ;;  %1912 = vmatprep.subr.bf16.mxu0 %v2042_v0 }
  0xe2   : > { %v911_v35 = vmul.f32 0.2, %v889_v32  ;;  %vm905_vm5 = vcmp.gt.f32.partialorder %v889_v32, 0.0  ;;  %v2016_v34 = vld [vmem:[%s715_s24 + $0x8] sm:$0xff]  }
  0xe3   : > { %v891_v36 = vpop.f32.mrf.mxu1  ;;  %1931 = vmatmul.mubr.msk.bf16.vlgmr.msra.gmra.mxu1 %vm769_vm1, %v2205_v33 }
  0xe4   : > { %v892_v37 = vadd.f32 %v1788_v11, %v891_v36  ;;  %1934 = vmatprep.mubr.msk.bf16.mxu1 %vm2043_vm0, %v2042_v0  ;;  %v917_v39 = vsel %vm905_vm5, %v889_v32, %v911_v35  ;;  %1913 = vmatpush3.bf16.msra.mxu0 %v2011_v54 }
  0xe5   : > { %v1897_v38 = vpop.f32.mrf.mxu1  ;;  %1918 = vmatprep.subr.bf16.mxu0 %v2042_v0  ;;  %1959 = vmatpush3.bf16.msra.mxu1 %v2012_v55 }
  0xe6   : > { %vm906_vm6 = vcmp.gt.f32.partialorder %v892_v37, 0.0  ;;  %v912_v40 = vmul.f32 0.2, %v892_v37  ;;  %1960 = vmatprep.subr.bf16.mxu1 %v2042_v0  ;;  %v2017_v38 = vld [vmem:[%s715_s24] sm:$0xff]   ;;  %s718_s24 = scalar_lea.vmem %s2356_s9, %s2367_s22 }
  0xe7   : > { %v896_v41 = vpop.f32.mrf.mxu1 }
  0xe8   : > { %v918_v42 = vsel %vm906_vm6, %v892_v37, %v912_v40  ;;  %v897_v43 = vadd.f32 %v1788_v11, %v896_v41  ;;  %v2018_v41 = vld [vmem:[%s2362_s15 + $0x8] sm:$0xff]  }
  0xe9   : > { %v2212_v44 = vpack.c.bf16 %v918_v42, %v917_v39  ;;  %v1900_v45 = vpop.f32.mrf.mxu1  ;;  %1961 = vmatpush3.bf16.msra.mxu1 %v2013_v56 }
  0xea   : > { %v913_v46 = vmul.f32 0.2, %v897_v43  ;;  %vm907_vm7 = vcmp.gt.f32.partialorder %v897_v43, 0.0  ;;  %v2019_v45 = vld [vmem:[%s2362_s15] sm:$0xff]  }
  0xeb   : > { %v899_v47 = vpop.f32.mrf.mxu1  ;;  %1935 = vmatmul.mubr.msk.bf16.gmra.mxu1 %vm769_vm1, %v2212_v44 }
  0xec   : > { %v900_v48 = vadd.f32 %v1788_v11, %v899_v47  ;;  %1938 = vmatprep.mubr.msk.bf16.mxu1 %vm2043_vm0, %v2042_v0  ;;  %v919_v50 = vsel %vm907_vm7, %v897_v43, %v913_v46 }
  0xed   : > { %v1901_v49 = vpop.f32.mrf.mxu1 }
  0xee   : > { %vm908_vm8 = vcmp.gt.f32.partialorder %v900_v48, 0.0  ;;  %v914_v51 = vmul.f32 0.2, %v900_v48 }
  0xf0   : > { %v920_v52 = vsel %vm908_vm8, %v900_v48, %v914_v51 }
  0xf1   : > { %v2218_v53 = vpack.c.bf16 %v920_v52, %v919_v50  ;;  %v1821_v52 = vld [vmem:[%s726_s18] ss:$0 sm:$0xff] }
  0xf3   : > { %1939 = vmatmul.mubr.msk.bf16.gmra.mxu1 %vm769_vm1, %v2218_v53 }
  0xf4   : > { %1962 = vmatprep.mubr.msk.bf16.mxu1 %vm2043_vm0, %v2042_v0 }
 0x19f   : > { %v985_v58 = vpop.f32.mrf.mxu0 }
 0x1a0   : > { %v986_v59 = vadd.f32 %v1798_v57, %v985_v58 }
 0x1a1   : > { %v1908_v60 = vpop.f32.mrf.mxu0 }
 0x1a2   : > { %v991_v61 = vpack.c.bf16 %v986_v59, %v986_v59 }
 0x1a3   : > { %v988_v62 = vpop.f32.mrf.mxu0  ;;  %v1187_v1 = vpop.f32.mrf.mxu1 }
 0x1a4   : > { %1915 = vmatmul.mubr.msk.bf16.vlgmr.msra.gmra.mxu0 %vm769_vm1, %v991_v61  ;;  %v1188_v4 = vadd.f32 %v1809_v63, %v1187_v1 }
 0x1a5   : > { %v1909_v2 = vpop.f32.mrf.mxu0  ;;  %v1932_v3 = vpop.f32.mrf.mxu1  ;;  %1922 = vmatprep.mubr.msk.bf16.mxu0 %vm2043_vm0, %v2042_v0  ;;  %1919 = vmatpush3.bf16.msra.mxu0 %v2014_v24 }
 0x1a6   : > { %1920 = vmatprep.subr.bf16.mxu0 %v2042_v0 }
 0x1a7   : > { %v1190_v5 = vpop.f32.mrf.mxu1 }
 0x1a8   : > { %v1191_v6 = vadd.f32 %v1809_v63, %v1190_v5 }
 0x1a9   : > { %v1933_v7 = vpop.f32.mrf.mxu1  ;;  %1921 = vmatpush3.bf16.msra.mxu0 %v2015_v25 }
 0x1aa   : > { %v1290_v8 = vpack.c.bf16 %v1191_v6, %v1188_v4  ;;  %1942 = vmatprep.subr.bf16.mxu0 %v2042_v0 }
 0x1ab   : > { %v1195_v9 = vpop.f32.mrf.mxu1 }
 0x1ac   : > { %1963 = vmatmul.mubr.msk.bf16.vlgmr.msra.gmra.mxu1 %vm769_vm1, %v1290_v8  ;;  %v1196_v11 = vadd.f32 %v1809_v63, %v1195_v9 }
 0x1ad   : > { %v1936_v10 = vpop.f32.mrf.mxu1  ;;  %1966 = vmatprep.mubr.msk.bf16.mxu1 %vm2043_vm0, %v2042_v0 }
 0x1af   : > { %v1198_v12 = vpop.f32.mrf.mxu1 }
 0x1b0   : > { %v1199_v13 = vadd.f32 %v1809_v63, %v1198_v12 }
 0x1b1   : > { %v1937_v14 = vpop.f32.mrf.mxu1 }
 0x1b2   : > { %v1291_v15 = vpack.c.bf16 %v1199_v13, %v1196_v11 }
 0x1b3   : > { %v1203_v16 = vpop.f32.mrf.mxu1 }
 0x1b4   : > { %1967 = vmatmul.mubr.msk.bf16.gmra.mxu1 %vm769_vm1, %v1291_v15  ;;  %v1204_v18 = vadd.f32 %v1809_v63, %v1203_v16 }
 0x1b5   : > { %v1940_v17 = vpop.f32.mrf.mxu1  ;;  %1970 = vmatprep.mubr.msk.bf16.mxu1 %vm2043_vm0, %v2042_v0 }
 0x1b7   : > { %v1206_v19 = vpop.f32.mrf.mxu1 }
 0x1b8   : > { %v1207_v20 = vadd.f32 %v1809_v63, %v1206_v19 }
 0x1b9   : > { %v1941_v21 = vpop.f32.mrf.mxu1 }
 0x1ba   : > { %v1292_v23 = vpack.c.bf16 %v1207_v20, %v1204_v18 }
 0x1bc   : > { %1971 = vmatmul.mubr.msk.bf16.gmra.mxu1 %vm769_vm1, %v1292_v23 }
 0x264   : > { %v1052_v27 = vpop.f32.mrf.mxu0 }
 0x265   : > { %v1053_v28 = vadd.f32 %v1802_v26, %v1052_v27 }
 0x266   : > { %v1916_v29 = vpop.f32.mrf.mxu0 }
 0x267   : > { %vm1058_vm9 = vcmp.gt.f32.partialorder %v1053_v28, 0.0  ;;  %v1059_v30 = vmul.f32 0.2, %v1053_v28 }
 0x268   : > { %v1055_v31 = vpop.f32.mrf.mxu0 }
 0x269   : > { %v1060_v32 = vsel %vm1058_vm9, %v1053_v28, %v1059_v30 }
 0x26a   : > { %v1061_v35 = vpack.c.bf16 %v1060_v32, %v1060_v32  ;;  %v1917_v36 = vpop.f32.mrf.mxu0 }
 0x26c   : > { %1923 = vmatmul.mubr.msk.bf16.vlgmr.msra.gmra.mxu0 %vm769_vm1, %v1061_v35  ;;  %v1359_v37 = vpop.f32.mrf.mxu1 }
 0x26d   : > { %1943 = vmatpush3.bf16.msra.mxu0 %v2016_v34  ;;  %1946 = vmatprep.mubr.msk.bf16.mxu0 %vm2043_vm0, %v2042_v0  ;;  %v1360_v54 = vadd.f32 %v1821_v52, %v1359_v37 }
 0x26e   : > { %1944 = vmatprep.subr.bf16.mxu0 %v2042_v0  ;;  %v1964_v39 = vpop.f32.mrf.mxu1 }
 0x26f   : > { %v1388_v59 = vmul.f32 0.2, %v1360_v54  ;;  %vm1382_vm12 = vcmp.gt.f32.partialorder %v1360_v54, 0.0 }
 0x270   : > { %v1362_v40 = vpop.f32.mrf.mxu1 }
 0x271   : > { %1945 = vmatpush3.bf16.msra.mxu0 %v2017_v38  ;;  %v1394_v3 = vsel %vm1382_vm12, %v1360_v54, %v1388_v59 }
 0x272   : > { %1974 = vmatprep.subr.bf16.mxu0 %v2042_v0  ;;  %v1965_v42 = vpop.f32.mrf.mxu1 }
 0x274   : > { %1947 = vmatmul.mubr.msk.bf16.vlgmr.msra.gmra.mxu0 %vm769_vm1, %v2205_v33  ;;  %v1367_v43 = vpop.f32.mrf.mxu1 }
 0x275   : > { %1950 = vmatprep.mubr.msk.bf16.mxu0 %vm2043_vm0, %v2042_v0  ;;  %1975 = vmatpush3.bf16.msra.mxu0 %v2018_v41  ;;  %v1368_v57 = vadd.f32 %v1821_v52, %v1367_v43 }
 0x276   : > { %v1968_v46 = vpop.f32.mrf.mxu1  ;;  %1976 = vmatprep.subr.bf16.mxu0 %v2042_v0 }
 0x277   : > { %v1390_v63 = vmul.f32 0.2, %v1368_v57  ;;  %vm1384_vm14 = vcmp.gt.f32.partialorder %v1368_v57, 0.0 }
 0x278   : > { %v1370_v47 = vpop.f32.mrf.mxu1 }
 0x279   : > { %1977 = vmatpush3.bf16.msra.mxu0 %v2019_v45  ;;  %v1371_v58 = vadd.f32 %v1821_v52, %v1370_v47  ;;  %v1396_v5 = vsel %vm1384_vm14, %v1368_v57, %v1390_v63 }
 0x27a   : > { %v1969_v48 = vpop.f32.mrf.mxu1 }
 0x27b   : > { %vm1385_vm15 = vcmp.gt.f32.partialorder %v1371_v58, 0.0 }
 0x27c   : > { %1951 = vmatmul.mubr.msk.bf16.gmra.mxu0 %vm769_vm1, %v2212_v44  ;;  %v1375_v33 = vpop.f32.mrf.mxu1  ;;  %v1363_v44 = vadd.f32 %v1821_v52, %v1362_v40 }
 0x27d   : > { %1954 = vmatprep.mubr.msk.bf16.mxu0 %vm2043_vm0, %v2042_v0  ;;  %v1376_v55 = vadd.f32 %v1821_v52, %v1375_v33 }
 0x27e   : > { %v1972_v49 = vpop.f32.mrf.mxu1  ;;  %v1389_v60 = vmul.f32 0.2, %v1363_v44  ;;  %vm1383_vm13 = vcmp.gt.f32.partialorder %v1363_v44, 0.0 }
 0x27f   : > { %v1392_v61 = vmul.f32 0.2, %v1376_v55  ;;  %vm1386_vm10 = vcmp.gt.f32.partialorder %v1376_v55, 0.0 }
 0x280   : > { %v1378_v50 = vpop.f32.mrf.mxu1  ;;  %v1395_v4 = vsel %vm1383_vm13, %v1363_v44, %v1389_v60 }
 0x281   : > { %v1379_v56 = vadd.f32 %v1821_v52, %v1378_v50  ;;  %v1398_v1 = vsel %vm1386_vm10, %v1376_v55, %v1392_v61 }
 0x282   : > { %v1973_v51 = vpop.f32.mrf.mxu1 }
 0x283   : > { %v1393_v62 = vmul.f32 0.2, %v1379_v56  ;;  %vm1387_vm11 = vcmp.gt.f32.partialorder %v1379_v56, 0.0 }
 0x284   : > { %1955 = vmatmul.mubr.msk.bf16.gmra.mxu0 %vm769_vm1, %v2218_v53  ;;  %v1391_v53 = vmul.f32 0.2, %v1371_v58 }
 0x285   : > { %1978 = vmatprep.mubr.msk.bf16.mxu0 %vm2043_vm0, %v2042_v0  ;;  %v1399_v2 = vsel %vm1387_vm11, %v1379_v56, %v1393_v62 }
 0x286   : > { %v1397_v6 = vsel %vm1385_vm15, %v1371_v58, %v1391_v53 }
 0x32c   : > { %v1115_v7 = vpop.f32.mrf.mxu0 }
 0x32d   : > { %v1400_v8 = vmul.f32 %v1394_v3, %v1115_v7  ;;  %v1401_v9 = vmul.f32 %v1395_v4, %v1115_v7  ;;  %v1402_v10 = vmul.f32 %v1396_v5, %v1115_v7  ;;  %v1403_v11 = vmul.f32 %v1397_v6, %v1115_v7 }
 0x32e   : > { %v1924_v12 = vpop.f32.mrf.mxu0  ;;  %v1404_v13 = vmul.f32 %v1398_v1, %v1115_v7  ;;  %v1405_v14 = vmul.f32 %v1399_v2, %v1115_v7 }
 0x32f   : > { %v1406_v15 = vpack.c.bf16 %v1401_v9, %v1400_v8  ;;  %v1407_v16 = vpack.c.bf16 %v1403_v11, %v1402_v10 }
 0x330   : > { %v1118_v17 = vpop.f32.mrf.mxu0  ;;  %v1408_v18 = vpack.c.bf16 %v1405_v14, %v1404_v13 }
 0x331   : > { %1979 = vmatmul.mubr.msk.bf16.vlgmr.msra.gmra.mxu0 %vm769_vm1, %v1406_v15 }
 0x332   : > { %v1925_v19 = vpop.f32.mrf.mxu0  ;;  %1982 = vmatprep.mubr.msk.bf16.mxu0 %vm2043_vm0, %v2042_v0 }
 0x334   : > { %v2294_v20 = vpop.f32.mrf.mxu0 }
 0x336   : > { %v1948_v21 = vpop.f32.mrf.mxu0 }
 0x338   : > { %v2296_v23 = vpop.f32.mrf.mxu0 }
 0x339   : > { %1983 = vmatmul.mubr.msk.bf16.gmra.mxu0 %vm769_vm1, %v1407_v16 }
 0x33a   : > { %v1949_v24 = vpop.f32.mrf.mxu0  ;;  %1986 = vmatprep.mubr.msk.bf16.mxu0 %vm2043_vm0, %v2042_v0 }
 0x33b   : > { %v1815_v24 = vld [vmem:[%s718_s24] ss:$0 sm:$0xff] }
 0x33c   : > { %v2301_v25 = vpop.f32.mrf.mxu0 }
 0x33e   : > { %v1952_v26 = vpop.f32.mrf.mxu0 }
 0x340   : > { %v2303_v27 = vpop.f32.mrf.mxu0 }
 0x341   : > { %1987 = vmatmul.mubr.msk.bf16.gmra.mxu0 %vm769_vm1, %v1408_v18 }
 0x342   : > { %v1953_v28 = vpop.f32.mrf.mxu0 }
 0x343   : > { %v1268_v28 = vadd.f32 %v1815_v24, %v2294_v20 }
 0x344   : > { %v2306_v29 = vpop.f32.mrf.mxu0 }
 0x346   : > { %v1956_v30 = vpop.f32.mrf.mxu0 }
 0x347   : > { %v1271_v30 = vadd.f32 %v1815_v24, %v2296_v23 }
 0x348   : > { %v2308_v31 = vpop.f32.mrf.mxu0 }
 0x349   : > { %v1287_v20 = vadd.f32 %v1815_v24, %v2308_v31 }
 0x34a   : > { %v1957_v32 = vpop.f32.mrf.mxu0 }
 0x34b   : > { %v1276_v32 = vadd.f32 %v1815_v24, %v2301_v25 }
 0x3f1   : > { %v1468_v34 = vpop.f32.mrf.mxu0 }
 0x3f2   : > { %v1491_v46 = vsel %vm769_vm1, %v1468_v34, -inf }
 0x3f3   : > { %v1980_v35 = vpop.f32.mrf.mxu0 }
 0x3f5   : > { %v1471_v36 = vpop.f32.mrf.mxu0 }
 0x3f6   : > { %v1492_v47 = vsel %vm769_vm1, %v1471_v36, -inf }
 0x3f7   : > { %v1981_v37 = vpop.f32.mrf.mxu0 }
 0x3f9   : > { %v1476_v38 = vpop.f32.mrf.mxu0 }
 0x3fa   : > { %v1493_v52 = vsel %vm769_vm1, %v1476_v38, -inf }
 0x3fb   : > { %v1984_v0 = vpop.f32.mrf.mxu0 }
 0x3fc   : > { %v1284_v0 = vadd.f32 %v1815_v24, %v2306_v29 }
 0x3fd   : > { %v1479_v39 = vpop.f32.mrf.mxu0 }
 0x3fe   : > { %v1494_v48 = vsel %vm769_vm1, %v1479_v39, -inf }
 0x3ff   : > { %v1985_v40 = vpop.f32.mrf.mxu0  ;;  %v1500_v54 = vmax.f32 %v1493_v52, %v1494_v48 }
 0x401   : > { %v1484_v41 = vpop.f32.mrf.mxu0 }
 0x402   : > { %v1495_v43 = vsel %vm769_vm1, %v1484_v41, -inf }
 0x403   : > { %v1988_v42 = vpop.f32.mrf.mxu0  ;;  %v1496_v49 = vmax.f32 %v1491_v46, %v1495_v43 }
 0x405   : > { %v1487_v45 = vpop.f32.mrf.mxu0 }
 0x406   : > { %v1497_v33 = vsel %vm769_vm1, %v1487_v45, -inf }
 0x407   : > { %v1498_v50 = vmax.f32 %v1492_v47, %v1497_v33  ;;  %v1989_v51 = vpop.f32.mrf.mxu0 }
 0x409   : > { %v1499_v44 = vmax.f32 %v1496_v49, %v1498_v50 }
 0x40b   : > { %v1501_v55 = vmax.f32 %v1499_v44, %v1500_v54 }
 0x40d   : > { %v1502_v56 = vsub.f32 %v1468_v34, %v1501_v55  ;;  %v1503_v57 = vsub.f32 %v1471_v36, %v1501_v55  ;;  %v1504_v58 = vsub.f32 %v1476_v38, %v1501_v55  ;;  %v1505_v59 = vsub.f32 %v1479_v39, %v1501_v55 }
 0x40e   : > { %v1506_v60 = vsub.f32 %v1484_v41, %v1501_v55  ;;  %v1507_v53 = vsub.f32 %v1487_v45, %v1501_v55  ;;  %v1279_v34 = vadd.f32 %v1815_v24, %v2303_v27 }
 0x40f   : > { %v1508_v61 = vmul.f32 1.442695, %v1502_v56  ;;  %v1510_v62 = vmul.f32 1.442695, %v1503_v57  ;;  %v1512_v63 = vmul.f32 1.442695, %v1504_v58 }
 0x410   : > { %v1514_v1 = vmul.f32 1.442695, %v1505_v59  ;;  %v1516_v2 = vmul.f32 1.442695, %v1506_v60  ;;  %v1518_v3 = vmul.f32 1.442695, %v1507_v53 }
 0x411   : > { %2020 = vpow2.f32 %v1508_v61 }
 0x412   : > { %2022 = vpow2.f32 %v1510_v62 }
 0x413   : > { %2024 = vpow2.f32 %v1512_v63 }
 0x414   : > { %2026 = vpow2.f32 %v1514_v1 }
 0x415   : > { %2028 = vpow2.f32 %v1516_v2 }
 0x416   : > { %2030 = vpow2.f32 %v1518_v3 }
 0x41e   : > { %v2021_v4 = vpop.eup %2020 }
 0x41f   : > { %v2023_v5 = vpop.eup %2022  ;;  %v1520_v6 = vsel %vm769_vm1, %v2021_v4, 0.0 }
 0x420   : > { %v2025_v7 = vpop.eup %2024  ;;  %v1521_v8 = vsel %vm769_vm1, %v2023_v5, 0.0 }
 0x421   : > { %v2027_v9 = vpop.eup %2026  ;;  %v1522_v10 = vadd.f32 %v1521_v8, %v1520_v6  ;;  %v1523_v11 = vsel %vm769_vm1, %v2025_v7, 0.0 }
 0x422   : > { %v2029_v12 = vpop.eup %2028  ;;  %v1525_v14 = vsel %vm769_vm1, %v2027_v9, 0.0 }
 0x423   : > { %v1524_v13 = vadd.f32 %v1523_v11, %v1522_v10  ;;  %v2031_v15 = vpop.eup %2030  ;;  %v1527_v17 = vsel %vm769_vm1, %v2029_v12, 0.0 }
 0x424   : > { %v1529_v19 = vsel %vm769_vm1, %v2031_v15, 0.0 }
 0x425   : > { %v1526_v16 = vadd.f32 %v1525_v14, %v1524_v13 }
 0x427   : > { %v1528_v18 = vadd.f32 %v1527_v17, %v1526_v16 }
 0x429   : > { %v1530_v21 = vadd.f32 %v1529_v19, %v1528_v18 }
 0x42b   : > { %2032 = vrcp.f32 %v1530_v21 }
 0x438   : > { %v2033_v26 = vpop.eup %2032 }
 0x439   : > { %v1532_v35 = vmul.f32 %v2033_v26, %v2021_v4  ;;  %v1533_v36 = vmul.f32 %v2033_v26, %v2023_v5  ;;  %v1534_v37 = vmul.f32 %v2033_v26, %v2025_v7  ;;  %v1535_v38 = vmul.f32 %v2033_v26, %v2027_v9 }
 0x43a   : > { %v1536_v39 = vmul.f32 %v2033_v26, %v2029_v12  ;;  %v1537_v40 = vmul.f32 %v2033_v26, %v2031_v15 }
 0x43b   : > { %v1538_v41 = vmul.f32 %v1532_v35, %v1268_v28  ;;  %v1539_v42 = vmul.f32 %v1533_v36, %v1271_v30  ;;  %v1540_v43 = vmul.f32 %v1534_v37, %v1276_v32  ;;  %v1541_v45 = vmul.f32 %v1535_v38, %v1279_v34 }
 0x43c   : > { %v1542_v46 = vmul.f32 %v1536_v39, %v1284_v0  ;;  %v1543_v27 = vmul.f32 %v1537_v40, %v1287_v20 }
 0x43d   : > { %vm1544_vm0 = vcmp.gt.f32.partialorder %v1538_v41, 0.0  ;;  %vm1545_vm2 = vcmp.gt.f32.partialorder %v1539_v42, 0.0  ;;  %vm1546_vm3 = vcmp.gt.f32.partialorder %v1540_v43, 0.0  ;;  %v1550_v23 = vmul.f32 0.2, %v1538_v41 }
 0x43e   : > { %v1551_v25 = vmul.f32 0.2, %v1539_v42  ;;  %v1552_v47 = vmul.f32 0.2, %v1540_v43  ;;  %v1553_v48 = vmul.f32 0.2, %v1541_v45 }
 0x43f   : > { %vm1547_vm4 = vcmp.gt.f32.partialorder %v1541_v45, 0.0  ;;  %v1556_v33 = vsel %vm1544_vm0, %v1538_v41, %v1550_v23  ;;  %v1554_v49 = vmul.f32 0.2, %v1542_v46  ;;  %vm1548_vm5 = vcmp.gt.f32.partialorder %v1542_v46, 0.0 }
 0x440   : > { %v1557_v29 = vsel %vm1545_vm2, %v1539_v42, %v1551_v25  ;;  %v1558_v50 = vsel %vm1546_vm3, %v1540_v43, %v1552_v47  ;;  %v1562_v51 = vsel %vm769_vm1, %v1556_v33, 0.0  ;;  %v1555_v52 = vmul.f32 0.2, %v1543_v27 }
 0x441   : > { %v1563_v31 = vsel %vm769_vm1, %v1557_v29, 0.0  ;;  %v1559_v54 = vsel %vm1547_vm4, %v1541_v45, %v1553_v48  ;;  %vm1549_vm6 = vcmp.gt.f32.partialorder %v1543_v27, 0.0  ;;  %v1565_v55 = vsel %vm769_vm1, %v1558_v50, 0.0 }
 0x442   : > { %v1564_v44 = vadd.f32 %v1563_v31, %v1562_v51  ;;  %v1560_v56 = vsel %vm1548_vm5, %v1542_v46, %v1554_v49  ;;  %v1567_v58 = vsel %vm769_vm1, %v1559_v54, 0.0  ;;  %v1561_v59 = vsel %vm1549_vm6, %v1543_v27, %v1555_v52 }
 0x443   : > { %v1569_v61 = vsel %vm769_vm1, %v1560_v56, 0.0  ;;  %v1571_v63 = vsel %vm769_vm1, %v1561_v59, 0.0 }
 0x444   : > { %v1566_v57 = vadd.f32 %v1565_v55, %v1564_v44 }
 0x446   : > { %v1568_v60 = vadd.f32 %v1567_v58, %v1566_v57 }
 0x448   : > { %v1570_v62 = vadd.f32 %v1569_v61, %v1568_v60 }
 0x44a   : > { %v1572_v53 = vadd.f32 %v1571_v63, %v1570_v62 }
 0x44c   : > { %v1573_v1 = vadd.f32 %v1572_v53, %v2197_v22 }
 0x44e   : > { %v1574_v2 = vmul.f32 0.5, %v1573_v1 }
 0x450   : > { %1575 = vst.msk [vmem:[%s743_s23] sm:$0xff] %vm769_vm1, %v1574_v2 }
 0x451 PF: > { %s26_s21 = sadd.s32 1, %s2040_s21  }
 0x452   : > { %p23_p4 = scmp.ge.s32.totalorder %s26_s21, 6  }
 0x454   :  { %25 = sbr.rel (!%p23_p4) target bundleno = 2 (0x2), region = 153 }

// kernel: mymodel_forward.7
= control target key start
LH: loop header
LB: loop body
LE: loop exit
PB: predicated region body
PF: predicated region fallthrough
CT: control target
= control target key end

     0   :  { %v1278_v0 = vmov 0.0   ;;  %vm1279_vm0 = vmmov 0   ;;  %vm192_vm1 = vcmask 1043456   ;;  %vm64_vm2 = vcmask 261120   ;;  %s1496_s2 = inlined_call_operand.vmem [shape: bf16[32,32], index: 2, kind: input, shape index: {}]   ;;  %s1497_s0 = inlined_call_operand.vmem [shape: f32[8,32], index: 0, kind: input, shape index: {}]   ;;  %s1498_s6 = inlined_call_operand.vmem [shape: bf16[8,16], index: 6, kind: input, shape index: {}]   ;;  %s1499_s1 = inlined_call_operand.vmem [shape: f32[4,8], index: 1, kind: input, shape index: {}]   ;;  %s1500_s4 = inlined_call_operand.vmem [shape: bf16[32,32], index: 4, kind: input, shape index: {}]   ;;  %s1501_s8 = inlined_call_operand.vmem [shape: bf16[16,16], index: 8, kind: input, shape index: {}]   ;;  %s1502_s3 = inlined_call_operand.vmem [shape: f32[1,32], index: 3, kind: input, shape index: {}]   ;;  %s1503_s7 = inlined_call_operand.vmem [shape: f32[1,16], index: 7, kind: input, shape index: {}]   ;;  %s1504_s5 = inlined_call_operand.vmem [shape: f32[1,32], index: 5, kind: input, shape index: {}]   ;;  %s1505_s9 = inlined_call_operand.vmem [shape: f32[1,16], index: 9, kind: input, shape index: {}]   ;;  %s1506_s10 = inlined_call_operand.vmem [shape: f32[4,4], index: 10, kind: input, shape index: {}]   ;;  %s1507_s11 = inlined_call_operand.vmem [shape: f32[1,2], index: 11, kind: output, shape index: {}]  }
   0x1   :  { %1160 = vmatprep.subr.bf16.mxu0 %v1278_v0  ;;  %v1231_v1 = vld [vmem:[%s1496_s2 + $0x8] sm:$0xff]   ;;  %1164 = vmatprep.mubr.msk.bf16.mxu0 %vm1279_vm0, %v1278_v0  ;;  %v1232_v2 = vld [vmem:[%s1496_s2] sm:$0xff]   ;;  %vm188_vm3 = vcmask 64512   ;;  %vm255_vm6 = vcmask 130048   ;;  %vm307_vm7 = vcmask 130052   ;;  %vm300_vm8 = vcmask 125952  }
   0x2   :  { %1168 = vmatprep.subr.bf16.mxu1 %v1278_v0  ;;  %1172 = vmatprep.mubr.msk.bf16.mxu1 %vm1279_vm0, %v1278_v0  ;;  %v39_v3 = vld [vmem:[%s1497_s0] sm:$0xff]  ;;  %v1233_v9 = vld [vmem:[%s1500_s4 + $0x8] sm:$0xff]   ;;  %vm645_vm10 = vcmask 27648   ;;  %vm1096_vm11 = vcmask 7168   ;;  %vm1098_vm12 = vcmask 8192  }
   0x3   :  { %1161 = vmatpush3.bf16.msra.mxu0 %v1231_v1  ;;  %v180_v4 = vld [vmem:[%s1498_s6] sm:$0xf]  ;;  %v40_v5 = vpack.c.bf16 %v39_v3, %v39_v3  ;;  %1169 = vmatpush3.bf16.msra.mxu1 %v1233_v9 }
   0x4   :  { %1162 = vmatprep.subr.bf16.mxu0 %v1278_v0  ;;  %v194_v6 = vsel %vm192_vm1, %v180_v4, 0  ;;  %v178_v7 = vld [vmem:[%s1499_s1] sm:$0xf]  ;;  %1170 = vmatprep.subr.bf16.mxu1 %v1278_v0 }
   0x5   :  { %v179_v8 = vpack.c.bf16 %v178_v7, %v178_v7  ;;  %v1234_v10 = vld [vmem:[%s1500_s4] sm:$0xff]  }
   0x6   :  { %v1104_v11 = vld [vmem:[%s1502_s3] ss:$0 sm:$0xff] }
   0x7   :  { %1163 = vmatpush3.bf16.msra.mxu0 %v1232_v2  ;;  %1171 = vmatpush3.bf16.msra.mxu1 %v1234_v10  ;;  %v1235_v18 = vld [vmem:[%s1501_s8] sm:$0xff]   ;;  %s1280_s8 = smov 112  }
   0x8   :  { %1176 = vmatprep.subr.bf16.mxu0 %v1278_v0  ;;  %1182 = vmatprep.subr.bf16.mxu1 %v1278_v0  ;;  %v1112_v21 = vld [vmem:[%s1503_s7] ss:$0 sm:$0xff] }
   0x9   :  { %v1108_v30 = vld [vmem:[%s1504_s5] ss:$0 sm:$0xff] }
   0xa   :  { %1165 = vmatmul.mubr.msk.bf16.vlgmr.msra.gmra.mxu0 %vm64_vm2, %v40_v5  ;;  %v1114_v42 = vld [vmem:[%s1505_s9] ss:$0 sm:$0xff] }
   0xb   :  { %1177 = vmatpush3.bf16.msra.mxu0 %v194_v6  ;;  %1178 = vmatprep.mubr.msk.bf16.mxu0 %vm1279_vm0, %v1278_v0 }
   0xc   :  { %1188 = vmatprep.subr.mxu0 %v1278_v0 }
  0x12   :  { %1179 = vmatmul.mubr.msk.bf16.vlgmr.msra.gmra.mxu0 %vm188_vm3, %v179_v8 }
  0x13   :  { %1190 = vmatprep.mubr.msk.f32.mxu0 %vm1279_vm0, %v1278_v0 }
  0xca   :  { %v102_v12 = vpop.f32.mrf.mxu0 }
  0xcb   :  { %v103_v13 = vadd.f32 %v1104_v11, %v102_v12 }
  0xcc   :  { %v1166_v14 = vpop.f32.mrf.mxu0 }
  0xcd   :  { %vm108_vm4 = vcmp.gt.f32.partialorder %v103_v13, 0.0  ;;  %v109_v15 = vmul.f32 0.2, %v103_v13 }
  0xce   :  { %v105_v16 = vpop.f32.mrf.mxu0 }
  0xcf   :  { %v110_v17 = vsel %vm108_vm4, %v103_v13, %v109_v15 }
  0xd0   :  { %v111_v19 = vpack.c.bf16 %v110_v17, %v110_v17  ;;  %v1167_v20 = vpop.f32.mrf.mxu0 }
  0xd2   :  { %1173 = vmatmul.mubr.msk.bf16.vlgmr.msra.gmra.mxu1 %vm64_vm2, %v111_v19  ;;  %v230_v22 = vpop.f32.mrf.mxu0 }
  0xd3   :  { %v231_v23 = vadd.f32 %v1112_v21, %v230_v22  ;;  %1183 = vmatpush3.bf16.msra.mxu1 %v1235_v18  ;;  %1184 = vmatprep.mubr.msk.bf16.mxu1 %vm1279_vm0, %v1278_v0 }
  0xd4   :  { %v1180_v24 = vpop.f32.mrf.mxu0  ;;  %1193 = vmatprep.subr.mxu1 %v1278_v0 }
  0xd5   :  { %vm236_vm5 = vcmp.gt.f32.partialorder %v231_v23, 0.0  ;;  %v237_v25 = vmul.f32 0.2, %v231_v23  ;;  %v337_v24 = vlaneseq }
  0xd6   :  { %v233_v26 = vpop.f32.mrf.mxu0 }
  0xd7   :  { %v238_v27 = vsel %vm236_vm5, %v231_v23, %v237_v25 }
  0xd8   :  { %v239_v28 = vpack.c.bf16 %v238_v27, %v238_v27  ;;  %v1181_v29 = vpop.f32.mrf.mxu0  ;;  %v338_v27 = vshrl.u32 %v337_v24, 7 }
  0xda   :  { %1185 = vmatmul.mubr.msk.bf16.vlgmr.msra.gmra.mxu1 %vm255_vm6, %v239_v28  ;;  %v340_v28 = vand.u32 127, %v337_v24 }
  0xdb   :  { %1195 = vmatprep.mubr.msk.f32.mxu1 %vm1279_vm0, %v1278_v0 }
  0xdc   :  { %vm341_vm9 = vcmp.eq.s32.totalorder %v338_v27, %v340_v28 }
 0x192   :  { %v172_v31 = vpop.f32.mrf.mxu1 }
 0x193   :  { %v173_v32 = vadd.f32 %v1108_v30, %v172_v31  ;;  %v1441_v30 = vld [vmem:[%s1506_s10] sm:$0xf] }
 0x194   :  { %v1174_v33 = vpop.f32.mrf.mxu1 }
 0x195   :  { %v299_v34 = vmul.f32 %v173_v32, %v173_v32 }
 0x196   :  { %v175_v35 = vpop.f32.mrf.mxu1 }
 0x197   :  { %315 = vrot.lane.b32.xlu0 %v299_v34, %s1280_s8  ;;  %v308_v46 = vsel %vm307_vm7, %v299_v34, 0.0  ;;  %v301_v48 = vsel %vm300_vm8, %v299_v34, 0.0  ;;  %v1449_v34 = vsel %vm341_vm9, 1.0, %v1278_v0 }
 0x198   :  { %v1175_v36 = vpop.f32.mrf.mxu1 }
 0x19a   :  { %v293_v37 = vpop.f32.mrf.mxu1 }
 0x19b   :  { %v294_v45 = vadd.f32 %v1114_v42, %v293_v37 }
 0x19c   :  { %v1186_v38 = vpop.f32.mrf.mxu1 }
 0x19d   :  { %v330_v47 = vmul.f32 %v294_v45, %v294_v45 }
 0x19e   :  { %v296_v39 = vpop.f32.mrf.mxu1 }
 0x19f   :  { %v331_v49 = vsel %vm300_vm8, %v330_v47, 0.0 }
 0x1a0   :  { %v1187_v40 = vpop.f32.mrf.mxu1 }
 0x209   :  { %v316_v41 = vpop.permute.xlu0 %315 }
 0x20a   :  { %v324_v43 = vsel %vm307_vm7, %v316_v41, 0.0  ;;  %v318_v44 = vsel %vm300_vm8, %v316_v41, 0.0 }
 0x20b   :  { %325 = vadd.xlane.f32.xlu0 %v324_v43  ;;  %319 = vadd.xlane.f32.xlu1 %v318_v44 }
 0x20f   :  { %309 = vadd.xlane.f32.xlu1 %v308_v46 }
 0x213   :  { %302 = vadd.xlane.f32.xlu1 %v301_v48 }
 0x217   :  { %332 = vadd.xlane.f32.xlu1 %v331_v49 }
 0x294   :  { %v326_v50 = vpop.xlane.xlu0 %325  ;;  %v320_v51 = vpop.xlane.xlu1 %319 }
 0x295   :  { %v327_v52 = vmax.f32 %v326_v50, 1e-16  ;;  %v321_v53 = vmax.f32 %v320_v51, 1e-16 }
 0x297   :  { %1236 = vrsqrt.f32 %v327_v52 }
 0x298   :  { %1238 = vrsqrt.f32 %v321_v53  ;;  %v310_v54 = vpop.xlane.xlu1 %309 }
 0x299   :  { %v311_v55 = vmax.f32 %v310_v54, 1e-16 }
 0x29b   :  { %1240 = vrsqrt.f32 %v311_v55 }
 0x29c   :  { %v303_v56 = vpop.xlane.xlu1 %302 }
 0x29d   :  { %v304_v57 = vmax.f32 %v303_v56, 1e-16 }
 0x29f   :  { %1242 = vrsqrt.f32 %v304_v57 }
 0x2a0   :  { %v333_v5 = vpop.xlane.xlu1 %332 }
 0x2a1   :  { %v334_v6 = vmax.f32 %v333_v5, 1e-16 }
 0x2a3   :  { %1244 = vrsqrt.f32 %v334_v6 }
 0x2a4   :  { %v1237_v58 = vpop.eup %1236 }
 0x2a5   :  { %v1239_v59 = vpop.eup %1238  ;;  %v329_v61 = vmul.f32 %v1237_v58, %v173_v32 }
 0x2a6   :  { %v323_v60 = vmul.f32 %v1239_v59, %v173_v32 }
 0x2a7   :  { %v809_v1 = vrot.slane %v329_v61, 4 }
 0x2a8   :  { %v1241_v62 = vpop.eup %1240  ;;  %731 = vrot.lane.b32.xlu1 %v323_v60, %s1280_s8 }
 0x2a9   :  { %v313_v63 = vmul.f32 %v1241_v62, %v173_v32 }
 0x2ab   :  { %v422_v2 = vrot.slane %v313_v63, 4 }
 0x2ac   :  { %v1243_v3 = vpop.eup %1242  ;;  %810 = vrot.lane.b32.xlu1 %v809_v1, %s1280_s8 }
 0x2ad   :  { %1194 = vmatpush3.xpose.msk.msra.mxu1 %vm255_vm6, %v422_v2  ;;  %v306_v4 = vmul.f32 %v1243_v3, %v173_v32  ;;  %v663_v32 = vsub.f32 1.0, %v1441_v30 }
 0x2ae   :  { %1203 = vmatprep.subr.mxu1 %v1278_v0 }
 0x2af   :  { %1189 = vmatpush3.xpose.msk.msra.mxu0 %vm255_vm6, %v306_v4 }
 0x2b0   :  { %1196 = vmatmul.mubr.msk.f32.vlgmr.msra.gmra.mxu1 %vm255_vm6, %v422_v2  ;;  %1198 = vmatprep.subr.mxu0 %v1278_v0  ;;  %v1245_v7 = vpop.eup %1244 }
 0x2b1   :  { %1204 = vmatpush3.xpose.msk.msra.mxu1 %vm255_vm6, %v306_v4  ;;  %1205 = vmatprep.mubr.msk.f32.mxu1 %vm1279_vm0, %v1278_v0  ;;  %v336_v9 = vmul.f32 %v1245_v7, %v294_v45 }
 0x2b2   :  { %1191 = vmatmul.mubr.msk.f32.vlgmr.msra.gmra.mxu0 %vm255_vm6, %v306_v4  ;;  %1213 = vmatprep.subr.mxu1 %v1278_v0 }
 0x2b3   :  { %1199 = vmatpush3.xpose.msk.msra.mxu0 %vm255_vm6, %v422_v2  ;;  %1200 = vmatprep.mubr.msk.f32.mxu0 %vm1279_vm0, %v1278_v0 }
 0x2b4   :  { %1206 = vmatmul.mubr.msk.f32.vlgmr.msra.gmra.mxu1 %vm255_vm6, %v422_v2  ;;  %1208 = vmatprep.subr.mxu0 %v1278_v0 }
 0x2b5   :  { %1215 = vmatprep.mubr.msk.f32.mxu1 %vm1279_vm0, %v1278_v0 }
 0x2b6   :  { %1201 = vmatmul.mubr.msk.f32.vlgmr.msra.gmra.mxu0 %vm255_vm6, %v306_v4 }
 0x2b7   :  { %1210 = vmatprep.mubr.msk.f32.mxu0 %vm1279_vm0, %v1278_v0 }
 0x31a   :  { %v732_v8 = vpop.permute.xlu1 %731 }
 0x31b   :  { %1209 = vmatpush3.xpose.msk.msra.mxu0 %vm255_vm6, %v732_v8 }
 0x31c   :  { %1218 = vmatprep.subr.mxu0 %v1278_v0 }
 0x31e   :  { %1211 = vmatmul.mubr.msk.f32.vlgmr.msra.gmra.mxu0 %vm255_vm6, %v732_v8  ;;  %v811_v10 = vpop.permute.xlu1 %810 }
 0x31f   :  { %1214 = vmatpush3.xpose.msk.msra.mxu1 %vm255_vm6, %v811_v10  ;;  %1219 = vmatpush3.xpose.msk.msra.mxu0 %vm255_vm6, %v336_v9 }
 0x320   :  { %1220 = vmatprep.mubr.msk.f32.mxu0 %vm1279_vm0, %v1278_v0  ;;  %1223 = vmatprep.subr.mxu1 %v1278_v0 }
 0x322   :  { %1216 = vmatmul.mubr.msk.f32.vlgmr.msra.gmra.mxu1 %vm255_vm6, %v811_v10  ;;  %1221 = vmatmul.mubr.msk.f32.vlgmr.msra.gmra.mxu0 %vm255_vm6, %v732_v8 }
 0x323   :  { %1224 = vmatpush3.xpose.msk.msra.mxu1 %vm255_vm6, %v336_v9  ;;  %1225 = vmatprep.mubr.msk.f32.mxu1 %vm1279_vm0, %v1278_v0 }
 0x326   :  { %1226 = vmatmul.mubr.msk.f32.vlgmr.msra.gmra.mxu1 %vm255_vm6, %v811_v10 }
 0x370   :  { %v491_v11 = vpop.f32.mrf.mxu1 }
 0x371   :  { %v495_v12 = vmul.f32 2.0, %v491_v11 }
 0x372   :  { %v414_v13 = vpop.f32.mrf.mxu0  ;;  %v1197_v14 = vpop.f32.mrf.mxu1 }
 0x373   :  { %v496_v15 = vmul.f32 1.442695, %v495_v12  ;;  %v418_v16 = vmul.f32 2.0, %v414_v13 }
 0x374   :  { %v1192_v17 = vpop.f32.mrf.mxu0  ;;  %v637_v18 = vpop.f32.mrf.mxu1 }
 0x375   :  { %v419_v19 = vmul.f32 1.442695, %v418_v16  ;;  %1246 = vpow2.f32 %v496_v15  ;;  %v641_v25 = vmul.f32 2.0, %v637_v18 }
 0x376   :  { %v564_v20 = vpop.f32.mrf.mxu0  ;;  %v1207_v21 = vpop.f32.mrf.mxu1 }
 0x377   :  { %1248 = vpow2.f32 %v419_v19  ;;  %v568_v22 = vmul.f32 2.0, %v564_v20  ;;  %v642_v29 = vmul.f32 1.442695, %v641_v25 }
 0x378   :  { %v1202_v23 = vpop.f32.mrf.mxu0 }
 0x379   :  { %v569_v26 = vmul.f32 1.442695, %v568_v22 }
 0x37b   :  { %1250 = vpow2.f32 %v569_v26 }
 0x37c   :  { %1252 = vpow2.f32 %v642_v29 }
 0x382   :  { %v1443_v31 = vpop.eup %1246 }
 0x383   :  { %v709_v39 = vmul.f32 %v1443_v31, %v663_v32  ;;  %v687_v0 = vmul.f32 %v1443_v31, %v1449_v34  ;;  %v700_v16 = vmul.f32 %v1443_v31, %v1441_v30 }
 0x384   :  { %v1446_v33 = vpop.eup %1248 }
 0x385   :  { %v668_v35 = vmul.f32 %v1446_v33, %v663_v32  ;;  %v644_v36 = vmul.f32 %v1446_v33, %v1449_v34  ;;  %v710_v40 = vsel %vm645_vm10, %v709_v39, 0.0  ;;  %v688_v42 = vsel %vm645_vm10, %v687_v0, 0.0 }
 0x386   :  { %v701_v19 = vsel %vm645_vm10, %v700_v16, 0.0  ;;  %v658_v25 = vmul.f32 %v1446_v33, %v1441_v30 }
 0x387   :  { %v669_v37 = vsel %vm645_vm10, %v668_v35, 0.0  ;;  %v646_v38 = vsel %vm645_vm10, %v644_v36, 0.0 }
 0x388   :  { %670 = vadd.xlane.f32.xlu1 %v669_v37  ;;  %647 = vadd.xlane.f32.xlu0 %v646_v38  ;;  %v1251_v41 = vpop.eup %1250  ;;  %v659_v26 = vsel %vm645_vm10, %v658_v25, 0.0 }
 0x389   :  { %v664_v43 = vmul.f32 %v1251_v41, %v663_v32  ;;  %v1253_v44 = vpop.eup %1252  ;;  %v653_v8 = vmul.f32 %v1251_v41, %v1441_v30  ;;  %v649_v18 = vmul.f32 %v1251_v41, %v1449_v34 }
 0x38a   :  { %v705_v46 = vmul.f32 %v1253_v44, %v663_v32  ;;  %v695_v12 = vmul.f32 %v1253_v44, %v1441_v30  ;;  %v691_v22 = vmul.f32 %v1253_v44, %v1449_v34 }
 0x38b   :  { %v665_v45 = vsel %vm645_vm10, %v664_v43, 0.0  ;;  %v654_v11 = vsel %vm645_vm10, %v653_v8, 0.0  ;;  %v650_v21 = vsel %vm645_vm10, %v649_v18, 0.0 }
 0x38c   :  { %711 = vadd.xlane.f32.xlu0 %v710_v40  ;;  %v706_v47 = vsel %vm645_vm10, %v705_v46, 0.0  ;;  %v696_v15 = vsel %vm645_vm10, %v695_v12, 0.0  ;;  %v692_v24 = vsel %vm645_vm10, %v691_v22, 0.0 }
 0x390   :  { %689 = vadd.xlane.f32.xlu0 %v688_v42 }
 0x394   :  { %666 = vadd.xlane.f32.xlu0 %v665_v45 }
 0x398   :  { %707 = vadd.xlane.f32.xlu0 %v706_v47 }
 0x3de   :  { %v801_v48 = vpop.f32.mrf.mxu0 }
 0x3df   :  { %v805_v49 = vmul.f32 2.0, %v801_v48 }
 0x3e0   :  { %v1212_v50 = vpop.f32.mrf.mxu0 }
 0x3e1   :  { %v806_v51 = vmul.f32 1.442695, %v805_v49 }
 0x3e2   :  { %v880_v52 = vpop.f32.mrf.mxu1  ;;  %v956_v53 = vpop.f32.mrf.mxu0 }
 0x3e3   :  { %1254 = vpow2.f32 %v806_v51  ;;  %v884_v54 = vmul.f32 2.0, %v880_v52  ;;  %v960_v55 = vmul.f32 2.0, %v956_v53 }
 0x3e4   :  { %v1217_v56 = vpop.f32.mrf.mxu1  ;;  %v1222_v57 = vpop.f32.mrf.mxu0 }
 0x3e5   :  { %v885_v58 = vmul.f32 1.442695, %v884_v54  ;;  %v961_v59 = vmul.f32 1.442695, %v960_v55 }
 0x3e6   :  { %v1029_v60 = vpop.f32.mrf.mxu1 }
 0x3e7   :  { %1256 = vpow2.f32 %v885_v58  ;;  %v1033_v61 = vmul.f32 2.0, %v1029_v60 }
 0x3e8   :  { %v1227_v62 = vpop.f32.mrf.mxu1  ;;  %1258 = vpow2.f32 %v961_v59 }
 0x3e9   :  { %v1034_v63 = vmul.f32 1.442695, %v1033_v61 }
 0x3eb   :  { %1260 = vpow2.f32 %v1034_v63 }
 0x3f0   :  { %v1255_v1 = vpop.eup %1254 }
 0x3f1   :  { %v1044_v2 = vsel %vm645_vm10, %v1255_v1, 0.0  ;;  %v1036_v14 = vmul.f32 %v1255_v1, %v1449_v34 }
 0x3f2   :  { %1045 = vadd.xlane.f32.xlu0 %v1044_v2 }
 0x3f3   :  { %v1037_v17 = vsel %vm645_vm10, %v1036_v14, 0.0 }
 0x3f4   :  { %v1257_v3 = vpop.eup %1256 }
 0x3f5   :  { %v1073_v4 = vsel %vm645_vm10, %v1257_v3, 0.0  ;;  %v1065_v5 = vmul.f32 %v1257_v3, %v1449_v34  ;;  %v1259_v6 = vpop.eup %1258 }
 0x3f6   :  { %1074 = vadd.xlane.f32.xlu0 %v1073_v4  ;;  %v1047_v9 = vsel %vm645_vm10, %v1259_v6, 0.0  ;;  %v1040_v27 = vmul.f32 %v1259_v6, %v1449_v34 }
 0x3f7   :  { %v1066_v7 = vsel %vm645_vm10, %v1065_v5, 0.0 }
 0x3f8   :  { %1067 = vadd.xlane.f32.xlu1 %v1066_v7  ;;  %v1261_v10 = vpop.eup %1260  ;;  %v1041_v28 = vsel %vm645_vm10, %v1040_v27, 0.0 }
 0x3f9   :  { %v1076_v13 = vsel %vm645_vm10, %v1261_v10, 0.0  ;;  %v1069_v20 = vmul.f32 %v1261_v10, %v1449_v34 }
 0x3fa   :  { %1048 = vadd.xlane.f32.xlu0 %v1047_v9 }
 0x3fb   :  { %v1070_v23 = vsel %vm645_vm10, %v1069_v20, 0.0 }
 0x3fc   :  { %655 = vadd.xlane.f32.xlu1 %v654_v11 }
 0x3fe   :  { %1077 = vadd.xlane.f32.xlu0 %v1076_v13 }
 0x400   :  { %697 = vadd.xlane.f32.xlu1 %v696_v15 }
 0x402   :  { %1038 = vadd.xlane.f32.xlu0 %v1037_v17 }
 0x404   :  { %702 = vadd.xlane.f32.xlu1 %v701_v19 }
 0x406   :  { %651 = vadd.xlane.f32.xlu0 %v650_v21 }
 0x408   :  { %1071 = vadd.xlane.f32.xlu1 %v1070_v23 }
 0x40a   :  { %693 = vadd.xlane.f32.xlu0 %v692_v24 }
 0x40e   :  { %660 = vadd.xlane.f32.xlu0 %v659_v26 }
 0x411   :  { %v648_v29 = vpop.xlane.xlu0 %647  ;;  %v671_v38 = vpop.xlane.xlu1 %670 }
 0x412   :  { %1042 = vadd.xlane.f32.xlu0 %v1041_v28 }
 0x415   :  { %v712_v31 = vpop.xlane.xlu0 %711 }
 0x419   :  { %v690_v32 = vpop.xlane.xlu0 %689 }
 0x41d   :  { %v667_v35 = vpop.xlane.xlu0 %666 }
 0x41e   :  { %v672_v30 = vadd.f32 %v671_v38, %v667_v35 }
 0x420   :  { %v673_v42 = vsub.f32 %v672_v30, %v648_v29 }
 0x421   :  { %v708_v36 = vpop.xlane.xlu0 %707 }
 0x422   :  { %v713_v0 = vadd.f32 %v712_v31, %v708_v36 }
 0x424   :  { %v714_v41 = vsub.f32 %v713_v0, %v690_v32 }
 0x426   :  { %1262 = vrcp.f32 %v714_v41 }
 0x427   :  { %1264 = vrcp.f32 %v673_v42 }
 0x433   :  { %v1263_v56 = vpop.eup %1262 }
 0x434   :  { %v1265_v58 = vpop.eup %1264 }
 0x47b   :  { %v1046_v37 = vpop.xlane.xlu0 %1045 }
 0x47f   :  { %v1075_v39 = vpop.xlane.xlu0 %1074 }
 0x481   :  { %v1068_v40 = vpop.xlane.xlu1 %1067 }
 0x483   :  { %v1049_v33 = vpop.xlane.xlu0 %1048 }
 0x484   :  { %v1050_v45 = vadd.f32 %v1049_v33, %v1046_v37 }
 0x485   :  { %v656_v43 = vpop.xlane.xlu1 %655 }
 0x487   :  { %v1078_v34 = vpop.xlane.xlu0 %1077 }
 0x488   :  { %v1079_v44 = vadd.f32 %v1078_v34, %v1075_v39 }
 0x489   :  { %v698_v49 = vpop.xlane.xlu1 %697 }
 0x48a   :  { %v1080_v46 = vsub.f32 %v1079_v44, %v1068_v40 }
 0x48b   :  { %v1039_v47 = vpop.xlane.xlu0 %1038 }
 0x48c   :  { %1266 = vrcp.f32 %v1080_v46  ;;  %v1051_v48 = vsub.f32 %v1050_v45, %v1039_v47 }
 0x48d   :  { %v703_v51 = vpop.xlane.xlu1 %702 }
 0x48e   :  { %1268 = vrcp.f32 %v1051_v48 }
 0x48f   :  { %v652_v50 = vpop.xlane.xlu0 %651 }
 0x490   :  { %v657_v54 = vadd.f32 %v656_v43, %v652_v50 }
 0x491   :  { %v1072_v62 = vpop.xlane.xlu1 %1071 }
 0x493   :  { %v694_v52 = vpop.xlane.xlu0 %693 }
 0x494   :  { %v699_v53 = vadd.f32 %v698_v49, %v694_v52 }
 0x496   :  { %v704_v55 = vadd.f32 %v703_v51, %v699_v53 }
 0x497   :  { %v661_v57 = vpop.xlane.xlu0 %660 }
 0x498   :  { %v716_v59 = vmul.f32 %v1263_v56, %v704_v55  ;;  %v662_v60 = vadd.f32 %v661_v57, %v657_v54 }
 0x499   :  { %v1267_v61 = vpop.eup %1266 }
 0x49a   :  { %v1082_v63 = vmul.f32 %v1267_v61, %v1072_v62  ;;  %1270 = vlog2.f32 %v716_v59  ;;  %v675_v1 = vmul.f32 %v1265_v58, %v662_v60 }
 0x49b   :  { %v1269_v2 = vpop.eup %1268  ;;  %v1043_v3 = vpop.xlane.xlu0 %1042 }
 0x49c   :  { %1272 = vlog2.f32 %v1082_v63  ;;  %v1053_v4 = vmul.f32 %v1269_v2, %v1043_v3 }
 0x49d   :  { %1274 = vlog2.f32 %v675_v1 }
 0x49e   :  { %1276 = vlog2.f32 %v1053_v4 }
 0x4a7   :  { %v1271_v5 = vpop.eup %1270 }
 0x4a8   :  { %v718_v6 = vmul.f32 0.6931472, %v1271_v5 }
 0x4a9   :  { %v1273_v7 = vpop.eup %1272 }
 0x4aa   :  { %v1275_v8 = vpop.eup %1274  ;;  %v1084_v9 = vmul.f32 0.6931472, %v1273_v7  ;;  %v719_v10 = vsub.f32 0.0, %v718_v6 }
 0x4ab   :  { %v1277_v11 = vpop.eup %1276  ;;  %v677_v12 = vmul.f32 0.6931472, %v1275_v8 }
 0x4ac   :  { %v1085_v13 = vsub.f32 0.0, %v1084_v9  ;;  %v720_v14 = vsel %vm192_vm1, %v719_v10, 0.0  ;;  %v1055_v15 = vmul.f32 0.6931472, %v1277_v11 }
 0x4ad   :  { %v721_v16 = vrot.slane %v720_v14, 4  ;;  %v678_v17 = vsub.f32 0.0, %v677_v12 }
 0x4ae   :  { %v1086_v18 = vsel %vm192_vm1, %v1085_v13, 0.0  ;;  %v1056_v19 = vsub.f32 0.0, %v1055_v15 }
 0x4af   :  { %v1087_v20 = vrot.slane %v1086_v18, 4  ;;  %v722_v21 = vadd.f32 %v721_v16, %v720_v14  ;;  %v679_v22 = vsel %vm192_vm1, %v678_v17, 0.0 }
 0x4b0   :  { %v680_v23 = vrot.slane %v679_v22, 4  ;;  %v1057_v24 = vsel %vm192_vm1, %v1056_v19, 0.0 }
 0x4b1   :  { %v1088_v25 = vadd.f32 %v1087_v20, %v1086_v18  ;;  %v723_v26 = vrot.slane %v722_v21, 2  ;;  %v1058_v27 = vrot.slane %v1057_v24, 4 }
 0x4b2   :  { %v681_v28 = vadd.f32 %v680_v23, %v679_v22 }
 0x4b3   :  { %v1089_v29 = vrot.slane %v1088_v25, 2  ;;  %v724_v31 = vadd.f32 %v723_v26, %v722_v21  ;;  %v1059_v32 = vadd.f32 %v1058_v27, %v1057_v24 }
 0x4b4   :  { %v682_v35 = vrot.slane %v681_v28, 2 }
 0x4b5   :  { %v1090_v36 = vadd.f32 %v1089_v29, %v1088_v25  ;;  %v725_v37 = vrot.slane %v724_v31, 1  ;;  %v1060_v38 = vrot.slane %v1059_v32, 2 }
 0x4b6   :  { %v683_v39 = vadd.f32 %v682_v35, %v681_v28 }
 0x4b7   :  { %v1091_v40 = vrot.slane %v1090_v36, 1  ;;  %v1061_v0 = vadd.f32 %v1060_v38, %v1059_v32  ;;  %v726_v30 = vadd.f32 %v725_v37, %v724_v31 }
 0x4b8   :  { %v684_v33 = vrot.slane %v683_v39, 1 }
 0x4b9   :  { %v1092_v41 = vadd.f32 %v1091_v40, %v1090_v36  ;;  %v1062_v42 = vrot.slane %v1061_v0, 1  ;;  %v727_v44 = vmul.f32 0.25, %v726_v30 }
 0x4ba   :  { %v685_v43 = vadd.f32 %v684_v33, %v683_v39 }
 0x4bb   :  { %v1063_v34 = vadd.f32 %v1062_v42, %v1061_v0  ;;  %v1093_v46 = vmul.f32 0.25, %v1092_v41 }
 0x4bc   :  { %v686_v45 = vmul.f32 0.25, %v685_v43 }
 0x4bd   :  { %v1064_v47 = vmul.f32 0.25, %v1063_v34 }
 0x4be   :  { %v728_v48 = vadd.f32 %v727_v44, %v686_v45 }
 0x4bf   :  { %v1094_v49 = vadd.f32 %v1093_v46, %v1064_v47 }
 0x4c0   :  { %v729_v50 = vmul.f32 0.5, %v728_v48 }
 0x4c1   :  { %v1095_v51 = vmul.f32 0.5, %v1094_v49 }
 0x4c3   :  { %v1097_v52 = vsel %vm1096_vm11, %v729_v50, %v1095_v51 }
 0x4c4   :  { %1099 = vst.msk [vmem:[%s1507_s11] sm:$0x1] %vm1098_vm12, %v1097_v52 }

</bundles_post_ra>
